<compile_context>
chip_gen: v7x
topology: tpu7x:2x2x1
jax: 0.10.0
libtpu: 0.0.40
codegen_flags: <defaults>
</compile_context>

<pallas_src>
import math

import jax
import jax.numpy as jnp
import numpy as np
from jax import lax
from jax.experimental import pallas as pl
from jax.experimental.pallas import tpu as pltpu


def _conv_out(size, k, s):
    return (size - k) // s + 1


# ----------------------------------------------------------------------------
# Parameter init (xavier_uniform weights, zero biases) — PyTorch-natural layouts
# ----------------------------------------------------------------------------
def xavier_uniform(key, shape, fan_in, fan_out):
    bound = math.sqrt(6.0 / (fan_in + fan_out))
    return jax.random.uniform(key, shape, jnp.float32, -bound, bound)


def init_params(key, input_shape, num_cells_cnn, kernel_sizes, strides,
                num_cells_mlp, num_outputs):
    # NOTE: the torch module unpacks input_shape as (channels, width, height) but the
    # tensor is consumed as (B, C, H, W).  For the square config used here this is
    # equivalent; we treat input_shape as (C, dim1, dim2) of the NCHW tensor.
    channels, d1, d2 = input_shape
    params = {"conv": [], "fc": [], "strides": list(strides),
              "kernel_sizes": list(kernel_sizes)}
    in_c, h_o, w_o = channels, d1, d2
    keys = jax.random.split(key, len(num_cells_cnn) + len(num_cells_mlp) + 1)
    ki = 0
    for out_c, k, s in zip(num_cells_cnn, kernel_sizes, strides):
        fan_in, fan_out = in_c * k * k, out_c * k * k
        wgt = xavier_uniform(keys[ki], (out_c, in_c, k, k), fan_in, fan_out)
        ki += 1
        params["conv"].append((wgt, jnp.zeros((out_c,), jnp.float32)))
        in_c = out_c
        h_o = _conv_out(h_o, k, s)
        w_o = _conv_out(w_o, k, s)
    in_features = h_o * w_o * num_cells_cnn[-1]
    for units in num_cells_mlp:
        wgt = xavier_uniform(keys[ki], (units, in_features), in_features, units)
        ki += 1
        params["fc"].append((wgt, jnp.zeros((units,), jnp.float32)))
        in_features = units
    wgt = xavier_uniform(keys[ki], (num_outputs, in_features), in_features, num_outputs)
    params["out"] = (wgt, jnp.zeros((num_outputs,), jnp.float32))
    return params


# ----------------------------------------------------------------------------
# One-time preprocessing: fold every layer into a GEMM-ready (matrix, bias_row) pair
# ----------------------------------------------------------------------------
def _gather_matrix(hin, win, k, s):
    """g[t=(i*k+j), q=hw_in, p=hw_out] = 1  iff  input pixel q is tap t of output pixel p."""
    oh, ow = _conv_out(hin, k, s), _conv_out(win, k, s)
    g = np.zeros((k * k, hin * win, oh * ow), np.float32)
    for i in range(k):
        for j in range(k):
            for a in range(oh):
                for b in range(ow):
                    g[i * k + j, (s * a + i) * win + (s * b + j), a * ow + b] = 1.0
    return g, oh, ow


def prepare_kernel_operands(params, input_shape):
    channels, d1, d2 = input_shape
    hin, win, in_c = d1, d2, channels
    layers = []  # list of (matrix (in_feat, out_feat), bias_row (1, out_feat))

    # Conv layers -> embedded-weight im2col matrices (one dense GEMM per conv layer).
    for (wgt, bias), k, s in zip(params["conv"], params["kernel_sizes"], params["strides"]):
        oc = int(wgt.shape[0])
        g, oh, ow = _gather_matrix(hin, win, k, s)
        pin, pout = hin * win, oh * ow
        wt = np.asarray(wgt, np.float32).reshape(oc, in_c, k * k).transpose(2, 0, 1)  # (kk,oc,ic)
        m = np.einsum("toi,tqp->iqop", wt, g).reshape(in_c * pin, oc * pout)
        brow = np.repeat(np.asarray(bias, np.float32), pout)[None, :]
        layers.append((jnp.asarray(m), jnp.asarray(brow)))
        in_c, hin, win = oc, oh, ow

    n_conv = len(layers)
    rep_dim = in_c * hin * win  # NCHW flatten size == lane dim of the last conv activation

    # FC layers then output head: plain (features-in, features-out) GEMMs.
    for wgt, bias in list(params["fc"]) + [params["out"]]:
        layers.append((jnp.asarray(np.asarray(wgt, np.float32).T),
                       jnp.asarray(np.asarray(bias, np.float32)[None, :])))

    geom = dict(C=channels, HW=d1 * d2, REP=rep_dim,
                NOUT=int(params["out"][0].shape[0]), N_CONV=n_conv)
    return layers, geom


# ----------------------------------------------------------------------------
# The single fused Pallas kernel (one grid step = one batch tile, whole network)
# ----------------------------------------------------------------------------
def _build_kernel(n_layers, n_conv):
    def kernel(*refs):
        x_ref = refs[0]
        layer_refs = [(refs[1 + 2 * i], refs[2 + 2 * i]) for i in range(n_layers)]
        q_ref = refs[1 + 2 * n_layers]
        rep_ref = refs[2 + 2 * n_layers]

        act = x_ref[...]                                        # (TB, C*H*W) f32
        for li, (w_ref, b_ref) in enumerate(layer_refs):
            act = jnp.dot(act, w_ref[...],
                          preferred_element_type=jnp.float32) + b_ref[...]
            if li < n_layers - 1:                               # ReLU on all but output head
                act = jnp.maximum(act, 0.0)
            if li == n_conv - 1:                                # MICO representation tap
                rep_ref[...] = act                              # == NCHW flatten (row-major)
        q_ref[...] = act                                        # (TB, num_outputs)

    return kernel


def _pick_batch_tile(batch):
    for tb in (128, 64, 32, 16, 8):
        if batch % tb == 0:
            return tb
    return batch


def mico_dqn_forward(layers, geom, x, enable_mico=True):
    # TODO(synk): BatchNorm2d branch (use_batch_norm=True) and the unbatched 3-D input
    # path of forward() are not implemented; batched NCHW inference path only.
    B = x.shape[0]
    C, HW = geom["C"], geom["HW"]
    NOUT, REP, n_conv = geom["NOUT"], geom["REP"], geom["N_CONV"]
    x2 = x.reshape(B, C * HW)                                   # contiguous reshape only

    n_layers = len(layers)
    kernel = _build_kernel(n_layers, n_conv)

    tb = _pick_batch_tile(B)
    grid = (B // tb,)

    operands = [x2]
    in_specs = [pl.BlockSpec((tb, C * HW), lambda i: (i, 0))]
    for mat, brow in layers:                                    # weights resident across steps
        operands.append(mat)
        in_specs.append(pl.BlockSpec(mat.shape, lambda i: (0, 0)))
        operands.append(brow)
        in_specs.append(pl.BlockSpec(brow.shape, lambda i: (0, 0)))

    out_shape = (jax.ShapeDtypeStruct((B, NOUT), jnp.float32),
                 jax.ShapeDtypeStruct((B, REP), jnp.float32))
    out_specs = (pl.BlockSpec((tb, NOUT), lambda i: (i, 0)),
                 pl.BlockSpec((tb, REP), lambda i: (i, 0)))

    q, rep = pl.pallas_call(
        kernel,
        out_shape=out_shape,
        grid=grid,
        in_specs=in_specs,
        out_specs=out_specs,
        compiler_params=pltpu.CompilerParams(
            dimension_semantics=("parallel",),
            vmem_limit_bytes=32 * 1024 * 1024),
    )(*operands)

    return (q, rep) if enable_mico else q


# ----------------------------------------------------------------------------
# Pure-JAX reference (for correctness check)
# ----------------------------------------------------------------------------
def reference_forward(params, x, enable_mico=True):
    for (w, b), s in zip(params["conv"], params["strides"]):
        x = lax.conv_general_dilated(
            x, w, window_strides=(s, s), padding="VALID",
            dimension_numbers=("NCHW", "OIHW", "NCHW"))
        x = jnp.maximum(x + b[None, :, None, None], 0.0)
    B = x.shape[0]
    x = x.reshape(B, -1)
    rep = x
    for w, b in params["fc"]:
        x = jnp.maximum(x @ w.T + b, 0.0)
    w, b = params["out"]
    q = x @ w.T + b
    return (q, rep) if enable_mico else q


if __name__ == "__main__":
    # Small, module-consistent configuration.
    input_shape = (4, 16, 16)      # (channels, spatial, spatial); tensor is NCHW
    num_cells_cnn = [16, 32]
    kernel_sizes = [4, 3]
    strides = [2, 1]
    num_cells_mlp = [32]
    num_outputs = 6
    batch = 2

    key = jax.random.PRNGKey(0)
    pkey, xkey = jax.random.split(key)
    params = init_params(pkey, input_shape, num_cells_cnn, kernel_sizes,
                         strides, num_cells_mlp, num_outputs)
    layers, geom = prepare_kernel_operands(params, input_shape)

    x = jax.random.normal(xkey, (batch,) + input_shape, jnp.float32)  # (2, 4, 16, 16)

    fwd = jax.jit(lambda ls, xx: mico_dqn_forward(ls, geom, xx, enable_mico=True))
    q_values, representation = fwd(layers, x)
    q_values = jax.block_until_ready(q_values)
    representation = jax.block_until_ready(representation)

    q_ref, rep_ref = reference_forward(params, x, enable_mico=True)
    np.testing.assert_allclose(np.asarray(q_values), np.asarray(q_ref),
                               rtol=1e-3, atol=1e-3)
    np.testing.assert_allclose(np.asarray(representation), np.asarray(rep_ref),
                               rtol=1e-3, atol=1e-3)

    assert q_values.shape == (batch, num_outputs)
    assert representation.shape == (batch, 5 * 5 * num_cells_cnn[-1])
    print("KERNEL_OK")
</pallas_src>

<mosaic_0001>
module attributes {stable_mosaic.version = 11 : i64} {
  func.func @kernel(%arg0: i32, %arg1: memref<2x1024xf32, #tpu.memory_space<vmem>>, %arg2: memref<1024x784xf32, #tpu.memory_space<vmem>>, %arg3: memref<1x784xf32, #tpu.memory_space<vmem>>, %arg4: memref<784x800xf32, #tpu.memory_space<vmem>>, %arg5: memref<1x800xf32, #tpu.memory_space<vmem>>, %arg6: memref<800x32xf32, #tpu.memory_space<vmem>>, %arg7: memref<1x32xf32, #tpu.memory_space<vmem>>, %arg8: memref<32x6xf32, #tpu.memory_space<vmem>>, %arg9: memref<1x6xf32, #tpu.memory_space<vmem>>, %arg10: memref<2x6xf32, #tpu.memory_space<vmem>>, %arg11: memref<2x800xf32, #tpu.memory_space<vmem>>) attributes {dimension_semantics = [#tpu.dimension_semantics<parallel>], iteration_bounds = array<i64: 1>, scalar_prefetch = 0 : i64, scratch_operands = 0 : i64, tpu.core_type = #tpu.core_type<tc>, window_params = [{transform_indices = @transform_0, window_bounds = array<i64: 2, 1024>}, {pipeline_mode = #tpu.pipeline_mode<synchronous>, transform_indices = @transform_1, window_bounds = array<i64: 1024, 784>}, {pipeline_mode = #tpu.pipeline_mode<synchronous>, transform_indices = @transform_2, window_bounds = array<i64: 1, 784>}, {pipeline_mode = #tpu.pipeline_mode<synchronous>, transform_indices = @transform_3, window_bounds = array<i64: 784, 800>}, {pipeline_mode = #tpu.pipeline_mode<synchronous>, transform_indices = @transform_4, window_bounds = array<i64: 1, 800>}, {pipeline_mode = #tpu.pipeline_mode<synchronous>, transform_indices = @transform_5, window_bounds = array<i64: 800, 32>}, {pipeline_mode = #tpu.pipeline_mode<synchronous>, transform_indices = @transform_6, window_bounds = array<i64: 1, 32>}, {pipeline_mode = #tpu.pipeline_mode<synchronous>, transform_indices = @transform_7, window_bounds = array<i64: 32, 6>}, {pipeline_mode = #tpu.pipeline_mode<synchronous>, transform_indices = @transform_8, window_bounds = array<i64: 1, 6>}, {transform_indices = @transform_9, window_bounds = array<i64: 2, 6>}, {transform_indices = @transform_10, window_bounds = array<i64: 2, 800>}]} {
    %c0 = arith.constant 0 : index
    %c0_0 = arith.constant 0 : index
    %0 = vector.load %arg1[%c0, %c0_0] : memref<2x1024xf32, #tpu.memory_space<vmem>>, vector<2x1024xf32>
    %c0_1 = arith.constant 0 : index
    %c0_2 = arith.constant 0 : index
    %1 = vector.load %arg2[%c0_1, %c0_2] : memref<1024x784xf32, #tpu.memory_space<vmem>>, vector<1024x784xf32>
    %cst = arith.constant dense<0.000000e+00> : vector<2x784xf32>
    %2 = tpu.matmul %0, %1, %cst {dimension_numbers = #tpu.dot_dimension_numbers<[1], [0], [0], [1], [0, 0, 1, 1], [], []>} : vector<2x1024xf32>, vector<1024x784xf32>, vector<2x784xf32> -> vector<2x784xf32>
    %c0_3 = arith.constant 0 : index
    %c0_4 = arith.constant 0 : index
    %3 = vector.load %arg3[%c0_3, %c0_4] : memref<1x784xf32, #tpu.memory_space<vmem>>, vector<1x784xf32>
    %4 = vector.broadcast %3 : vector<1x784xf32> to vector<2x784xf32>
    %5 = arith.addf %2, %4 : vector<2x784xf32>
    %cst_5 = arith.constant 0.000000e+00 : f32
    %6 = vector.broadcast %cst_5 : f32 to vector<2x784xf32>
    %7 = arith.maximumf %5, %6 : vector<2x784xf32>
    %c0_6 = arith.constant 0 : index
    %c0_7 = arith.constant 0 : index
    %8 = vector.load %arg4[%c0_6, %c0_7] : memref<784x800xf32, #tpu.memory_space<vmem>>, vector<784x800xf32>
    %cst_8 = arith.constant dense<0.000000e+00> : vector<2x800xf32>
    %9 = tpu.matmul %7, %8, %cst_8 {dimension_numbers = #tpu.dot_dimension_numbers<[1], [0], [0], [1], [0, 0, 1, 1], [], []>} : vector<2x784xf32>, vector<784x800xf32>, vector<2x800xf32> -> vector<2x800xf32>
    %c0_9 = arith.constant 0 : index
    %c0_10 = arith.constant 0 : index
    %10 = vector.load %arg5[%c0_9, %c0_10] : memref<1x800xf32, #tpu.memory_space<vmem>>, vector<1x800xf32>
    %11 = vector.broadcast %10 : vector<1x800xf32> to vector<2x800xf32>
    %12 = arith.addf %9, %11 : vector<2x800xf32>
    %cst_11 = arith.constant 0.000000e+00 : f32
    %13 = vector.broadcast %cst_11 : f32 to vector<2x800xf32>
    %14 = arith.maximumf %12, %13 : vector<2x800xf32>
    %c0_12 = arith.constant 0 : index
    %c0_13 = arith.constant 0 : index
    %15 = vector.load %arg11[%c0_12, %c0_13] : memref<2x800xf32, #tpu.memory_space<vmem>>, vector<2x800xf32>
    tpu.vector_store %arg11[%c0_12, %c0_13], %14 {strides = array<i32>} : memref<2x800xf32, #tpu.memory_space<vmem>>, vector<2x800xf32>,
    %c0_14 = arith.constant 0 : index
    %c0_15 = arith.constant 0 : index
    %16 = vector.load %arg6[%c0_14, %c0_15] : memref<800x32xf32, #tpu.memory_space<vmem>>, vector<800x32xf32>
    %cst_16 = arith.constant dense<0.000000e+00> : vector<2x32xf32>
    %17 = tpu.matmul %14, %16, %cst_16 {dimension_numbers = #tpu.dot_dimension_numbers<[1], [0], [0], [1], [0, 0, 1, 1], [], []>} : vector<2x800xf32>, vector<800x32xf32>, vector<2x32xf32> -> vector<2x32xf32>
    %c0_17 = arith.constant 0 : index
    %c0_18 = arith.constant 0 : index
    %18 = vector.load %arg7[%c0_17, %c0_18] : memref<1x32xf32, #tpu.memory_space<vmem>>, vector<1x32xf32>
    %19 = vector.broadcast %18 : vector<1x32xf32> to vector<2x32xf32>
    %20 = arith.addf %17, %19 : vector<2x32xf32>
    %cst_19 = arith.constant 0.000000e+00 : f32
    %21 = vector.broadcast %cst_19 : f32 to vector<2x32xf32>
    %22 = arith.maximumf %20, %21 : vector<2x32xf32>
    %c0_20 = arith.constant 0 : index
    %c0_21 = arith.constant 0 : index
    %23 = vector.load %arg8[%c0_20, %c0_21] : memref<32x6xf32, #tpu.memory_space<vmem>>, vector<32x6xf32>
    %cst_22 = arith.constant dense<0.000000e+00> : vector<2x6xf32>
    %24 = tpu.matmul %22, %23, %cst_22 {dimension_numbers = #tpu.dot_dimension_numbers<[1], [0], [0], [1], [0, 0, 1, 1], [], []>} : vector<2x32xf32>, vector<32x6xf32>, vector<2x6xf32> -> vector<2x6xf32>
    %c0_23 = arith.constant 0 : index
    %c0_24 = arith.constant 0 : index
    %25 = vector.load %arg9[%c0_23, %c0_24] : memref<1x6xf32, #tpu.memory_space<vmem>>, vector<1x6xf32>
    %26 = vector.broadcast %25 : vector<1x6xf32> to vector<2x6xf32>
    %27 = arith.addf %24, %26 : vector<2x6xf32>
    %c0_25 = arith.constant 0 : index
    %c0_26 = arith.constant 0 : index
    %28 = vector.load %arg10[%c0_25, %c0_26] : memref<2x6xf32, #tpu.memory_space<vmem>>, vector<2x6xf32>
    tpu.vector_store %arg10[%c0_25, %c0_26], %27 {strides = array<i32>} : memref<2x6xf32, #tpu.memory_space<vmem>>, vector<2x6xf32>,
    return
  }
  func.func @transform_0(%arg0: i32) -> (i32, i32) {
    %c0_i32 = arith.constant 0 : i32
    %c0_i32_0 = arith.constant 0 : i32
    return %arg0, %c0_i32 : i32, i32
  }
  func.func @transform_1(%arg0: i32) -> (i32, i32) {
    %c0_i32 = arith.constant 0 : i32
    %c0_i32_0 = arith.constant 0 : i32
    %c0_i32_1 = arith.constant 0 : i32
    return %c0_i32, %c0_i32_0 : i32, i32
  }
  func.func @transform_2(%arg0: i32) -> (i32, i32) {
    %c0_i32 = arith.constant 0 : i32
    %c0_i32_0 = arith.constant 0 : i32
    %c0_i32_1 = arith.constant 0 : i32
    return %c0_i32, %c0_i32_0 : i32, i32
  }
  func.func @transform_3(%arg0: i32) -> (i32, i32) {
    %c0_i32 = arith.constant 0 : i32
    %c0_i32_0 = arith.constant 0 : i32
    %c0_i32_1 = arith.constant 0 : i32
    return %c0_i32, %c0_i32_0 : i32, i32
  }
  func.func @transform_4(%arg0: i32) -> (i32, i32) {
    %c0_i32 = arith.constant 0 : i32
    %c0_i32_0 = arith.constant 0 : i32
    %c0_i32_1 = arith.constant 0 : i32
    return %c0_i32, %c0_i32_0 : i32, i32
  }
  func.func @transform_5(%arg0: i32) -> (i32, i32) {
    %c0_i32 = arith.constant 0 : i32
    %c0_i32_0 = arith.constant 0 : i32
    %c0_i32_1 = arith.constant 0 : i32
    return %c0_i32, %c0_i32_0 : i32, i32
  }
  func.func @transform_6(%arg0: i32) -> (i32, i32) {
    %c0_i32 = arith.constant 0 : i32
    %c0_i32_0 = arith.constant 0 : i32
    %c0_i32_1 = arith.constant 0 : i32
    return %c0_i32, %c0_i32_0 : i32, i32
  }
  func.func @transform_7(%arg0: i32) -> (i32, i32) {
    %c0_i32 = arith.constant 0 : i32
    %c0_i32_0 = arith.constant 0 : i32
    %c0_i32_1 = arith.constant 0 : i32
    return %c0_i32, %c0_i32_0 : i32, i32
  }
  func.func @transform_8(%arg0: i32) -> (i32, i32) {
    %c0_i32 = arith.constant 0 : i32
    %c0_i32_0 = arith.constant 0 : i32
    %c0_i32_1 = arith.constant 0 : i32
    return %c0_i32, %c0_i32_0 : i32, i32
  }
  func.func @transform_9(%arg0: i32) -> (i32, i32) {
    %c0_i32 = arith.constant 0 : i32
    %c0_i32_0 = arith.constant 0 : i32
    return %arg0, %c0_i32 : i32, i32
  }
  func.func @transform_10(%arg0: i32) -> (i32, i32) {
    %c0_i32 = arith.constant 0 : i32
    %c0_i32_0 = arith.constant 0 : i32
    return %arg0, %c0_i32 : i32, i32
  }
}

</mosaic_0001>

<bundles_post_ra>
// kernel: _lambda_.1
= control target key start
LH: loop header
LB: loop body
LE: loop exit
PB: predicated region body
PF: predicated region fallthrough
CT: control target
= control target key end

     0   :  { %16 = vsyncpa [#allocation3], 0  ;;  %s12148_s0 = inlined_call_operand.vmem [shape: f32[2,1024], index: 0, kind: input, shape index: {}]   ;;  %s12149_s1 = inlined_call_operand.vmem [shape: f32[1024,784], index: 1, kind: input, shape index: {}]   ;;  %s12150_s2 = inlined_call_operand.vmem [shape: f32[1,784], index: 2, kind: input, shape index: {}]   ;;  %s12151_s3 = inlined_call_operand.vmem [shape: f32[784,800], index: 3, kind: input, shape index: {}]   ;;  %s12152_s4 = inlined_call_operand.vmem [shape: f32[1,800], index: 4, kind: input, shape index: {}]   ;;  %s12153_s5 = inlined_call_operand.vmem [shape: f32[800,32], index: 5, kind: input, shape index: {}]   ;;  %s12154_s6 = inlined_call_operand.vmem [shape: f32[1,32], index: 6, kind: input, shape index: {}]   ;;  %s12155_s7 = inlined_call_operand.vmem [shape: f32[32,6], index: 7, kind: input, shape index: {}]   ;;  %s12156_s8 = inlined_call_operand.vmem [shape: f32[1,6], index: 8, kind: input, shape index: {}]   ;;  %s12157_s9 = inlined_call_operand.hbm [shape: f32[2,6], index: 9, kind: output, shape index: {0}]   ;;  %s12158_s10 = inlined_call_operand.hbm [shape: f32[2,800], index: 10, kind: output, shape index: {1}]  }
   0x1   :  { %v39_v0 = vld [vmem:[%s12149_s1 + $0x8] sm:$0xff]  ;;  %v46_v1 = vld [vmem:[%s12149_s1 + $0x40] sm:$0xff]  ;;  %v41_v2 = vld [vmem:[%s12149_s1 + $0x18] sm:$0xff] }
   0x2   :  { %v4974_v3 = vpack.c.bf16 %v46_v1, %v39_v0  ;;  %v48_v4 = vld [vmem:[%s12149_s1 + $0x50] sm:$0xff]  ;;  %v38_v5 = vld [vmem:[%s12149_s1] sm:$0xff]  ;;  %v45_v6 = vld [vmem:[%s12149_s1 + $0x38] sm:$0xff] }
   0x3   :  { %v5230_v7 = vpack.c.bf16 %v48_v4, %v41_v2  ;;  %v4976_v8 = vpack.c.bf16 %v45_v6, %v38_v5  ;;  %v40_v9 = vld [vmem:[%s12149_s1 + $0x10] sm:$0xff]  ;;  %v47_v10 = vld [vmem:[%s12149_s1 + $0x48] sm:$0xff]  ;;  %v53_v11 = vld [vmem:[%s12149_s1 + $0x78] sm:$0xff] }
   0x4   :  { %4975 = vmatprep.subr.bf16.mxu0 %v4974_v3  ;;  %v5232_v12 = vpack.c.bf16 %v47_v10, %v40_v9  ;;  %v60_v13 = vld [vmem:[%s12149_s1 + $0xb0] sm:$0xff]  ;;  %v55_v14 = vld [vmem:[%s12149_s1 + $0x88] sm:$0xff]  ;;  %v62_v15 = vld [vmem:[%s12149_s1 + $0xc0] sm:$0xff] }
   0x5   :  { %5231 = vmatprep.subr.bf16.mxu1 %v5230_v7  ;;  %4977 = vmatpush1.bf16.msra.mxu0 %v4976_v8  ;;  %v4978_v16 = vpack.c.bf16 %v60_v13, %v53_v11  ;;  %v5234_v17 = vpack.c.bf16 %v62_v15, %v55_v14  ;;  %v52_v18 = vld [vmem:[%s12149_s1 + $0x70] sm:$0xff]  ;;  %v59_v19 = vld [vmem:[%s12149_s1 + $0xa8] sm:$0xff]  ;;  %v54_v20 = vld [vmem:[%s12149_s1 + $0x80] sm:$0xff] }
   0x6   :  { %5233 = vmatpush1.bf16.msra.mxu1 %v5232_v12  ;;  %v4980_v21 = vpack.c.bf16 %v59_v19, %v52_v18  ;;  %v61_v22 = vld [vmem:[%s12149_s1 + $0xb8] sm:$0xff]  ;;  %v67_v23 = vld [vmem:[%s12149_s1 + $0xe8] sm:$0xff]  ;;  %v74_v24 = vld [vmem:[%s12149_s1 + $0x120] sm:$0xff] }
   0x7   :  { %4979 = vmatprep.subr.bf16.mxu0 %v4978_v16  ;;  %5235 = vmatprep.subr.bf16.mxu1 %v5234_v17  ;;  %v5236_v25 = vpack.c.bf16 %v61_v22, %v54_v20  ;;  %v4982_v26 = vpack.c.bf16 %v74_v24, %v67_v23  ;;  %v69_v27 = vld [vmem:[%s12149_s1 + $0xf8] sm:$0xff]  ;;  %v76_v28 = vld [vmem:[%s12149_s1 + $0x130] sm:$0xff]  ;;  %v66_v29 = vld [vmem:[%s12149_s1 + $0xe0] sm:$0xff] }
   0x8   :  { %v5238_v30 = vpack.c.bf16 %v76_v28, %v69_v27  ;;  %v73_v31 = vld [vmem:[%s12149_s1 + $0x118] sm:$0xff]  ;;  %v68_v32 = vld [vmem:[%s12149_s1 + $0xf0] sm:$0xff]  ;;  %v75_v33 = vld [vmem:[%s12149_s1 + $0x128] sm:$0xff] }
   0x9   :  { %4981 = vmatpush1.bf16.msra.mxu0 %v4980_v21  ;;  %v4984_v34 = vpack.c.bf16 %v73_v31, %v66_v29  ;;  %v81_v35 = vld [vmem:[%s12149_s1 + $0x158] sm:$0xff]  ;;  %v88_v36 = vld [vmem:[%s12149_s1 + $0x190] sm:$0xff]  ;;  %v83_v37 = vld [vmem:[%s12149_s1 + $0x168] sm:$0xff]  ;;  %v5240_v38 = vpack.c.bf16 %v75_v33, %v68_v32 }
   0xa   :  { %5237 = vmatpush1.bf16.msra.mxu1 %v5236_v25  ;;  %4983 = vmatprep.subr.bf16.mxu0 %v4982_v26  ;;  %v4986_v39 = vpack.c.bf16 %v88_v36, %v81_v35  ;;  %v90_v40 = vld [vmem:[%s12149_s1 + $0x1a0] sm:$0xff]  ;;  %v80_v41 = vld [vmem:[%s12149_s1 + $0x150] sm:$0xff]  ;;  %v87_v42 = vld [vmem:[%s12149_s1 + $0x188] sm:$0xff] }
   0xb   :  { %5239 = vmatprep.subr.bf16.mxu1 %v5238_v30  ;;  %v5242_v43 = vpack.c.bf16 %v90_v40, %v83_v37  ;;  %v82_v44 = vld [vmem:[%s12149_s1 + $0x160] sm:$0xff]  ;;  %v89_v45 = vld [vmem:[%s12149_s1 + $0x198] sm:$0xff]  ;;  %v95_v46 = vld [vmem:[%s12149_s1 + $0x1c8] sm:$0xff]  ;;  %v4988_v50 = vpack.c.bf16 %v87_v42, %v80_v41 }
   0xc   :  { %v102_v47 = vld [vmem:[%s12149_s1 + $0x200] sm:$0xff]  ;;  %v97_v48 = vld [vmem:[%s12149_s1 + $0x1d8] sm:$0xff]  ;;  %v104_v49 = vld [vmem:[%s12149_s1 + $0x210] sm:$0xff]  ;;  %v5244_v51 = vpack.c.bf16 %v89_v45, %v82_v44 }
   0xd   :  { %4985 = vmatpush1.bf16.msra.mxu0 %v4984_v34  ;;  %v4990_v52 = vpack.c.bf16 %v102_v47, %v95_v46  ;;  %v94_v53 = vld [vmem:[%s12149_s1 + $0x1c0] sm:$0xff]  ;;  %v101_v54 = vld [vmem:[%s12149_s1 + $0x1f8] sm:$0xff]  ;;  %v96_v55 = vld [vmem:[%s12149_s1 + $0x1d0] sm:$0xff]  ;;  %v5246_v56 = vpack.c.bf16 %v104_v49, %v97_v48  ;;  %v936_v46 = vlaneseq  ;;  %v6770_v47 = vmov 1983009808  }
   0xe   :  { %5241 = vmatpush1.bf16.msra.mxu1 %v5240_v38  ;;  %4987 = vmatprep.subr.bf16.mxu0 %v4986_v39  ;;  %v103_v57 = vld [vmem:[%s12149_s1 + $0x208] sm:$0xff]  ;;  %v109_v58 = vld [vmem:[%s12149_s1 + $0x238] sm:$0xff]  ;;  %v116_v59 = vld [vmem:[%s12149_s1 + $0x270] sm:$0xff]  ;;  %v4992_v62 = vpack.c.bf16 %v101_v54, %v94_v53  ;;  %v975_v48 = vunpack.c.l.s4 %v6770_v47 }
   0xf   :  { %5243 = vmatprep.subr.bf16.mxu1 %v5242_v43  ;;  %v111_v60 = vld [vmem:[%s12149_s1 + $0x248] sm:$0xff]  ;;  %v118_v61 = vld [vmem:[%s12149_s1 + $0x280] sm:$0xff]  ;;  %v5248_v63 = vpack.c.bf16 %v103_v57, %v96_v55  ;;  %v4994_v0 = vpack.c.bf16 %v116_v59, %v109_v58  ;;  %v108_v1 = vld [vmem:[%s12149_s1 + $0x230] sm:$0xff] }
  0x10   :  { %v115_v2 = vld [vmem:[%s12149_s1 + $0x268] sm:$0xff]  ;;  %v110_v3 = vld [vmem:[%s12149_s1 + $0x240] sm:$0xff]  ;;  %v5250_v4 = vpack.c.bf16 %v118_v61, %v111_v60  ;;  %v117_v5 = vld [vmem:[%s12149_s1 + $0x278] sm:$0xff]  ;;  %v7083_v61 = vshrl.u32 %v936_v46, 7 }
  0x11   :  { %4989 = vmatpush1.bf16.msra.mxu0 %v4988_v50  ;;  %v123_v6 = vld [vmem:[%s12149_s1 + $0x2a8] sm:$0xff]  ;;  %v130_v7 = vld [vmem:[%s12149_s1 + $0x2e0] sm:$0xff]  ;;  %v125_v8 = vld [vmem:[%s12149_s1 + $0x2b8] sm:$0xff]  ;;  %v4996_v10 = vpack.c.bf16 %v115_v2, %v108_v1  ;;  %v5252_v11 = vpack.c.bf16 %v117_v5, %v110_v3 }
  0x12   :  { %5245 = vmatpush1.bf16.msra.mxu1 %v5244_v51  ;;  %4991 = vmatprep.subr.bf16.mxu0 %v4990_v52  ;;  %v132_v9 = vld [vmem:[%s12149_s1 + $0x2f0] sm:$0xff]  ;;  %v4998_v12 = vpack.c.bf16 %v130_v7, %v123_v6  ;;  %v122_v13 = vld [vmem:[%s12149_s1 + $0x2a0] sm:$0xff]  ;;  %v129_v14 = vld [vmem:[%s12149_s1 + $0x2d8] sm:$0xff] }
  0x13   :  { %5247 = vmatprep.subr.bf16.mxu1 %v5246_v56  ;;  %v124_v15 = vld [vmem:[%s12149_s1 + $0x2b0] sm:$0xff]  ;;  %v5254_v16 = vpack.c.bf16 %v132_v9, %v125_v8  ;;  %v131_v17 = vld [vmem:[%s12149_s1 + $0x2e8] sm:$0xff]  ;;  %v137_v18 = vld [vmem:[%s12149_s1 + $0x318] sm:$0xff]  ;;  %v5000_v22 = vpack.c.bf16 %v129_v14, %v122_v13 }
  0x14   :  { %v144_v19 = vld [vmem:[%s12149_s1 + $0x350] sm:$0xff]  ;;  %v139_v20 = vld [vmem:[%s12149_s1 + $0x328] sm:$0xff]  ;;  %v146_v21 = vld [vmem:[%s12149_s1 + $0x360] sm:$0xff]  ;;  %v5256_v23 = vpack.c.bf16 %v131_v17, %v124_v15 }
  0x15   :  { %4993 = vmatpush1.bf16.msra.mxu0 %v4992_v62  ;;  %v5002_v24 = vpack.c.bf16 %v144_v19, %v137_v18  ;;  %v136_v25 = vld [vmem:[%s12149_s1 + $0x310] sm:$0xff]  ;;  %v143_v26 = vld [vmem:[%s12149_s1 + $0x348] sm:$0xff]  ;;  %v138_v27 = vld [vmem:[%s12149_s1 + $0x320] sm:$0xff]  ;;  %v5258_v28 = vpack.c.bf16 %v146_v21, %v139_v20  ;;  %v976_v62 = vunpack.c.0.s8 %v975_v48 }
  0x16   :  { %5249 = vmatpush1.bf16.msra.mxu1 %v5248_v63  ;;  %4995 = vmatprep.subr.bf16.mxu0 %v4994_v0  ;;  %v145_v29 = vld [vmem:[%s12149_s1 + $0x358] sm:$0xff]  ;;  %v151_v30 = vld [vmem:[%s12149_s1 + $0x388] sm:$0xff]  ;;  %v158_v31 = vld [vmem:[%s12149_s1 + $0x3c0] sm:$0xff]  ;;  %v5004_v34 = vpack.c.bf16 %v143_v26, %v136_v25 }
  0x17   :  { %5251 = vmatprep.subr.bf16.mxu1 %v5250_v4  ;;  %v153_v32 = vld [vmem:[%s12149_s1 + $0x398] sm:$0xff]  ;;  %v160_v33 = vld [vmem:[%s12149_s1 + $0x3d0] sm:$0xff]  ;;  %v5260_v35 = vpack.c.bf16 %v145_v29, %v138_v27  ;;  %v5006_v36 = vpack.c.bf16 %v158_v31, %v151_v30  ;;  %v150_v37 = vld [vmem:[%s12149_s1 + $0x380] sm:$0xff] }
  0x18   :  { %v157_v38 = vld [vmem:[%s12149_s1 + $0x3b8] sm:$0xff]  ;;  %v152_v39 = vld [vmem:[%s12149_s1 + $0x390] sm:$0xff]  ;;  %v5262_v40 = vpack.c.bf16 %v160_v33, %v153_v32  ;;  %v159_v41 = vld [vmem:[%s12149_s1 + $0x3c8] sm:$0xff] }
  0x19   :  { %4997 = vmatpush1.bf16.msra.mxu0 %v4996_v10  ;;  %v165_v42 = vld [vmem:[%s12149_s1 + $0x3f8] sm:$0xff]  ;;  %v172_v43 = vld [vmem:[%s12149_s1 + $0x430] sm:$0xff]  ;;  %v167_v44 = vld [vmem:[%s12149_s1 + $0x408] sm:$0xff]  ;;  %v5008_v49 = vpack.c.bf16 %v157_v38, %v150_v37  ;;  %v5264_v50 = vpack.c.bf16 %v159_v41, %v152_v39 }
  0x1a   :  { %5253 = vmatpush1.bf16.msra.mxu1 %v5252_v11  ;;  %4999 = vmatprep.subr.bf16.mxu0 %v4998_v12  ;;  %v174_v45 = vld [vmem:[%s12149_s1 + $0x440] sm:$0xff]  ;;  %v5010_v51 = vpack.c.bf16 %v172_v43, %v165_v42  ;;  %v164_v52 = vld [vmem:[%s12149_s1 + $0x3f0] sm:$0xff]  ;;  %v171_v53 = vld [vmem:[%s12149_s1 + $0x428] sm:$0xff]  ;;  %v7110_v11 = vsub.s32 %v976_v62, %v7083_v61 }
  0x1b   :  { %5255 = vmatprep.subr.bf16.mxu1 %v5254_v16  ;;  %v166_v54 = vld [vmem:[%s12149_s1 + $0x400] sm:$0xff]  ;;  %v5266_v55 = vpack.c.bf16 %v174_v45, %v167_v44  ;;  %v173_v56 = vld [vmem:[%s12149_s1 + $0x438] sm:$0xff]  ;;  %v179_v57 = vld [vmem:[%s12149_s1 + $0x468] sm:$0xff]  ;;  %v5012_v63 = vpack.c.bf16 %v171_v53, %v164_v52 }
  0x1c   :  { %v186_v58 = vld [vmem:[%s12149_s1 + $0x4a0] sm:$0xff]  ;;  %v181_v59 = vld [vmem:[%s12149_s1 + $0x478] sm:$0xff]  ;;  %v188_v60 = vld [vmem:[%s12149_s1 + $0x4b0] sm:$0xff]  ;;  %v5268_v0 = vpack.c.bf16 %v173_v56, %v166_v54 }
  0x1d   :  { %5001 = vmatpush1.bf16.msra.mxu0 %v5000_v22  ;;  %v5014_v1 = vpack.c.bf16 %v186_v58, %v179_v57  ;;  %v178_v2 = vld [vmem:[%s12149_s1 + $0x460] sm:$0xff]  ;;  %v185_v3 = vld [vmem:[%s12149_s1 + $0x498] sm:$0xff]  ;;  %v180_v4 = vld [vmem:[%s12149_s1 + $0x470] sm:$0xff]  ;;  %v5270_v5 = vpack.c.bf16 %v188_v60, %v181_v59 }
  0x1e   :  { %5257 = vmatpush1.bf16.msra.mxu1 %v5256_v23  ;;  %5003 = vmatprep.subr.bf16.mxu0 %v5002_v24  ;;  %v187_v6 = vld [vmem:[%s12149_s1 + $0x4a8] sm:$0xff]  ;;  %v193_v7 = vld [vmem:[%s12149_s1 + $0x4d8] sm:$0xff]  ;;  %v200_v8 = vld [vmem:[%s12149_s1 + $0x510] sm:$0xff]  ;;  %v5016_v12 = vpack.c.bf16 %v185_v3, %v178_v2 }
  0x1f   :  { %5259 = vmatprep.subr.bf16.mxu1 %v5258_v28  ;;  %v195_v9 = vld [vmem:[%s12149_s1 + $0x4e8] sm:$0xff]  ;;  %v202_v10 = vld [vmem:[%s12149_s1 + $0x520] sm:$0xff]  ;;  %v192_v13 = vld [vmem:[%s12149_s1 + $0x4d0] sm:$0xff]  ;;  %v5272_v14 = vpack.c.bf16 %v187_v6, %v180_v4  ;;  %v5018_v15 = vpack.c.bf16 %v200_v8, %v193_v7 }
  0x20   :  { %v199_v16 = vld [vmem:[%s12149_s1 + $0x508] sm:$0xff]  ;;  %v194_v17 = vld [vmem:[%s12149_s1 + $0x4e0] sm:$0xff]  ;;  %v201_v18 = vld [vmem:[%s12149_s1 + $0x518] sm:$0xff]  ;;  %v5274_v19 = vpack.c.bf16 %v202_v10, %v195_v9 }
  0x21   :  { %5005 = vmatpush1.bf16.msra.mxu0 %v5004_v34  ;;  %v207_v20 = vld [vmem:[%s12149_s1 + $0x548] sm:$0xff]  ;;  %v214_v21 = vld [vmem:[%s12149_s1 + $0x580] sm:$0xff]  ;;  %v209_v23 = vld [vmem:[%s12149_s1 + $0x558] sm:$0xff]  ;;  %v5020_v26 = vpack.c.bf16 %v199_v16, %v192_v13  ;;  %v5276_v27 = vpack.c.bf16 %v201_v18, %v194_v17 }
  0x22   :  { %5261 = vmatpush1.bf16.msra.mxu1 %v5260_v35  ;;  %5007 = vmatprep.subr.bf16.mxu0 %v5006_v36  ;;  %v7133_v22 = vld [vmem:[%s12148_s0] sm:$0xff]  ;;  %v216_v24 = vld [vmem:[%s12149_s1 + $0x590] sm:$0xff]  ;;  %v5022_v28 = vpack.c.bf16 %v214_v21, %v207_v20  ;;  %v213_v30 = vld [vmem:[%s12149_s1 + $0x578] sm:$0xff] }
  0x23   :  { %5263 = vmatprep.subr.bf16.mxu1 %v5262_v40  ;;  %v7143_v25 = vrot.slane %v7133_v22, %v7110_v11  ;;  %v206_v29 = vld [vmem:[%s12149_s1 + $0x540] sm:$0xff]  ;;  %v208_v31 = vld [vmem:[%s12149_s1 + $0x550] sm:$0xff]  ;;  %v5278_v33 = vpack.c.bf16 %v216_v24, %v209_v23  ;;  %v215_v34 = vld [vmem:[%s12149_s1 + $0x588] sm:$0xff]  ;;  %v973_v10 = vcombine.high %v7133_v22, %v7133_v22 }
  0x24   :  { %v221_v35 = vld [vmem:[%s12149_s1 + $0x5b8] sm:$0xff]  ;;  %v228_v36 = vld [vmem:[%s12149_s1 + $0x5f0] sm:$0xff]  ;;  %v223_v37 = vld [vmem:[%s12149_s1 + $0x5c8] sm:$0xff]  ;;  %v5024_v39 = vpack.c.bf16 %v213_v30, %v206_v29  ;;  %v5280_v40 = vpack.c.bf16 %v215_v34, %v208_v31 }
  0x25   :  { %5009 = vmatpush1.bf16.msra.mxu0 %v5008_v49  ;;  %v7156_v32 = vcombine.high %v7143_v25, %v7143_v25  ;;  %v230_v38 = vld [vmem:[%s12149_s1 + $0x600] sm:$0xff]  ;;  %v5026_v41 = vpack.c.bf16 %v228_v36, %v221_v35  ;;  %v220_v42 = vld [vmem:[%s12149_s1 + $0x5b0] sm:$0xff]  ;;  %v227_v43 = vld [vmem:[%s12149_s1 + $0x5e8] sm:$0xff]  ;;  %v7268_v24 = vrot.slane %v973_v10, %v7110_v11 }
  0x26   :  { %5265 = vmatpush1.bf16.msra.mxu1 %v5264_v50  ;;  %5011 = vmatprep.subr.bf16.mxu0 %v5010_v51  ;;  %v222_v44 = vld [vmem:[%s12149_s1 + $0x5c0] sm:$0xff]  ;;  %v5282_v45 = vpack.c.bf16 %v230_v38, %v223_v37  ;;  %v229_v46 = vld [vmem:[%s12149_s1 + $0x5f8] sm:$0xff]  ;;  %v235_v47 = vld [vmem:[%s12149_s1 + $0x628] sm:$0xff]  ;;  %v5028_v51 = vpack.c.bf16 %v227_v43, %v220_v42 }
  0x27   :  { %5267 = vmatprep.subr.bf16.mxu1 %v5266_v55  ;;  %1079 = vmatprep.mubr.f32.mxu0 %v7156_v32  ;;  %v242_v48 = vld [vmem:[%s12149_s1 + $0x660] sm:$0xff]  ;;  %v237_v49 = vld [vmem:[%s12149_s1 + $0x638] sm:$0xff]  ;;  %v244_v50 = vld [vmem:[%s12149_s1 + $0x670] sm:$0xff]  ;;  %v5284_v52 = vpack.c.bf16 %v229_v46, %v222_v44 }
  0x28   :  { %1363 = vmatprep.mubr.f32.mxu1 %v7156_v32  ;;  %v5030_v53 = vpack.c.bf16 %v242_v48, %v235_v47  ;;  %v234_v54 = vld [vmem:[%s12149_s1 + $0x620] sm:$0xff]  ;;  %v241_v55 = vld [vmem:[%s12149_s1 + $0x658] sm:$0xff]  ;;  %v236_v56 = vld [vmem:[%s12149_s1 + $0x630] sm:$0xff]  ;;  %v5286_v57 = vpack.c.bf16 %v244_v50, %v237_v49 }
  0x29   :  { %5013 = vmatpush1.bf16.msra.mxu0 %v5012_v63  ;;  %v243_v58 = vld [vmem:[%s12149_s1 + $0x668] sm:$0xff]  ;;  %v249_v59 = vld [vmem:[%s12149_s1 + $0x698] sm:$0xff]  ;;  %v256_v60 = vld [vmem:[%s12149_s1 + $0x6d0] sm:$0xff] }
  0x2a   :  { %5269 = vmatpush1.bf16.msra.mxu1 %v5268_v0  ;;  %5015 = vmatprep.subr.bf16.mxu0 %v5014_v1  ;;  %v251_v62 = vld [vmem:[%s12149_s1 + $0x6a8] sm:$0xff]  ;;  %v258_v63 = vld [vmem:[%s12149_s1 + $0x6e0] sm:$0xff]  ;;  %v5032_v0 = vpack.c.bf16 %v241_v55, %v234_v54  ;;  %v5288_v1 = vpack.c.bf16 %v243_v58, %v236_v56  ;;  %v5034_v2 = vpack.c.bf16 %v256_v60, %v249_v59  ;;  %v248_v3 = vld [vmem:[%s12149_s1 + $0x690] sm:$0xff] }
  0x2b   :  { %5271 = vmatprep.subr.bf16.mxu1 %v5270_v5  ;;  %v255_v4 = vld [vmem:[%s12149_s1 + $0x6c8] sm:$0xff]  ;;  %v250_v5 = vld [vmem:[%s12149_s1 + $0x6a0] sm:$0xff]  ;;  %v5290_v6 = vpack.c.bf16 %v258_v63, %v251_v62  ;;  %v257_v7 = vld [vmem:[%s12149_s1 + $0x6d8] sm:$0xff] }
  0x2c   :  { %v263_v8 = vld [vmem:[%s12149_s1 + $0x708] sm:$0xff]  ;;  %v270_v9 = vld [vmem:[%s12149_s1 + $0x740] sm:$0xff]  ;;  %v272_v13 = vld [vmem:[%s12149_s1 + $0x750] sm:$0xff] }
  0x2d   :  { %5017 = vmatpush1.bf16.msra.mxu0 %v5016_v12  ;;  %v265_v12 = vld [vmem:[%s12149_s1 + $0x718] sm:$0xff]  ;;  %v5038_v16 = vpack.c.bf16 %v270_v9, %v263_v8  ;;  %v262_v17 = vld [vmem:[%s12149_s1 + $0x700] sm:$0xff]  ;;  %v271_v21 = vld [vmem:[%s12149_s1 + $0x748] sm:$0xff] }
  0x2e   :  { %5273 = vmatpush1.bf16.msra.mxu1 %v5272_v14  ;;  %5019 = vmatprep.subr.bf16.mxu0 %v5018_v15  ;;  %v5036_v14 = vpack.c.bf16 %v255_v4, %v248_v3  ;;  %v5292_v15 = vpack.c.bf16 %v257_v7, %v250_v5  ;;  %v269_v18 = vld [vmem:[%s12149_s1 + $0x738] sm:$0xff]  ;;  %v5294_v20 = vpack.c.bf16 %v272_v13, %v265_v12  ;;  %v284_v23 = vld [vmem:[%s12149_s1 + $0x7b0] sm:$0xff]  ;;  %v278_v34 = vld [vmem:[%s12149_s1 + $0x780] sm:$0xff] }
  0x2f   :  { %5275 = vmatprep.subr.bf16.mxu1 %v5274_v19  ;;  %v264_v19 = vld [vmem:[%s12149_s1 + $0x710] sm:$0xff]  ;;  %v277_v22 = vld [vmem:[%s12149_s1 + $0x778] sm:$0xff]  ;;  %v291_v37 = vld [vmem:[%s12149_s1 + $0x7e8] sm:$0xff] }
  0x30   :  { %v5296_v29 = vpack.c.bf16 %v271_v21, %v264_v19  ;;  %v5042_v30 = vpack.c.bf16 %v284_v23, %v277_v22  ;;  %v276_v31 = vld [vmem:[%s12149_s1 + $0x770] sm:$0xff]  ;;  %v285_v36 = vld [vmem:[%s12149_s1 + $0x7b8] sm:$0xff]  ;;  %v298_v38 = vld [vmem:[%s12149_s1 + $0x820] sm:$0xff] }
  0x31   :  { %5021 = vmatpush1.bf16.msra.mxu0 %v5020_v26  ;;  %v279_v26 = vld [vmem:[%s12149_s1 + $0x788] sm:$0xff]  ;;  %v5300_v43 = vpack.c.bf16 %v285_v36, %v278_v34  ;;  %v5046_v44 = vpack.c.bf16 %v298_v38, %v291_v37  ;;  %v297_v46 = vld [vmem:[%s12149_s1 + $0x818] sm:$0xff]  ;;  %v292_v47 = vld [vmem:[%s12149_s1 + $0x7f0] sm:$0xff] }
  0x32   :  { %5277 = vmatpush1.bf16.msra.mxu1 %v5276_v27  ;;  %5023 = vmatprep.subr.bf16.mxu0 %v5022_v28  ;;  %v286_v27 = vld [vmem:[%s12149_s1 + $0x7c0] sm:$0xff]  ;;  %v5040_v28 = vpack.c.bf16 %v269_v18, %v262_v17  ;;  %v299_v49 = vld [vmem:[%s12149_s1 + $0x828] sm:$0xff]  ;;  %v305_v50 = vld [vmem:[%s12149_s1 + $0x858] sm:$0xff] }
  0x33   :  { %5279 = vmatprep.subr.bf16.mxu1 %v5278_v33  ;;  %v283_v33 = vld [vmem:[%s12149_s1 + $0x7a8] sm:$0xff]  ;;  %v5298_v35 = vpack.c.bf16 %v286_v27, %v279_v26  ;;  %v5304_v55 = vpack.c.bf16 %v299_v49, %v292_v47  ;;  %v306_v59 = vld [vmem:[%s12149_s1 + $0x860] sm:$0xff]  ;;  %v313_v62 = vld [vmem:[%s12149_s1 + $0x898] sm:$0xff] }
  0x34   :  { %v5044_v42 = vpack.c.bf16 %v283_v33, %v276_v31  ;;  %v311_v58 = vld [vmem:[%s12149_s1 + $0x888] sm:$0xff]  ;;  %v5308_v4 = vpack.c.bf16 %v313_v62, %v306_v59  ;;  %v325_v7 = vld [vmem:[%s12149_s1 + $0x8f8] sm:$0xff]  ;;  %v320_v8 = vld [vmem:[%s12149_s1 + $0x8d0] sm:$0xff] }
  0x35   :  { %5025 = vmatpush1.bf16.msra.mxu0 %v5024_v39  ;;  %v7296_v39 = vcombine.high %v7268_v24, %v7268_v24  ;;  %v319_v63 = vld [vmem:[%s12149_s1 + $0x8c8] sm:$0xff]  ;;  %v333_v12 = vld [vmem:[%s12149_s1 + $0x938] sm:$0xff]  ;;  %v340_v13 = vld [vmem:[%s12149_s1 + $0x970] sm:$0xff] }
  0x36   :  { %5281 = vmatpush1.bf16.msra.mxu1 %v5280_v40  ;;  %5027 = vmatprep.subr.bf16.mxu0 %v5026_v41  ;;  %v293_v40 = vld [vmem:[%s12149_s1 + $0x7f8] sm:$0xff]  ;;  %v300_v41 = vld [vmem:[%s12149_s1 + $0x830] sm:$0xff]  ;;  %v327_v10 = vld [vmem:[%s12149_s1 + $0x908] sm:$0xff]  ;;  %v5058_v18 = vpack.c.bf16 %v340_v13, %v333_v12 }
  0x37   :  { %5283 = vmatprep.subr.bf16.mxu1 %v5282_v45  ;;  %v290_v45 = vld [vmem:[%s12149_s1 + $0x7e0] sm:$0xff]  ;;  %v5302_v48 = vpack.c.bf16 %v300_v41, %v293_v40  ;;  %v5312_v17 = vpack.c.bf16 %v327_v10, %v320_v8  ;;  %v332_v19 = vld [vmem:[%s12149_s1 + $0x930] sm:$0xff]  ;;  %v341_v23 = vld [vmem:[%s12149_s1 + $0x978] sm:$0xff] }
  0x38   :  { %v5048_v54 = vpack.c.bf16 %v297_v46, %v290_v45  ;;  %v334_v21 = vld [vmem:[%s12149_s1 + $0x940] sm:$0xff]  ;;  %v347_v26 = vld [vmem:[%s12149_s1 + $0x9a8] sm:$0xff]  ;;  %v348_v36 = vld [vmem:[%s12149_s1 + $0x9b0] sm:$0xff] }
  0x39   :  { %5029 = vmatpush1.bf16.msra.mxu0 %v5028_v51  ;;  %v312_v51 = vld [vmem:[%s12149_s1 + $0x890] sm:$0xff]  ;;  %v354_v27 = vld [vmem:[%s12149_s1 + $0x9e0] sm:$0xff]  ;;  %v5316_v31 = vpack.c.bf16 %v341_v23, %v334_v21  ;;  %v355_v38 = vld [vmem:[%s12149_s1 + $0x9e8] sm:$0xff] }
  0x3a   :  { %5285 = vmatpush1.bf16.msra.mxu1 %v5284_v52  ;;  %5031 = vmatprep.subr.bf16.mxu0 %v5030_v53  ;;  %v307_v52 = vld [vmem:[%s12149_s1 + $0x868] sm:$0xff]  ;;  %v314_v53 = vld [vmem:[%s12149_s1 + $0x8a0] sm:$0xff]  ;;  %v5050_v56 = vpack.c.bf16 %v312_v51, %v305_v50  ;;  %v5062_v33 = vpack.c.bf16 %v354_v27, %v347_v26  ;;  %v361_v40 = vld [vmem:[%s12149_s1 + $0xa18] sm:$0xff]  ;;  %v5320_v45 = vpack.c.bf16 %v355_v38, %v348_v36 }
  0x3b   :  { %5287 = vmatprep.subr.bf16.mxu1 %v5286_v57  ;;  %v304_v57 = vld [vmem:[%s12149_s1 + $0x850] sm:$0xff]  ;;  %v5306_v60 = vpack.c.bf16 %v314_v53, %v307_v52  ;;  %v346_v34 = vld [vmem:[%s12149_s1 + $0x9a0] sm:$0xff]  ;;  %v369_v51 = vld [vmem:[%s12149_s1 + $0xa58] sm:$0xff] }
  0x3c   :  { %v5052_v3 = vpack.c.bf16 %v311_v58, %v304_v57  ;;  %v368_v41 = vld [vmem:[%s12149_s1 + $0xa50] sm:$0xff]  ;;  %v362_v49 = vld [vmem:[%s12149_s1 + $0xa20] sm:$0xff]  ;;  %v375_v52 = vld [vmem:[%s12149_s1 + $0xa88] sm:$0xff] }
  0x3d   :  { %5033 = vmatpush1.bf16.msra.mxu0 %v5032_v0  ;;  %v326_v0 = vld [vmem:[%s12149_s1 + $0x900] sm:$0xff]  ;;  %v5066_v46 = vpack.c.bf16 %v368_v41, %v361_v40  ;;  %v360_v47 = vld [vmem:[%s12149_s1 + $0xa10] sm:$0xff]  ;;  %v5324_v57 = vpack.c.bf16 %v369_v51, %v362_v49  ;;  %v397_v13 = vld [vmem:[%s12149_s1 + $0xb38] sm:$0xff] }
  0x3e   :  { %5289 = vmatpush1.bf16.msra.mxu1 %v5288_v1  ;;  %5035 = vmatprep.subr.bf16.mxu0 %v5034_v2  ;;  %v321_v1 = vld [vmem:[%s12149_s1 + $0x8d8] sm:$0xff]  ;;  %v328_v2 = vld [vmem:[%s12149_s1 + $0x910] sm:$0xff]  ;;  %v5054_v5 = vpack.c.bf16 %v326_v0, %v319_v63  ;;  %v382_v53 = vld [vmem:[%s12149_s1 + $0xac0] sm:$0xff] }
  0x3f   :  { %5291 = vmatprep.subr.bf16.mxu1 %v5290_v6  ;;  %v318_v6 = vld [vmem:[%s12149_s1 + $0x8c0] sm:$0xff]  ;;  %v5310_v9 = vpack.c.bf16 %v328_v2, %v321_v1  ;;  %v5070_v58 = vpack.c.bf16 %v382_v53, %v375_v52  ;;  %v376_v62 = vld [vmem:[%s12149_s1 + $0xa90] sm:$0xff]  ;;  %v383_v0 = vld [vmem:[%s12149_s1 + $0xac8] sm:$0xff] }
  0x40   :  { %v374_v59 = vld [vmem:[%s12149_s1 + $0xa80] sm:$0xff]  ;;  %v389_v1 = vld [vmem:[%s12149_s1 + $0xaf8] sm:$0xff]  ;;  %v396_v2 = vld [vmem:[%s12149_s1 + $0xb30] sm:$0xff] }
  0x41   :  { %5037 = vmatpush1.bf16.msra.mxu0 %v5036_v14  ;;  %v335_v14 = vld [vmem:[%s12149_s1 + $0x948] sm:$0xff]  ;;  %v388_v8 = vld [vmem:[%s12149_s1 + $0xaf0] sm:$0xff]  ;;  %v390_v10 = vld [vmem:[%s12149_s1 + $0xb00] sm:$0xff] }
  0x42   :  { %5293 = vmatpush1.bf16.msra.mxu1 %v5292_v15  ;;  %5039 = vmatprep.subr.bf16.mxu0 %v5038_v16  ;;  %v342_v15 = vld [vmem:[%s12149_s1 + $0x980] sm:$0xff]  ;;  %v5056_v16 = vpack.c.bf16 %v325_v7, %v318_v6  ;;  %v5328_v6 = vpack.c.bf16 %v383_v0, %v376_v62  ;;  %v5074_v7 = vpack.c.bf16 %v396_v2, %v389_v1  ;;  %v404_v23 = vld [vmem:[%s12149_s1 + $0xb70] sm:$0xff]  ;;  %v411_v27 = vld [vmem:[%s12149_s1 + $0xba8] sm:$0xff] }
  0x43   :  { %5295 = vmatprep.subr.bf16.mxu1 %v5294_v20  ;;  %v339_v20 = vld [vmem:[%s12149_s1 + $0x968] sm:$0xff]  ;;  %v5314_v22 = vpack.c.bf16 %v342_v15, %v335_v14  ;;  %v410_v15 = vld [vmem:[%s12149_s1 + $0xba0] sm:$0xff]  ;;  %v416_v36 = vld [vmem:[%s12149_s1 + $0xbd0] sm:$0xff] }
  0x44   :  { %1080 = vmatmul.mubr.f32.vlgmr.msra.gmra.mrb[0].mxu0 %v7143_v25  ;;  %v403_v14 = vld [vmem:[%s12149_s1 + $0xb68] sm:$0xff]  ;;  %v402_v21 = vld [vmem:[%s12149_s1 + $0xb60] sm:$0xff]  ;;  %v425_v41 = vld [vmem:[%s12149_s1 + $0xc18] sm:$0xff] }
  0x45   :  { %5041 = vmatpush1.bf16.msra.mxu0 %v5040_v28  ;;  %1364 = vmatmul.mubr.f32.vlgmr.msra.gmra.mrb[0].mxu1 %v7143_v25  ;;  %v349_v28 = vld [vmem:[%s12149_s1 + $0x9b8] sm:$0xff]  ;;  %v418_v38 = vld [vmem:[%s12149_s1 + $0xbe0] sm:$0xff]  ;;  %v432_v51 = vld [vmem:[%s12149_s1 + $0xc50] sm:$0xff] }
  0x46   :  { %5297 = vmatpush1.bf16.msra.mxu1 %v5296_v29  ;;  %5043 = vmatprep.subr.bf16.mxu0 %v5042_v30  ;;  %v356_v29 = vld [vmem:[%s12149_s1 + $0x9f0] sm:$0xff]  ;;  %v5060_v30 = vpack.c.bf16 %v339_v20, %v332_v19  ;;  %v5332_v19 = vpack.c.bf16 %v397_v13, %v390_v10  ;;  %v5078_v20 = vpack.c.bf16 %v410_v15, %v403_v14  ;;  %v430_v49 = vld [vmem:[%s12149_s1 + $0xc40] sm:$0xff]  ;;  %v439_v53 = vld [vmem:[%s12149_s1 + $0xc88] sm:$0xff] }
  0x47   :  { %5299 = vmatprep.subr.bf16.mxu1 %v5298_v35  ;;  %1150 = vmatprep.mubr.f32.mxu0 %v7296_v39  ;;  %v353_v35 = vld [vmem:[%s12149_s1 + $0x9d8] sm:$0xff]  ;;  %v5318_v37 = vpack.c.bf16 %v356_v29, %v349_v28  ;;  %v424_v29 = vld [vmem:[%s12149_s1 + $0xc10] sm:$0xff]  ;;  %v446_v0 = vld [vmem:[%s12149_s1 + $0xcc0] sm:$0xff] }
  0x48   :  { %1434 = vmatprep.mubr.f32.mxu1 %v7296_v39  ;;  %v417_v28 = vld [vmem:[%s12149_s1 + $0xbd8] sm:$0xff]  ;;  %v444_v62 = vld [vmem:[%s12149_s1 + $0xcb0] sm:$0xff]  ;;  %v458_v10 = vld [vmem:[%s12149_s1 + $0xd20] sm:$0xff] }
  0x49   :  { %5045 = vmatpush1.bf16.msra.mxu0 %v5044_v42  ;;  %v363_v42 = vld [vmem:[%s12149_s1 + $0xa28] sm:$0xff]  ;;  %v453_v2 = vld [vmem:[%s12149_s1 + $0xcf8] sm:$0xff]  ;;  %v460_v13 = vld [vmem:[%s12149_s1 + $0xd30] sm:$0xff] }
  0x4a   :  { %5301 = vmatpush1.bf16.msra.mxu1 %v5300_v43  ;;  %5047 = vmatprep.subr.bf16.mxu0 %v5046_v44  ;;  %v370_v43 = vld [vmem:[%s12149_s1 + $0xa60] sm:$0xff]  ;;  %v5064_v44 = vpack.c.bf16 %v353_v35, %v346_v34  ;;  %v5336_v34 = vpack.c.bf16 %v411_v27, %v404_v23  ;;  %v5082_v35 = vpack.c.bf16 %v424_v29, %v417_v28  ;;  %v467_v15 = vld [vmem:[%s12149_s1 + $0xd68] sm:$0xff]  ;;  %v472_v23 = vld [vmem:[%s12149_s1 + $0xd90] sm:$0xff] }
  0x4b   :  { %5303 = vmatprep.subr.bf16.mxu1 %v5302_v48  ;;  %v367_v48 = vld [vmem:[%s12149_s1 + $0xa48] sm:$0xff]  ;;  %v5322_v50 = vpack.c.bf16 %v370_v43, %v363_v42  ;;  %v438_v43 = vld [vmem:[%s12149_s1 + $0xc80] sm:$0xff]  ;;  %v481_v29 = vld [vmem:[%s12149_s1 + $0xdd8] sm:$0xff] }
  0x4c   :  { %v431_v42 = vld [vmem:[%s12149_s1 + $0xc48] sm:$0xff]  ;;  %v474_v27 = vld [vmem:[%s12149_s1 + $0xda0] sm:$0xff] }
  0x4d   :  { %5049 = vmatpush1.bf16.msra.mxu0 %v5048_v54  ;;  %v377_v54 = vld [vmem:[%s12149_s1 + $0xa98] sm:$0xff] }
  0x4e   :  { %5305 = vmatpush1.bf16.msra.mxu1 %v5304_v55  ;;  %5051 = vmatprep.subr.bf16.mxu0 %v5050_v56  ;;  %v384_v55 = vld [vmem:[%s12149_s1 + $0xad0] sm:$0xff]  ;;  %v5068_v56 = vpack.c.bf16 %v367_v48, %v360_v47  ;;  %v5340_v47 = vpack.c.bf16 %v425_v41, %v418_v38  ;;  %v5086_v48 = vpack.c.bf16 %v438_v43, %v431_v42  ;;  %v486_v38 = vld [vmem:[%s12149_s1 + $0xe00] sm:$0xff]  ;;  %v495_v43 = vld [vmem:[%s12149_s1 + $0xe48] sm:$0xff] }
  0x4f   :  { %5307 = vmatprep.subr.bf16.mxu1 %v5306_v60  ;;  %v381_v60 = vld [vmem:[%s12149_s1 + $0xab8] sm:$0xff]  ;;  %v5326_v63 = vpack.c.bf16 %v384_v55, %v377_v54  ;;  %v452_v55 = vld [vmem:[%s12149_s1 + $0xcf0] sm:$0xff] }
  0x50   :  { %v445_v54 = vld [vmem:[%s12149_s1 + $0xcb8] sm:$0xff]  ;;  %v488_v41 = vld [vmem:[%s12149_s1 + $0xe10] sm:$0xff] }
  0x51   :  { %5053 = vmatpush1.bf16.msra.mxu0 %v5052_v3  ;;  %v391_v3 = vld [vmem:[%s12149_s1 + $0xb08] sm:$0xff] }
  0x52   :  { %5309 = vmatpush1.bf16.msra.mxu1 %v5308_v4  ;;  %5055 = vmatprep.subr.bf16.mxu0 %v5054_v5  ;;  %v398_v4 = vld [vmem:[%s12149_s1 + $0xb40] sm:$0xff]  ;;  %v5072_v5 = vpack.c.bf16 %v381_v60, %v374_v59  ;;  %v5344_v59 = vpack.c.bf16 %v439_v53, %v432_v51  ;;  %v5090_v60 = vpack.c.bf16 %v452_v55, %v445_v54  ;;  %v507_v53 = vld [vmem:[%s12149_s1 + $0xea8] sm:$0xff] }
  0x53   :  { %5311 = vmatprep.subr.bf16.mxu1 %v5310_v9  ;;  %v395_v9 = vld [vmem:[%s12149_s1 + $0xb28] sm:$0xff]  ;;  %v5330_v12 = vpack.c.bf16 %v398_v4, %v391_v3  ;;  %v466_v4 = vld [vmem:[%s12149_s1 + $0xd60] sm:$0xff] }
  0x54   :  { %v459_v3 = vld [vmem:[%s12149_s1 + $0xd28] sm:$0xff]  ;;  %v502_v54 = vld [vmem:[%s12149_s1 + $0xe80] sm:$0xff] }
  0x55   :  { %5057 = vmatpush1.bf16.msra.mxu0 %v5056_v16  ;;  %v405_v16 = vld [vmem:[%s12149_s1 + $0xb78] sm:$0xff] }
  0x56   :  { %5313 = vmatpush1.bf16.msra.mxu1 %v5312_v17  ;;  %5059 = vmatprep.subr.bf16.mxu0 %v5058_v18  ;;  %v412_v17 = vld [vmem:[%s12149_s1 + $0xbb0] sm:$0xff]  ;;  %v5076_v18 = vpack.c.bf16 %v395_v9, %v388_v8  ;;  %v5348_v8 = vpack.c.bf16 %v453_v2, %v446_v0  ;;  %v5094_v9 = vpack.c.bf16 %v466_v4, %v459_v3  ;;  %v514_v3 = vld [vmem:[%s12149_s1 + $0xee0] sm:$0xff]  ;;  %v521_v4 = vld [vmem:[%s12149_s1 + $0xf18] sm:$0xff] }
  0x57   :  { %5315 = vmatprep.subr.bf16.mxu1 %v5314_v22  ;;  %v409_v22 = vld [vmem:[%s12149_s1 + $0xb98] sm:$0xff]  ;;  %v5334_v26 = vpack.c.bf16 %v412_v17, %v405_v16  ;;  %v480_v17 = vld [vmem:[%s12149_s1 + $0xdd0] sm:$0xff] }
  0x58   :  { %v473_v16 = vld [vmem:[%s12149_s1 + $0xd98] sm:$0xff] }
  0x59   :  { %5061 = vmatpush1.bf16.msra.mxu0 %v5060_v30  ;;  %v419_v30 = vld [vmem:[%s12149_s1 + $0xbe8] sm:$0xff] }
  0x5a   :  { %5317 = vmatpush1.bf16.msra.mxu1 %v5316_v31  ;;  %5063 = vmatprep.subr.bf16.mxu0 %v5062_v33  ;;  %v426_v31 = vld [vmem:[%s12149_s1 + $0xc20] sm:$0xff]  ;;  %v5080_v33 = vpack.c.bf16 %v409_v22, %v402_v21  ;;  %v5352_v21 = vpack.c.bf16 %v467_v15, %v460_v13  ;;  %v5098_v22 = vpack.c.bf16 %v480_v17, %v473_v16  ;;  %v528_v16 = vld [vmem:[%s12149_s1 + $0xf50] sm:$0xff]  ;;  %v535_v17 = vld [vmem:[%s12149_s1 + $0xf88] sm:$0xff] }
  0x5b   :  { %5319 = vmatprep.subr.bf16.mxu1 %v5318_v37  ;;  %v423_v37 = vld [vmem:[%s12149_s1 + $0xc08] sm:$0xff]  ;;  %v5338_v40 = vpack.c.bf16 %v426_v31, %v419_v30  ;;  %v494_v31 = vld [vmem:[%s12149_s1 + $0xe40] sm:$0xff]  ;;  %v5112_v13 = vpack.c.bf16 %v521_v4, %v514_v3 }
  0x5c   :  { %v487_v30 = vld [vmem:[%s12149_s1 + $0xe08] sm:$0xff]  ;;  %v594_v4 = vld [vmem:[%s12149_s1 + $0x1160] sm:$0xff] }
  0x5d   :  { %5065 = vmatpush1.bf16.msra.mxu0 %v5064_v44  ;;  %v433_v44 = vld [vmem:[%s12149_s1 + $0xc58] sm:$0xff]  ;;  %v587_v3 = vld [vmem:[%s12149_s1 + $0x1128] sm:$0xff] }
  0x5e   :  { %5321 = vmatpush1.bf16.msra.mxu1 %v5320_v45  ;;  %5067 = vmatprep.subr.bf16.mxu0 %v5066_v46  ;;  %v440_v45 = vld [vmem:[%s12149_s1 + $0xc90] sm:$0xff]  ;;  %v5084_v46 = vpack.c.bf16 %v423_v37, %v416_v36  ;;  %v5356_v36 = vpack.c.bf16 %v481_v29, %v474_v27  ;;  %v5102_v37 = vpack.c.bf16 %v494_v31, %v487_v30  ;;  %v542_v30 = vld [vmem:[%s12149_s1 + $0xfc0] sm:$0xff]  ;;  %v549_v31 = vld [vmem:[%s12149_s1 + $0xff8] sm:$0xff] }
  0x5f   :  { %5323 = vmatprep.subr.bf16.mxu1 %v5322_v50  ;;  %v437_v50 = vld [vmem:[%s12149_s1 + $0xc78] sm:$0xff]  ;;  %v5342_v52 = vpack.c.bf16 %v440_v45, %v433_v44  ;;  %v508_v45 = vld [vmem:[%s12149_s1 + $0xeb0] sm:$0xff]  ;;  %v5116_v27 = vpack.c.bf16 %v535_v17, %v528_v16 }
  0x60   :  { %v501_v44 = vld [vmem:[%s12149_s1 + $0xe78] sm:$0xff]  ;;  %v608_v17 = vld [vmem:[%s12149_s1 + $0x11d0] sm:$0xff] }
  0x61   :  { %5069 = vmatpush1.bf16.msra.mxu0 %v5068_v56  ;;  %v447_v56 = vld [vmem:[%s12149_s1 + $0xcc8] sm:$0xff]  ;;  %v5106_v51 = vpack.c.bf16 %v508_v45, %v501_v44  ;;  %v556_v44 = vld [vmem:[%s12149_s1 + $0x1030] sm:$0xff]  ;;  %v601_v16 = vld [vmem:[%s12149_s1 + $0x1198] sm:$0xff] }
  0x62   :  { %5325 = vmatpush1.bf16.msra.mxu1 %v5324_v57  ;;  %5071 = vmatprep.subr.bf16.mxu0 %v5070_v58  ;;  %v454_v57 = vld [vmem:[%s12149_s1 + $0xd00] sm:$0xff]  ;;  %v5088_v58 = vpack.c.bf16 %v437_v50, %v430_v49  ;;  %v7671_v49 = vld [vmem:[%s12148_s0 + $0x8] sm:$0xff]  ;;  %v5360_v50 = vpack.c.bf16 %v495_v43, %v488_v41  ;;  %v5120_v41 = vpack.c.bf16 %v549_v31, %v542_v30 }
  0x63   :  { %5327 = vmatprep.subr.bf16.mxu1 %v5326_v63  ;;  %v451_v63 = vld [vmem:[%s12149_s1 + $0xce8] sm:$0xff]  ;;  %v5346_v1 = vpack.c.bf16 %v454_v57, %v447_v56  ;;  %v7684_v55 = vrot.slane %v7671_v49, %v7110_v11  ;;  %v509_v57 = vld [vmem:[%s12149_s1 + $0xeb8] sm:$0xff]  ;;  %v622_v31 = vld [vmem:[%s12149_s1 + $0x1240] sm:$0xff] }
  0x64   :  { %v563_v45 = vld [vmem:[%s12149_s1 + $0x1068] sm:$0xff] }
  0x65   :  { %5073 = vmatpush1.bf16.msra.mxu0 %v5072_v5  ;;  %v461_v5 = vld [vmem:[%s12149_s1 + $0xd38] sm:$0xff]  ;;  %v615_v30 = vld [vmem:[%s12149_s1 + $0x1208] sm:$0xff] }
  0x66   :  { %5329 = vmatpush1.bf16.msra.mxu1 %v5328_v6  ;;  %5075 = vmatprep.subr.bf16.mxu0 %v5074_v7  ;;  %v468_v6 = vld [vmem:[%s12149_s1 + $0xd70] sm:$0xff]  ;;  %v5092_v7 = vpack.c.bf16 %v451_v63, %v444_v62  ;;  %v7704_v63 = vcombine.high %v7684_v55, %v7684_v55 }
  0x67   :  { %5331 = vmatprep.subr.bf16.mxu1 %v5330_v12  ;;  %v465_v12 = vld [vmem:[%s12149_s1 + $0xd58] sm:$0xff]  ;;  %v5350_v14 = vpack.c.bf16 %v468_v6, %v461_v5  ;;  %v524_v62 = vld [vmem:[%s12149_s1 + $0xf30] sm:$0xff] }
  0x68   :  { %v516_v5 = vld [vmem:[%s12149_s1 + $0xef0] sm:$0xff] }
  0x69   :  { %5077 = vmatpush1.bf16.msra.mxu0 %v5076_v18  ;;  %v475_v18 = vld [vmem:[%s12149_s1 + $0xda8] sm:$0xff] }
  0x6a   :  { %5333 = vmatpush1.bf16.msra.mxu1 %v5332_v19  ;;  %5079 = vmatprep.subr.bf16.mxu0 %v5078_v20  ;;  %v482_v19 = vld [vmem:[%s12149_s1 + $0xde0] sm:$0xff]  ;;  %v5096_v20 = vpack.c.bf16 %v465_v12, %v458_v10  ;;  %v531_v10 = vld [vmem:[%s12149_s1 + $0xf68] sm:$0xff] }
  0x6b   :  { %5335 = vmatprep.subr.bf16.mxu1 %v5334_v26  ;;  %v479_v26 = vld [vmem:[%s12149_s1 + $0xdc8] sm:$0xff]  ;;  %v5354_v28 = vpack.c.bf16 %v482_v19, %v475_v18  ;;  %v538_v12 = vld [vmem:[%s12149_s1 + $0xfa0] sm:$0xff] }
  0x6c   :  { %v530_v18 = vld [vmem:[%s12149_s1 + $0xf60] sm:$0xff]  ;;  %v5370_v19 = vpack.c.bf16 %v538_v12, %v531_v10  ;;  %v5386_v12 = vpack.c.bf16 %v594_v4, %v587_v3 }
  0x6d   :  { %5081 = vmatpush1.bf16.msra.mxu0 %v5080_v33  ;;  %v489_v33 = vld [vmem:[%s12149_s1 + $0xe18] sm:$0xff]  ;;  %v586_v10 = vld [vmem:[%s12149_s1 + $0x1120] sm:$0xff] }
  0x6e   :  { %5337 = vmatpush1.bf16.msra.mxu1 %v5336_v34  ;;  %5083 = vmatprep.subr.bf16.mxu0 %v5082_v35  ;;  %v496_v34 = vld [vmem:[%s12149_s1 + $0xe50] sm:$0xff]  ;;  %v5100_v35 = vpack.c.bf16 %v479_v26, %v472_v23  ;;  %v545_v23 = vld [vmem:[%s12149_s1 + $0xfd8] sm:$0xff]  ;;  %v642_v3 = vld [vmem:[%s12149_s1 + $0x12e0] sm:$0xff] }
  0x6f   :  { %5339 = vmatprep.subr.bf16.mxu1 %v5338_v40  ;;  %v493_v40 = vld [vmem:[%s12149_s1 + $0xe38] sm:$0xff]  ;;  %v5358_v42 = vpack.c.bf16 %v496_v34, %v489_v33  ;;  %v552_v26 = vld [vmem:[%s12149_s1 + $0x1010] sm:$0xff] }
  0x70   :  { %v544_v33 = vld [vmem:[%s12149_s1 + $0xfd0] sm:$0xff]  ;;  %v5374_v34 = vpack.c.bf16 %v552_v26, %v545_v23  ;;  %v5390_v26 = vpack.c.bf16 %v608_v17, %v601_v16 }
  0x71   :  { %5085 = vmatpush1.bf16.msra.mxu0 %v5084_v46  ;;  %v503_v46 = vld [vmem:[%s12149_s1 + $0xe88] sm:$0xff]  ;;  %v600_v23 = vld [vmem:[%s12149_s1 + $0x1190] sm:$0xff] }
  0x72   :  { %5341 = vmatpush1.bf16.msra.mxu1 %v5340_v47  ;;  %5087 = vmatprep.subr.bf16.mxu0 %v5086_v48  ;;  %v510_v47 = vld [vmem:[%s12149_s1 + $0xec0] sm:$0xff]  ;;  %v5104_v48 = vpack.c.bf16 %v493_v40, %v486_v38  ;;  %v559_v38 = vld [vmem:[%s12149_s1 + $0x1048] sm:$0xff]  ;;  %v656_v16 = vld [vmem:[%s12149_s1 + $0x1350] sm:$0xff] }
  0x73   :  { %5343 = vmatprep.subr.bf16.mxu1 %v5342_v52  ;;  %v500_v52 = vld [vmem:[%s12149_s1 + $0xe70] sm:$0xff]  ;;  %v5362_v56 = vpack.c.bf16 %v510_v47, %v503_v46  ;;  %v566_v40 = vld [vmem:[%s12149_s1 + $0x1080] sm:$0xff] }
  0x74   :  { %v5108_v0 = vpack.c.bf16 %v507_v53, %v500_v52  ;;  %v558_v46 = vld [vmem:[%s12149_s1 + $0x1040] sm:$0xff]  ;;  %v5378_v47 = vpack.c.bf16 %v566_v40, %v559_v38  ;;  %v573_v52 = vld [vmem:[%s12149_s1 + $0x10b8] sm:$0xff]  ;;  %v580_v53 = vld [vmem:[%s12149_s1 + $0x10f0] sm:$0xff]  ;;  %v5394_v40 = vpack.c.bf16 %v622_v31, %v615_v30 }
  0x75   :  { %5089 = vmatpush1.bf16.msra.mxu0 %v5088_v58  ;;  %v515_v58 = vld [vmem:[%s12149_s1 + $0xee8] sm:$0xff]  ;;  %v614_v38 = vld [vmem:[%s12149_s1 + $0x1200] sm:$0xff] }
  0x76   :  { %5345 = vmatpush1.bf16.msra.mxu1 %v5344_v59  ;;  %5091 = vmatprep.subr.bf16.mxu0 %v5090_v60  ;;  %v522_v59 = vld [vmem:[%s12149_s1 + $0xf20] sm:$0xff]  ;;  %v517_v60 = vld [vmem:[%s12149_s1 + $0xef8] sm:$0xff] }
  0x77   :  { %5347 = vmatprep.subr.bf16.mxu1 %v5346_v1  ;;  %v5364_v1 = vpack.c.bf16 %v509_v57, %v502_v54  ;;  %v5110_v2 = vpack.c.bf16 %v522_v59, %v515_v58  ;;  %v5366_v6 = vpack.c.bf16 %v524_v62, %v517_v60  ;;  %v5124_v54 = vpack.c.bf16 %v563_v45, %v556_v44  ;;  %v570_v58 = vld [vmem:[%s12149_s1 + $0x10a0] sm:$0xff]  ;;  %v577_v59 = vld [vmem:[%s12149_s1 + $0x10d8] sm:$0xff]  ;;  %v572_v60 = vld [vmem:[%s12149_s1 + $0x10b0] sm:$0xff] }
  0x78   :  { %v5382_v62 = vpack.c.bf16 %v580_v53, %v573_v52  ;;  %v629_v44 = vld [vmem:[%s12149_s1 + $0x1278] sm:$0xff]  ;;  %v636_v45 = vld [vmem:[%s12149_s1 + $0x12b0] sm:$0xff]  ;;  %v670_v30 = vld [vmem:[%s12149_s1 + $0x13c0] sm:$0xff] }
  0x79   :  { %5093 = vmatpush1.bf16.msra.mxu0 %v5092_v7  ;;  %v523_v7 = vld [vmem:[%s12149_s1 + $0xf28] sm:$0xff]  ;;  %v628_v52 = vld [vmem:[%s12149_s1 + $0x1270] sm:$0xff]  ;;  %v5398_v53 = vpack.c.bf16 %v636_v45, %v629_v44 }
  0x7a   :  { %5349 = vmatpush1.bf16.msra.mxu1 %v5348_v8  ;;  %5095 = vmatprep.subr.bf16.mxu0 %v5094_v9  ;;  %v529_v8 = vld [vmem:[%s12149_s1 + $0xf58] sm:$0xff]  ;;  %v536_v9 = vld [vmem:[%s12149_s1 + $0xf90] sm:$0xff] }
  0x7b   :  { %5351 = vmatprep.subr.bf16.mxu1 %v5350_v14  ;;  %v5368_v14 = vpack.c.bf16 %v523_v7, %v516_v5  ;;  %v5114_v15 = vpack.c.bf16 %v536_v9, %v529_v8  ;;  %v5128_v5 = vpack.c.bf16 %v577_v59, %v570_v58  ;;  %v584_v8 = vld [vmem:[%s12149_s1 + $0x1110] sm:$0xff]  ;;  %v591_v9 = vld [vmem:[%s12149_s1 + $0x1148] sm:$0xff]  ;;  %v650_v59 = vld [vmem:[%s12149_s1 + $0x1320] sm:$0xff] }
  0x7c   :  { %v643_v58 = vld [vmem:[%s12149_s1 + $0x12e8] sm:$0xff]  ;;  %v684_v44 = vld [vmem:[%s12149_s1 + $0x1430] sm:$0xff] }
  0x7d   :  { %5097 = vmatpush1.bf16.msra.mxu0 %v5096_v20  ;;  %v537_v20 = vld [vmem:[%s12149_s1 + $0xf98] sm:$0xff]  ;;  %v5402_v4 = vpack.c.bf16 %v650_v59, %v643_v58  ;;  %v698_v58 = vld [vmem:[%s12149_s1 + $0x14a0] sm:$0xff] }
  0x7e   :  { %5353 = vmatpush1.bf16.msra.mxu1 %v5352_v21  ;;  %5099 = vmatprep.subr.bf16.mxu0 %v5098_v22  ;;  %v543_v21 = vld [vmem:[%s12149_s1 + $0xfc8] sm:$0xff]  ;;  %v550_v22 = vld [vmem:[%s12149_s1 + $0x1000] sm:$0xff] }
  0x7f   :  { %5355 = vmatprep.subr.bf16.mxu1 %v5354_v28  ;;  %v5372_v28 = vpack.c.bf16 %v537_v20, %v530_v18  ;;  %v5118_v29 = vpack.c.bf16 %v550_v22, %v543_v21  ;;  %v5132_v18 = vpack.c.bf16 %v591_v9, %v584_v8  ;;  %v598_v21 = vld [vmem:[%s12149_s1 + $0x1180] sm:$0xff]  ;;  %v605_v22 = vld [vmem:[%s12149_s1 + $0x11b8] sm:$0xff]  ;;  %v664_v9 = vld [vmem:[%s12149_s1 + $0x1390] sm:$0xff] }
  0x80   :  { %v657_v8 = vld [vmem:[%s12149_s1 + $0x1358] sm:$0xff] }
  0x81   :  { %5101 = vmatpush1.bf16.msra.mxu0 %v5100_v35  ;;  %v551_v35 = vld [vmem:[%s12149_s1 + $0x1008] sm:$0xff]  ;;  %v5406_v17 = vpack.c.bf16 %v664_v9, %v657_v8  ;;  %v712_v8 = vld [vmem:[%s12149_s1 + $0x1510] sm:$0xff] }
  0x82   :  { %5357 = vmatpush1.bf16.msra.mxu1 %v5356_v36  ;;  %5103 = vmatprep.subr.bf16.mxu0 %v5102_v37  ;;  %v557_v36 = vld [vmem:[%s12149_s1 + $0x1038] sm:$0xff]  ;;  %v564_v37 = vld [vmem:[%s12149_s1 + $0x1070] sm:$0xff] }
  0x83   :  { %5359 = vmatprep.subr.bf16.mxu1 %v5358_v42  ;;  %v5376_v42 = vpack.c.bf16 %v551_v35, %v544_v33  ;;  %v5122_v43 = vpack.c.bf16 %v564_v37, %v557_v36  ;;  %v5136_v33 = vpack.c.bf16 %v605_v22, %v598_v21  ;;  %v612_v36 = vld [vmem:[%s12149_s1 + $0x11f0] sm:$0xff]  ;;  %v619_v37 = vld [vmem:[%s12149_s1 + $0x1228] sm:$0xff]  ;;  %v678_v22 = vld [vmem:[%s12149_s1 + $0x1400] sm:$0xff] }
  0x84   :  { %1151 = vmatmul.mubr.f32.vlgmr.msra.gmra.mrb[0].mxu0 %v7268_v24  ;;  %v671_v21 = vld [vmem:[%s12149_s1 + $0x13c8] sm:$0xff] }
  0x85   :  { %5105 = vmatpush1.bf16.msra.mxu0 %v5104_v48  ;;  %1435 = vmatmul.mubr.f32.vlgmr.msra.gmra.mrb[0].mxu1 %v7268_v24  ;;  %v565_v48 = vld [vmem:[%s12149_s1 + $0x1078] sm:$0xff]  ;;  %v5410_v31 = vpack.c.bf16 %v678_v22, %v671_v21  ;;  %v731_v21 = vld [vmem:[%s12149_s1 + $0x15a8] sm:$0xff]  ;;  %v726_v22 = vld [vmem:[%s12149_s1 + $0x1580] sm:$0xff] }
  0x86   :  { %5361 = vmatpush1.bf16.msra.mxu1 %v5360_v50  ;;  %5107 = vmatprep.subr.bf16.mxu0 %v5106_v51  ;;  %v571_v50 = vld [vmem:[%s12149_s1 + $0x10a8] sm:$0xff]  ;;  %v578_v51 = vld [vmem:[%s12149_s1 + $0x10e0] sm:$0xff] }
  0x87   :  { %5363 = vmatprep.subr.bf16.mxu1 %v5362_v56  ;;  %1221 = vmatprep.mubr.f32.mxu0 %v7704_v63  ;;  %v5380_v56 = vpack.c.bf16 %v565_v48, %v558_v46  ;;  %v5126_v57 = vpack.c.bf16 %v578_v51, %v571_v50  ;;  %v5140_v46 = vpack.c.bf16 %v619_v37, %v612_v36  ;;  %v626_v50 = vld [vmem:[%s12149_s1 + $0x1260] sm:$0xff]  ;;  %v633_v51 = vld [vmem:[%s12149_s1 + $0x1298] sm:$0xff]  ;;  %v692_v37 = vld [vmem:[%s12149_s1 + $0x1470] sm:$0xff] }
  0x88   :  { %1505 = vmatprep.mubr.f32.mxu1 %v7704_v63  ;;  %v685_v36 = vld [vmem:[%s12149_s1 + $0x1438] sm:$0xff] }
  0x89   :  { %5109 = vmatpush1.bf16.msra.mxu0 %v5108_v0  ;;  %v579_v0 = vld [vmem:[%s12149_s1 + $0x10e8] sm:$0xff]  ;;  %v5414_v45 = vpack.c.bf16 %v692_v37, %v685_v36  ;;  %v738_v36 = vld [vmem:[%s12149_s1 + $0x15e0] sm:$0xff]  ;;  %v745_v37 = vld [vmem:[%s12149_s1 + $0x1618] sm:$0xff] }
  0x8a   :  { %5365 = vmatpush1.bf16.msra.mxu1 %v5364_v1  ;;  %5111 = vmatprep.subr.bf16.mxu0 %v5110_v2  ;;  %v585_v1 = vld [vmem:[%s12149_s1 + $0x1118] sm:$0xff]  ;;  %v592_v2 = vld [vmem:[%s12149_s1 + $0x1150] sm:$0xff] }
  0x8b   :  { %5367 = vmatprep.subr.bf16.mxu1 %v5366_v6  ;;  %v5384_v6 = vpack.c.bf16 %v579_v0, %v572_v60  ;;  %v5130_v7 = vpack.c.bf16 %v592_v2, %v585_v1  ;;  %v5144_v60 = vpack.c.bf16 %v633_v51, %v626_v50  ;;  %v640_v1 = vld [vmem:[%s12149_s1 + $0x12d0] sm:$0xff]  ;;  %v647_v2 = vld [vmem:[%s12149_s1 + $0x1308] sm:$0xff]  ;;  %v706_v51 = vld [vmem:[%s12149_s1 + $0x14e0] sm:$0xff] }
  0x8c   :  { %v699_v50 = vld [vmem:[%s12149_s1 + $0x14a8] sm:$0xff] }
  0x8d   :  { %5113 = vmatpush1.bf16.msra.mxu0 %v5112_v13  ;;  %v593_v13 = vld [vmem:[%s12149_s1 + $0x1158] sm:$0xff]  ;;  %v5418_v59 = vpack.c.bf16 %v706_v51, %v699_v50  ;;  %v752_v50 = vld [vmem:[%s12149_s1 + $0x1650] sm:$0xff]  ;;  %v759_v51 = vld [vmem:[%s12149_s1 + $0x1688] sm:$0xff] }
  0x8e   :  { %5369 = vmatpush1.bf16.msra.mxu1 %v5368_v14  ;;  %5115 = vmatprep.subr.bf16.mxu0 %v5114_v15  ;;  %v599_v14 = vld [vmem:[%s12149_s1 + $0x1188] sm:$0xff]  ;;  %v606_v15 = vld [vmem:[%s12149_s1 + $0x11c0] sm:$0xff] }
  0x8f   :  { %5371 = vmatprep.subr.bf16.mxu1 %v5370_v19  ;;  %v5388_v19 = vpack.c.bf16 %v593_v13, %v586_v10  ;;  %v5134_v20 = vpack.c.bf16 %v606_v15, %v599_v14  ;;  %v5148_v10 = vpack.c.bf16 %v647_v2, %v640_v1  ;;  %v654_v14 = vld [vmem:[%s12149_s1 + $0x1340] sm:$0xff]  ;;  %v661_v15 = vld [vmem:[%s12149_s1 + $0x1378] sm:$0xff]  ;;  %v990_v1 = vcombine.high %v7671_v49, %v7671_v49 }
  0x90   :  { %v713_v2 = vld [vmem:[%s12149_s1 + $0x1518] sm:$0xff] }
  0x91   :  { %5117 = vmatpush1.bf16.msra.mxu0 %v5116_v27  ;;  %v607_v27 = vld [vmem:[%s12149_s1 + $0x11c8] sm:$0xff]  ;;  %v717_v49 = vld [vmem:[%s12149_s1 + $0x1538] sm:$0xff] }
  0x92   :  { %5373 = vmatpush1.bf16.msra.mxu1 %v5372_v28  ;;  %5119 = vmatprep.subr.bf16.mxu0 %v5118_v29  ;;  %v613_v28 = vld [vmem:[%s12149_s1 + $0x11f8] sm:$0xff]  ;;  %v620_v29 = vld [vmem:[%s12149_s1 + $0x1230] sm:$0xff] }
  0x93   :  { %5375 = vmatprep.subr.bf16.mxu1 %v5374_v34  ;;  %v5392_v34 = vpack.c.bf16 %v607_v27, %v600_v23  ;;  %v5138_v35 = vpack.c.bf16 %v620_v29, %v613_v28  ;;  %v5152_v23 = vpack.c.bf16 %v661_v15, %v654_v14  ;;  %v668_v28 = vld [vmem:[%s12149_s1 + $0x13b0] sm:$0xff]  ;;  %v675_v29 = vld [vmem:[%s12149_s1 + $0x13e8] sm:$0xff]  ;;  %v8066_v14 = vrot.slane %v990_v1, %v7110_v11  ;;  %v766_v1 = vld [vmem:[%s12149_s1 + $0x16c0] sm:$0xff] }
  0x94   :  { %v727_v15 = vld [vmem:[%s12149_s1 + $0x1588] sm:$0xff] }
  0x95   :  { %5121 = vmatpush1.bf16.msra.mxu0 %v5120_v41  ;;  %v621_v41 = vld [vmem:[%s12149_s1 + $0x1238] sm:$0xff] }
  0x96   :  { %5377 = vmatpush1.bf16.msra.mxu1 %v5376_v42  ;;  %5123 = vmatprep.subr.bf16.mxu0 %v5122_v43  ;;  %v627_v42 = vld [vmem:[%s12149_s1 + $0x1268] sm:$0xff]  ;;  %v634_v43 = vld [vmem:[%s12149_s1 + $0x12a0] sm:$0xff] }
  0x97   :  { %5379 = vmatprep.subr.bf16.mxu1 %v5378_v47  ;;  %v5396_v47 = vpack.c.bf16 %v621_v41, %v614_v38  ;;  %v5142_v48 = vpack.c.bf16 %v634_v43, %v627_v42  ;;  %v5156_v38 = vpack.c.bf16 %v675_v29, %v668_v28  ;;  %v682_v42 = vld [vmem:[%s12149_s1 + $0x1420] sm:$0xff]  ;;  %v689_v43 = vld [vmem:[%s12149_s1 + $0x1458] sm:$0xff]  ;;  %v8094_v29 = vcombine.high %v8066_v14, %v8066_v14 }
  0x98   :  { %v746_v28 = vld [vmem:[%s12149_s1 + $0x1620] sm:$0xff] }
  0x99   :  { %5125 = vmatpush1.bf16.msra.mxu0 %v5124_v54  ;;  %v635_v54 = vld [vmem:[%s12149_s1 + $0x12a8] sm:$0xff] }
  0x9a   :  { %5381 = vmatpush1.bf16.msra.mxu1 %v5380_v56  ;;  %5127 = vmatprep.subr.bf16.mxu0 %v5126_v57  ;;  %v641_v56 = vld [vmem:[%s12149_s1 + $0x12d8] sm:$0xff]  ;;  %v648_v57 = vld [vmem:[%s12149_s1 + $0x1310] sm:$0xff] }
  0x9b   :  { %5383 = vmatprep.subr.bf16.mxu1 %v5382_v62  ;;  %v5400_v62 = vpack.c.bf16 %v635_v54, %v628_v52  ;;  %v5146_v0 = vpack.c.bf16 %v648_v57, %v641_v56  ;;  %v5160_v52 = vpack.c.bf16 %v689_v43, %v682_v42  ;;  %v696_v56 = vld [vmem:[%s12149_s1 + $0x1490] sm:$0xff]  ;;  %v703_v57 = vld [vmem:[%s12149_s1 + $0x14c8] sm:$0xff]  ;;  %v753_v42 = vld [vmem:[%s12149_s1 + $0x1658] sm:$0xff] }
  0x9c   :  { %v760_v43 = vld [vmem:[%s12149_s1 + $0x1690] sm:$0xff] }
  0x9d   :  { %5129 = vmatpush1.bf16.msra.mxu0 %v5128_v5  ;;  %v649_v5 = vld [vmem:[%s12149_s1 + $0x1318] sm:$0xff] }
  0x9e   :  { %5385 = vmatpush1.bf16.msra.mxu1 %v5384_v6  ;;  %5131 = vmatprep.subr.bf16.mxu0 %v5130_v7  ;;  %v655_v6 = vld [vmem:[%s12149_s1 + $0x1348] sm:$0xff]  ;;  %v662_v7 = vld [vmem:[%s12149_s1 + $0x1380] sm:$0xff] }
  0x9f   :  { %5387 = vmatprep.subr.bf16.mxu1 %v5386_v12  ;;  %v5404_v12 = vpack.c.bf16 %v649_v5, %v642_v3  ;;  %v5150_v13 = vpack.c.bf16 %v662_v7, %v655_v6  ;;  %v720_v3 = vld [vmem:[%s12149_s1 + $0x1550] sm:$0xff]  ;;  %v710_v7 = vld [vmem:[%s12149_s1 + $0x1500] sm:$0xff] }
  0xa0   :  { %v5422_v9 = vpack.c.bf16 %v720_v3, %v713_v2  ;;  %v773_v2 = vld [vmem:[%s12149_s1 + $0x16f8] sm:$0xff]  ;;  %v768_v3 = vld [vmem:[%s12149_s1 + $0x16d0] sm:$0xff] }
  0xa1   :  { %5133 = vmatpush1.bf16.msra.mxu0 %v5132_v18  ;;  %v663_v18 = vld [vmem:[%s12149_s1 + $0x1388] sm:$0xff] }
  0xa2   :  { %5389 = vmatpush1.bf16.msra.mxu1 %v5388_v19  ;;  %5135 = vmatprep.subr.bf16.mxu0 %v5134_v20  ;;  %v669_v19 = vld [vmem:[%s12149_s1 + $0x13b8] sm:$0xff]  ;;  %v676_v20 = vld [vmem:[%s12149_s1 + $0x13f0] sm:$0xff] }
  0xa3   :  { %5391 = vmatprep.subr.bf16.mxu1 %v5390_v26  ;;  %v5408_v26 = vpack.c.bf16 %v663_v18, %v656_v16  ;;  %v5154_v27 = vpack.c.bf16 %v676_v20, %v669_v19  ;;  %v734_v16 = vld [vmem:[%s12149_s1 + $0x15c0] sm:$0xff]  ;;  %v724_v20 = vld [vmem:[%s12149_s1 + $0x1570] sm:$0xff] }
  0xa5   :  { %5137 = vmatpush1.bf16.msra.mxu0 %v5136_v33  ;;  %v677_v33 = vld [vmem:[%s12149_s1 + $0x13f8] sm:$0xff] }
  0xa6   :  { %5393 = vmatpush1.bf16.msra.mxu1 %v5392_v34  ;;  %5139 = vmatprep.subr.bf16.mxu0 %v5138_v35  ;;  %v683_v34 = vld [vmem:[%s12149_s1 + $0x1428] sm:$0xff]  ;;  %v690_v35 = vld [vmem:[%s12149_s1 + $0x1460] sm:$0xff] }
  0xa7   :  { %5395 = vmatprep.subr.bf16.mxu1 %v5394_v40  ;;  %v5412_v40 = vpack.c.bf16 %v677_v33, %v670_v30  ;;  %v5158_v41 = vpack.c.bf16 %v690_v35, %v683_v34  ;;  %v741_v30 = vld [vmem:[%s12149_s1 + $0x15f8] sm:$0xff]  ;;  %v5172_v33 = vpack.c.bf16 %v731_v21, %v724_v20  ;;  %v802_v20 = vld [vmem:[%s12149_s1 + $0x17e0] sm:$0xff] }
  0xa8   :  { %v797_v21 = vld [vmem:[%s12149_s1 + $0x17b8] sm:$0xff] }
  0xa9   :  { %5141 = vmatpush1.bf16.msra.mxu0 %v5140_v46  ;;  %v691_v46 = vld [vmem:[%s12149_s1 + $0x1468] sm:$0xff] }
  0xaa   :  { %5397 = vmatpush1.bf16.msra.mxu1 %v5396_v47  ;;  %5143 = vmatprep.subr.bf16.mxu0 %v5142_v48  ;;  %v697_v47 = vld [vmem:[%s12149_s1 + $0x1498] sm:$0xff]  ;;  %v704_v48 = vld [vmem:[%s12149_s1 + $0x14d0] sm:$0xff] }
  0xab   :  { %5399 = vmatprep.subr.bf16.mxu1 %v5398_v53  ;;  %v5416_v53 = vpack.c.bf16 %v691_v46, %v684_v44  ;;  %v5162_v54 = vpack.c.bf16 %v704_v48, %v697_v47  ;;  %v755_v44 = vld [vmem:[%s12149_s1 + $0x1668] sm:$0xff]  ;;  %v5176_v46 = vpack.c.bf16 %v745_v37, %v738_v36  ;;  %v5178_v48 = vpack.c.bf16 %v760_v43, %v753_v42  ;;  %v816_v36 = vld [vmem:[%s12149_s1 + $0x1850] sm:$0xff] }
  0xac   :  { %v811_v37 = vld [vmem:[%s12149_s1 + $0x1828] sm:$0xff]  ;;  %v808_v43 = vld [vmem:[%s12149_s1 + $0x1810] sm:$0xff] }
  0xad   :  { %5145 = vmatpush1.bf16.msra.mxu0 %v5144_v60  ;;  %v705_v60 = vld [vmem:[%s12149_s1 + $0x14d8] sm:$0xff] }
  0xae   :  { %5401 = vmatpush1.bf16.msra.mxu1 %v5400_v62  ;;  %5147 = vmatprep.subr.bf16.mxu0 %v5146_v0  ;;  %v711_v62 = vld [vmem:[%s12149_s1 + $0x1508] sm:$0xff]  ;;  %v718_v0 = vld [vmem:[%s12149_s1 + $0x1540] sm:$0xff]  ;;  %v5420_v5 = vpack.c.bf16 %v705_v60, %v698_v58  ;;  %v769_v58 = vld [vmem:[%s12149_s1 + $0x16d8] sm:$0xff]  ;;  %v5180_v60 = vpack.c.bf16 %v759_v51, %v752_v50 }
  0xaf   :  { %5403 = vmatprep.subr.bf16.mxu1 %v5402_v4  ;;  %v5164_v4 = vpack.c.bf16 %v703_v57, %v696_v56  ;;  %v5166_v6 = vpack.c.bf16 %v718_v0, %v711_v62  ;;  %v767_v56 = vld [vmem:[%s12149_s1 + $0x16c8] sm:$0xff]  ;;  %v774_v57 = vld [vmem:[%s12149_s1 + $0x1700] sm:$0xff]  ;;  %v825_v51 = vld [vmem:[%s12149_s1 + $0x1898] sm:$0xff] }
  0xb0   :  { %v5182_v0 = vpack.c.bf16 %v774_v57, %v767_v56  ;;  %v830_v50 = vld [vmem:[%s12149_s1 + $0x18c0] sm:$0xff] }
  0xb1   :  { %5149 = vmatpush1.bf16.msra.mxu0 %v5148_v10  ;;  %v719_v10 = vld [vmem:[%s12149_s1 + $0x1548] sm:$0xff]  ;;  %v822_v57 = vld [vmem:[%s12149_s1 + $0x1880] sm:$0xff] }
  0xb2   :  { %5405 = vmatpush1.bf16.msra.mxu1 %v5404_v12  ;;  %5151 = vmatprep.subr.bf16.mxu0 %v5150_v13  ;;  %v725_v12 = vld [vmem:[%s12149_s1 + $0x1578] sm:$0xff]  ;;  %v732_v13 = vld [vmem:[%s12149_s1 + $0x15b0] sm:$0xff]  ;;  %v5424_v18 = vpack.c.bf16 %v719_v10, %v712_v8  ;;  %v790_v8 = vld [vmem:[%s12149_s1 + $0x1780] sm:$0xff] }
  0xb3   :  { %5407 = vmatprep.subr.bf16.mxu1 %v5406_v17  ;;  %v5168_v17 = vpack.c.bf16 %v717_v49, %v710_v7  ;;  %v5170_v19 = vpack.c.bf16 %v732_v13, %v725_v12  ;;  %v788_v7 = vld [vmem:[%s12149_s1 + $0x1770] sm:$0xff]  ;;  %v783_v49 = vld [vmem:[%s12149_s1 + $0x1748] sm:$0xff] }
  0xb4   :  { %v780_v13 = vld [vmem:[%s12149_s1 + $0x1730] sm:$0xff] }
  0xb5   :  { %5153 = vmatpush1.bf16.msra.mxu0 %v5152_v23  ;;  %v5426_v23 = vpack.c.bf16 %v734_v16, %v727_v15  ;;  %v787_v15 = vld [vmem:[%s12149_s1 + $0x1768] sm:$0xff]  ;;  %v782_v16 = vld [vmem:[%s12149_s1 + $0x1740] sm:$0xff] }
  0xb6   :  { %5409 = vmatpush1.bf16.msra.mxu1 %v5408_v26  ;;  %5155 = vmatprep.subr.bf16.mxu0 %v5154_v27  ;;  %v733_v26 = vld [vmem:[%s12149_s1 + $0x15b8] sm:$0xff]  ;;  %v739_v27 = vld [vmem:[%s12149_s1 + $0x15e8] sm:$0xff] }
  0xb7   :  { %5411 = vmatprep.subr.bf16.mxu1 %v5410_v31  ;;  %v748_v31 = vld [vmem:[%s12149_s1 + $0x1630] sm:$0xff]  ;;  %v5428_v34 = vpack.c.bf16 %v733_v26, %v726_v22  ;;  %v5174_v35 = vpack.c.bf16 %v746_v28, %v739_v27  ;;  %v794_v28 = vld [vmem:[%s12149_s1 + $0x17a0] sm:$0xff] }
  0xb8   :  { %v804_v22 = vld [vmem:[%s12149_s1 + $0x17f0] sm:$0xff] }
  0xb9   :  { %5157 = vmatpush1.bf16.msra.mxu0 %v5156_v38  ;;  %v740_v38 = vld [vmem:[%s12149_s1 + $0x15f0] sm:$0xff] }
  0xba   :  { %5413 = vmatpush1.bf16.msra.mxu1 %v5412_v40  ;;  %5159 = vmatprep.subr.bf16.mxu0 %v5158_v41  ;;  %v5430_v40 = vpack.c.bf16 %v748_v31, %v741_v30  ;;  %v747_v41 = vld [vmem:[%s12149_s1 + $0x1628] sm:$0xff]  ;;  %v801_v30 = vld [vmem:[%s12149_s1 + $0x17d8] sm:$0xff]  ;;  %v796_v31 = vld [vmem:[%s12149_s1 + $0x17b0] sm:$0xff] }
  0xbb   :  { %5415 = vmatprep.subr.bf16.mxu1 %v5414_v45  ;;  %v762_v45 = vld [vmem:[%s12149_s1 + $0x16a0] sm:$0xff]  ;;  %v5432_v47 = vpack.c.bf16 %v747_v41, %v740_v38 }
  0xbc   :  { %v818_v38 = vld [vmem:[%s12149_s1 + $0x1860] sm:$0xff] }
  0xbd   :  { %5161 = vmatpush1.bf16.msra.mxu0 %v5160_v52  ;;  %v754_v52 = vld [vmem:[%s12149_s1 + $0x1660] sm:$0xff] }
  0xbe   :  { %5417 = vmatpush1.bf16.msra.mxu1 %v5416_v53  ;;  %5163 = vmatprep.subr.bf16.mxu0 %v5162_v54  ;;  %v5434_v53 = vpack.c.bf16 %v762_v45, %v755_v44  ;;  %v761_v54 = vld [vmem:[%s12149_s1 + $0x1698] sm:$0xff]  ;;  %v815_v44 = vld [vmem:[%s12149_s1 + $0x1848] sm:$0xff]  ;;  %v810_v45 = vld [vmem:[%s12149_s1 + $0x1820] sm:$0xff] }
  0xbf   :  { %5419 = vmatprep.subr.bf16.mxu1 %v5418_v59  ;;  %v776_v59 = vld [vmem:[%s12149_s1 + $0x1710] sm:$0xff]  ;;  %v5436_v62 = vpack.c.bf16 %v761_v54, %v754_v52 }
  0xc0   :  { %v832_v52 = vld [vmem:[%s12149_s1 + $0x18d0] sm:$0xff] }
  0xc1   :  { %5165 = vmatpush1.bf16.msra.mxu0 %v5164_v4  ;;  %v5438_v4 = vpack.c.bf16 %v776_v59, %v769_v58  ;;  %v829_v58 = vld [vmem:[%s12149_s1 + $0x18b8] sm:$0xff]  ;;  %v824_v59 = vld [vmem:[%s12149_s1 + $0x1890] sm:$0xff] }
  0xc2   :  { %5421 = vmatpush1.bf16.msra.mxu1 %v5420_v5  ;;  %5167 = vmatprep.subr.bf16.mxu0 %v5166_v6  ;;  %v775_v5 = vld [vmem:[%s12149_s1 + $0x1708] sm:$0xff]  ;;  %v781_v6 = vld [vmem:[%s12149_s1 + $0x1738] sm:$0xff] }
  0xc3   :  { %5423 = vmatprep.subr.bf16.mxu1 %v5422_v9  ;;  %v5184_v9 = vpack.c.bf16 %v773_v2, %v766_v1  ;;  %v5440_v10 = vpack.c.bf16 %v775_v5, %v768_v3  ;;  %v5186_v12 = vpack.c.bf16 %v788_v7, %v781_v6  ;;  %v844_v1 = vld [vmem:[%s12149_s1 + $0x1930] sm:$0xff]  ;;  %v839_v2 = vld [vmem:[%s12149_s1 + $0x1908] sm:$0xff]  ;;  %v846_v3 = vld [vmem:[%s12149_s1 + $0x1940] sm:$0xff] }
  0xc4   :  { %1222 = vmatmul.mubr.f32.vlgmr.msra.gmra.mrb[0].mxu0 %v7684_v55  ;;  %v836_v7 = vld [vmem:[%s12149_s1 + $0x18f0] sm:$0xff] }
  0xc5   :  { %5169 = vmatpush1.bf16.msra.mxu0 %v5168_v17  ;;  %1506 = vmatmul.mubr.f32.vlgmr.msra.gmra.mrb[0].mxu1 %v7684_v55  ;;  %v5442_v17 = vpack.c.bf16 %v790_v8, %v783_v49  ;;  %v843_v49 = vld [vmem:[%s12149_s1 + $0x1928] sm:$0xff]  ;;  %v838_v8 = vld [vmem:[%s12149_s1 + $0x1900] sm:$0xff] }
  0xc6   :  { %5425 = vmatpush1.bf16.msra.mxu1 %v5424_v18  ;;  %5171 = vmatprep.subr.bf16.mxu0 %v5170_v19  ;;  %v789_v18 = vld [vmem:[%s12149_s1 + $0x1778] sm:$0xff]  ;;  %v795_v19 = vld [vmem:[%s12149_s1 + $0x17a8] sm:$0xff] }
  0xc7   :  { %5427 = vmatprep.subr.bf16.mxu1 %v5426_v23  ;;  %1292 = vmatprep.mubr.f32.mxu0 %v8094_v29  ;;  %v5188_v23 = vpack.c.bf16 %v787_v15, %v780_v13  ;;  %v5444_v26 = vpack.c.bf16 %v789_v18, %v782_v16  ;;  %v5190_v27 = vpack.c.bf16 %v802_v20, %v795_v19  ;;  %v858_v13 = vld [vmem:[%s12149_s1 + $0x19a0] sm:$0xff]  ;;  %v853_v15 = vld [vmem:[%s12149_s1 + $0x1978] sm:$0xff]  ;;  %v860_v16 = vld [vmem:[%s12149_s1 + $0x19b0] sm:$0xff] }
  0xc8   :  { %1576 = vmatprep.mubr.f32.mxu1 %v8094_v29  ;;  %v850_v20 = vld [vmem:[%s12149_s1 + $0x1960] sm:$0xff] }
  0xc9   :  { %5173 = vmatpush1.bf16.msra.mxu0 %v5172_v33  ;;  %v5446_v33 = vpack.c.bf16 %v804_v22, %v797_v21  ;;  %v857_v21 = vld [vmem:[%s12149_s1 + $0x1998] sm:$0xff]  ;;  %v852_v22 = vld [vmem:[%s12149_s1 + $0x1970] sm:$0xff] }
  0xca   :  { %5429 = vmatpush1.bf16.msra.mxu1 %v5428_v34  ;;  %5175 = vmatprep.subr.bf16.mxu0 %v5174_v35  ;;  %v803_v34 = vld [vmem:[%s12149_s1 + $0x17e8] sm:$0xff]  ;;  %v809_v35 = vld [vmem:[%s12149_s1 + $0x1818] sm:$0xff] }
  0xcb   :  { %5431 = vmatprep.subr.bf16.mxu1 %v5430_v40  ;;  %v5192_v40 = vpack.c.bf16 %v801_v30, %v794_v28  ;;  %v5448_v41 = vpack.c.bf16 %v803_v34, %v796_v31  ;;  %v5194_v42 = vpack.c.bf16 %v816_v36, %v809_v35  ;;  %v872_v28 = vld [vmem:[%s12149_s1 + $0x1a10] sm:$0xff]  ;;  %v867_v30 = vld [vmem:[%s12149_s1 + $0x19e8] sm:$0xff]  ;;  %v874_v31 = vld [vmem:[%s12149_s1 + $0x1a20] sm:$0xff] }
  0xcc   :  { %v864_v34 = vld [vmem:[%s12149_s1 + $0x19d0] sm:$0xff] }
  0xcd   :  { %5177 = vmatpush1.bf16.msra.mxu0 %v5176_v46  ;;  %v5450_v46 = vpack.c.bf16 %v818_v38, %v811_v37  ;;  %v871_v37 = vld [vmem:[%s12149_s1 + $0x1a08] sm:$0xff]  ;;  %v866_v38 = vld [vmem:[%s12149_s1 + $0x19e0] sm:$0xff] }
  0xce   :  { %5433 = vmatpush1.bf16.msra.mxu1 %v5432_v47  ;;  %5179 = vmatprep.subr.bf16.mxu0 %v5178_v48  ;;  %v817_v47 = vld [vmem:[%s12149_s1 + $0x1858] sm:$0xff]  ;;  %v823_v48 = vld [vmem:[%s12149_s1 + $0x1888] sm:$0xff] }
  0xcf   :  { %5435 = vmatprep.subr.bf16.mxu1 %v5434_v53  ;;  %v5196_v53 = vpack.c.bf16 %v815_v44, %v808_v43  ;;  %v5452_v54 = vpack.c.bf16 %v817_v47, %v810_v45  ;;  %v5198_v56 = vpack.c.bf16 %v830_v50, %v823_v48  ;;  %v886_v43 = vld [vmem:[%s12149_s1 + $0x1a80] sm:$0xff] }
  0xd1   :  { %5181 = vmatpush1.bf16.msra.mxu0 %v5180_v60  ;;  %v5454_v60 = vpack.c.bf16 %v832_v52, %v825_v51 }
  0xd2   :  { %5437 = vmatpush1.bf16.msra.mxu1 %v5436_v62  ;;  %5183 = vmatprep.subr.bf16.mxu0 %v5182_v0  ;;  %v831_v62 = vld [vmem:[%s12149_s1 + $0x18c8] sm:$0xff]  ;;  %v837_v0 = vld [vmem:[%s12149_s1 + $0x18f8] sm:$0xff] }
  0xd3   :  { %5439 = vmatprep.subr.bf16.mxu1 %v5438_v4  ;;  %v5200_v4 = vpack.c.bf16 %v829_v58, %v822_v57  ;;  %v5456_v5 = vpack.c.bf16 %v831_v62, %v824_v59  ;;  %v5202_v6 = vpack.c.bf16 %v844_v1, %v837_v0 }
  0xd5   :  { %5185 = vmatpush1.bf16.msra.mxu0 %v5184_v9  ;;  %v5458_v9 = vpack.c.bf16 %v846_v3, %v839_v2 }
  0xd6   :  { %5441 = vmatpush1.bf16.msra.mxu1 %v5440_v10  ;;  %5187 = vmatprep.subr.bf16.mxu0 %v5186_v12  ;;  %v845_v10 = vld [vmem:[%s12149_s1 + $0x1938] sm:$0xff]  ;;  %v851_v12 = vld [vmem:[%s12149_s1 + $0x1968] sm:$0xff] }
  0xd7   :  { %5443 = vmatprep.subr.bf16.mxu1 %v5442_v17  ;;  %v5204_v17 = vpack.c.bf16 %v843_v49, %v836_v7  ;;  %v5460_v18 = vpack.c.bf16 %v845_v10, %v838_v8  ;;  %v5206_v19 = vpack.c.bf16 %v858_v13, %v851_v12 }
  0xd9   :  { %5189 = vmatpush1.bf16.msra.mxu0 %v5188_v23  ;;  %v5462_v23 = vpack.c.bf16 %v860_v16, %v853_v15 }
  0xda   :  { %5445 = vmatpush1.bf16.msra.mxu1 %v5444_v26  ;;  %5191 = vmatprep.subr.bf16.mxu0 %v5190_v27  ;;  %v859_v26 = vld [vmem:[%s12149_s1 + $0x19a8] sm:$0xff]  ;;  %v865_v27 = vld [vmem:[%s12149_s1 + $0x19d8] sm:$0xff] }
  0xdb   :  { %5447 = vmatprep.subr.bf16.mxu1 %v5446_v33  ;;  %v5208_v33 = vpack.c.bf16 %v857_v21, %v850_v20  ;;  %v5464_v35 = vpack.c.bf16 %v859_v26, %v852_v22  ;;  %v5210_v36 = vpack.c.bf16 %v872_v28, %v865_v27 }
  0xdd   :  { %5193 = vmatpush1.bf16.msra.mxu0 %v5192_v40  ;;  %v873_v40 = vld [vmem:[%s12149_s1 + $0x1a18] sm:$0xff] }
  0xde   :  { %5449 = vmatpush1.bf16.msra.mxu1 %v5448_v41  ;;  %5195 = vmatprep.subr.bf16.mxu0 %v5194_v42  ;;  %v5466_v41 = vpack.c.bf16 %v874_v31, %v867_v30  ;;  %v879_v42 = vld [vmem:[%s12149_s1 + $0x1a48] sm:$0xff] }
  0xdf   :  { %5451 = vmatprep.subr.bf16.mxu1 %v5450_v46 }
  0xe1   :  { %5197 = vmatpush1.bf16.msra.mxu0 %v5196_v53 }
  0xe2   :  { %5453 = vmatpush1.bf16.msra.mxu1 %v5452_v54  ;;  %5199 = vmatprep.subr.bf16.mxu0 %v5198_v56 }
  0xe3   :  { %5455 = vmatprep.subr.bf16.mxu1 %v5454_v60 }
  0xe5   :  { %5201 = vmatpush1.bf16.msra.mxu0 %v5200_v4 }
  0xe6   :  { %5457 = vmatpush1.bf16.msra.mxu1 %v5456_v5  ;;  %5203 = vmatprep.subr.bf16.mxu0 %v5202_v6 }
  0xe7   :  { %5459 = vmatprep.subr.bf16.mxu1 %v5458_v9 }
  0xe9   :  { %5205 = vmatpush1.bf16.msra.mxu0 %v5204_v17 }
  0xea   :  { %5461 = vmatpush1.bf16.msra.mxu1 %v5460_v18  ;;  %5207 = vmatprep.subr.bf16.mxu0 %v5206_v19 }
  0xeb   :  { %5463 = vmatprep.subr.bf16.mxu1 %v5462_v23 }
  0xec   :  { %17 = vsyncpa [#allocation5], 0  ;;  %v881_v44 = vld [vmem:[%s12149_s1 + $0x1a58] sm:$0xff]  ;;  %v888_v45 = vld [vmem:[%s12149_s1 + $0x1a90] sm:$0xff]  ;;  %v5212_v46 = vpack.c.bf16 %v871_v37, %v864_v34  ;;  %v5468_v47 = vpack.c.bf16 %v873_v40, %v866_v38  ;;  %v5214_v48 = vpack.c.bf16 %v886_v43, %v879_v42  ;;  %vm2877_vm0 = vcmask 130048   ;;  %s6774_s18 = smov [#allocation4]  }
  0xed   :  { %5209 = vmatpush1.bf16.msra.mxu0 %v5208_v33  ;;  %v878_v50 = vld [vmem:[%s12149_s1 + $0x1a40] sm:$0xff]  ;;  %v885_v51 = vld [vmem:[%s12149_s1 + $0x1a78] sm:$0xff]  ;;  %v880_v52 = vld [vmem:[%s12149_s1 + $0x1a50] sm:$0xff]  ;;  %v5470_v53 = vpack.c.bf16 %v888_v45, %v881_v44  ;;  %vm6773_vm1 = vmmov 0   ;;  %vm4063_vm2 = vcmask 1041408   ;;  %vm4064_vm3 = vcmask 1043458  }
  0xee   :  { %5465 = vmatpush1.bf16.msra.mxu1 %v5464_v35  ;;  %5211 = vmatprep.subr.bf16.mxu0 %v5210_v36  ;;  %v887_v54 = vld [vmem:[%s12149_s1 + $0x1a88] sm:$0xff]  ;;  %v893_v56 = vld [vmem:[%s12149_s1 + $0x1ab8] sm:$0xff]  ;;  %v900_v57 = vld [vmem:[%s12149_s1 + $0x1af0] sm:$0xff]  ;;  %v5216_v60 = vpack.c.bf16 %v885_v51, %v878_v50  ;;  %vm4176_vm4 = vcmask 261120   ;;  %vm4066_vm6 = vcmask 259076  }
  0xef   :  { %5467 = vmatprep.subr.bf16.mxu1 %v5466_v41  ;;  %v895_v58 = vld [vmem:[%s12149_s1 + $0x1ac8] sm:$0xff]  ;;  %v902_v59 = vld [vmem:[%s12149_s1 + $0x1b00] sm:$0xff]  ;;  %v5472_v62 = vpack.c.bf16 %v887_v54, %v880_v52  ;;  %v5218_v0 = vpack.c.bf16 %v900_v57, %v893_v56  ;;  %v892_v1 = vld [vmem:[%s12149_s1 + $0x1ab0] sm:$0xff] }
  0xf0   :  { %v899_v2 = vld [vmem:[%s12149_s1 + $0x1ae8] sm:$0xff]  ;;  %v894_v3 = vld [vmem:[%s12149_s1 + $0x1ac0] sm:$0xff]  ;;  %v5474_v4 = vpack.c.bf16 %v902_v59, %v895_v58  ;;  %v901_v5 = vld [vmem:[%s12149_s1 + $0x1af8] sm:$0xff] }
  0xf1   :  { %5213 = vmatpush1.bf16.msra.mxu0 %v5212_v46  ;;  %v907_v6 = vld [vmem:[%s12149_s1 + $0x1b28] sm:$0xff]  ;;  %v914_v7 = vld [vmem:[%s12149_s1 + $0x1b60] sm:$0xff]  ;;  %v909_v49 = vld [vmem:[%s12149_s1 + $0x1b38] sm:$0xff]  ;;  %v5220_v9 = vpack.c.bf16 %v899_v2, %v892_v1  ;;  %v5476_v10 = vpack.c.bf16 %v901_v5, %v894_v3 }
  0xf2   :  { %5469 = vmatpush1.bf16.msra.mxu1 %v5468_v47  ;;  %5215 = vmatprep.subr.bf16.mxu0 %v5214_v48  ;;  %v916_v8 = vld [vmem:[%s12149_s1 + $0x1b70] sm:$0xff]  ;;  %v5222_v12 = vpack.c.bf16 %v914_v7, %v907_v6  ;;  %v906_v13 = vld [vmem:[%s12149_s1 + $0x1b20] sm:$0xff]  ;;  %v913_v15 = vld [vmem:[%s12149_s1 + $0x1b58] sm:$0xff] }
  0xf3   :  { %5471 = vmatprep.subr.bf16.mxu1 %v5470_v53  ;;  %v908_v16 = vld [vmem:[%s12149_s1 + $0x1b30] sm:$0xff]  ;;  %v5478_v17 = vpack.c.bf16 %v916_v8, %v909_v49  ;;  %v915_v18 = vld [vmem:[%s12149_s1 + $0x1b68] sm:$0xff]  ;;  %v921_v19 = vld [vmem:[%s12149_s1 + $0x1b98] sm:$0xff]  ;;  %v5224_v23 = vpack.c.bf16 %v913_v15, %v906_v13 }
  0xf4   :  { %v928_v20 = vld [vmem:[%s12149_s1 + $0x1bd0] sm:$0xff]  ;;  %v923_v21 = vld [vmem:[%s12149_s1 + $0x1ba8] sm:$0xff]  ;;  %v930_v22 = vld [vmem:[%s12149_s1 + $0x1be0] sm:$0xff]  ;;  %v5480_v26 = vpack.c.bf16 %v915_v18, %v908_v16 }
  0xf5   :  { %5217 = vmatpush1.bf16.msra.mxu0 %v5216_v60  ;;  %v5226_v27 = vpack.c.bf16 %v928_v20, %v921_v19  ;;  %v920_v28 = vld [vmem:[%s12149_s1 + $0x1b90] sm:$0xff]  ;;  %v927_v30 = vld [vmem:[%s12149_s1 + $0x1bc8] sm:$0xff]  ;;  %v922_v31 = vld [vmem:[%s12149_s1 + $0x1ba0] sm:$0xff]  ;;  %v5482_v33 = vpack.c.bf16 %v930_v22, %v923_v21 }
  0xf6   :  { %5473 = vmatpush1.bf16.msra.mxu1 %v5472_v62  ;;  %5219 = vmatprep.subr.bf16.mxu0 %v5218_v0  ;;  %v929_v34 = vld [vmem:[%s12149_s1 + $0x1bd8] sm:$0xff]  ;;  %v43_v35 = vld [vmem:[%s12149_s1 + $0x28] sm:$0xff]  ;;  %v50_v36 = vld [vmem:[%s12149_s1 + $0x60] sm:$0xff]  ;;  %v5228_v40 = vpack.c.bf16 %v927_v30, %v920_v28 }
  0xf7   :  { %5475 = vmatprep.subr.bf16.mxu1 %v5474_v4  ;;  %v156_v37 = vld [vmem:[%s12149_s1 + $0x3b0] sm:$0xff]  ;;  %v163_v38 = vld [vmem:[%s12149_s1 + $0x3e8] sm:$0xff]  ;;  %v5484_v41 = vpack.c.bf16 %v929_v34, %v922_v31  ;;  %v5486_v42 = vpack.c.bf16 %v50_v36, %v43_v35  ;;  %v42_v43 = vld [vmem:[%s12149_s1 + $0x20] sm:$0xff] }
  0xf8   :  { %v49_v44 = vld [vmem:[%s12149_s1 + $0x58] sm:$0xff]  ;;  %v64_v46 = vld [vmem:[%s12149_s1 + $0xd0] sm:$0xff]  ;;  %v5742_v47 = vpack.c.bf16 %v163_v38, %v156_v37  ;;  %v51_v50 = vld [vmem:[%s12149_s1 + $0x68] sm:$0xff] }
  0xf9   :  { %5221 = vmatpush1.bf16.msra.mxu0 %v5220_v9  ;;  %v57_v45 = vld [vmem:[%s12149_s1 + $0x98] sm:$0xff]  ;;  %v44_v48 = vld [vmem:[%s12149_s1 + $0x30] sm:$0xff]  ;;  %v170_v51 = vld [vmem:[%s12149_s1 + $0x420] sm:$0xff]  ;;  %v5488_v53 = vpack.c.bf16 %v49_v44, %v42_v43 }
  0xfa   :  { %5477 = vmatpush1.bf16.msra.mxu1 %v5476_v10  ;;  %5223 = vmatprep.subr.bf16.mxu0 %v5222_v12  ;;  %v177_v52 = vld [vmem:[%s12149_s1 + $0x458] sm:$0xff]  ;;  %v5490_v54 = vpack.c.bf16 %v64_v46, %v57_v45  ;;  %v56_v56 = vld [vmem:[%s12149_s1 + $0x90] sm:$0xff]  ;;  %v63_v57 = vld [vmem:[%s12149_s1 + $0xc8] sm:$0xff]  ;;  %v5744_v59 = vpack.c.bf16 %v51_v50, %v44_v48 }
  0xfb   :  { %5479 = vmatprep.subr.bf16.mxu1 %v5478_v17  ;;  %v71_v58 = vld [vmem:[%s12149_s1 + $0x108] sm:$0xff]  ;;  %v78_v60 = vld [vmem:[%s12149_s1 + $0x140] sm:$0xff]  ;;  %v5746_v62 = vpack.c.bf16 %v177_v52, %v170_v51  ;;  %v65_v1 = vld [vmem:[%s12149_s1 + $0xd8] sm:$0xff]  ;;  %v5492_v4 = vpack.c.bf16 %v63_v57, %v56_v56 }
  0xfc   :  { %v58_v0 = vld [vmem:[%s12149_s1 + $0xa0] sm:$0xff]  ;;  %v184_v2 = vld [vmem:[%s12149_s1 + $0x490] sm:$0xff]  ;;  %v191_v3 = vld [vmem:[%s12149_s1 + $0x4c8] sm:$0xff]  ;;  %v5494_v5 = vpack.c.bf16 %v78_v60, %v71_v58 }
  0xfd   :  { %5225 = vmatpush1.bf16.msra.mxu0 %v5224_v23  ;;  %v70_v6 = vld [vmem:[%s12149_s1 + $0x100] sm:$0xff]  ;;  %v77_v7 = vld [vmem:[%s12149_s1 + $0x138] sm:$0xff]  ;;  %v5748_v8 = vpack.c.bf16 %v65_v1, %v58_v0  ;;  %v92_v9 = vld [vmem:[%s12149_s1 + $0x1b0] sm:$0xff]  ;;  %v5750_v10 = vpack.c.bf16 %v191_v3, %v184_v2 }
  0xfe   :  { %5481 = vmatpush1.bf16.msra.mxu1 %v5480_v26  ;;  %5227 = vmatprep.subr.bf16.mxu0 %v5226_v27  ;;  %v85_v49 = vld [vmem:[%s12149_s1 + $0x178] sm:$0xff]  ;;  %v72_v12 = vld [vmem:[%s12149_s1 + $0x110] sm:$0xff]  ;;  %v79_v13 = vld [vmem:[%s12149_s1 + $0x148] sm:$0xff]  ;;  %v5496_v17 = vpack.c.bf16 %v77_v7, %v70_v6 }
  0xff   :  { %5483 = vmatprep.subr.bf16.mxu1 %v5482_v33  ;;  %v198_v15 = vld [vmem:[%s12149_s1 + $0x500] sm:$0xff]  ;;  %v205_v16 = vld [vmem:[%s12149_s1 + $0x538] sm:$0xff]  ;;  %v5498_v18 = vpack.c.bf16 %v92_v9, %v85_v49  ;;  %v84_v19 = vld [vmem:[%s12149_s1 + $0x170] sm:$0xff]  ;;  %v5752_v22 = vpack.c.bf16 %v79_v13, %v72_v12 }
 0x100   :  { %v91_v20 = vld [vmem:[%s12149_s1 + $0x1a8] sm:$0xff]  ;;  %v5754_v23 = vpack.c.bf16 %v205_v16, %v198_v15  ;;  %v86_v26 = vld [vmem:[%s12149_s1 + $0x180] sm:$0xff]  ;;  %v93_v27 = vld [vmem:[%s12149_s1 + $0x1b8] sm:$0xff] }
 0x101   :  { %5229 = vmatpush1.bf16.msra.mxu0 %v5228_v40  ;;  %v99_v21 = vld [vmem:[%s12149_s1 + $0x1e8] sm:$0xff]  ;;  %v212_v28 = vld [vmem:[%s12149_s1 + $0x570] sm:$0xff]  ;;  %v5500_v31 = vpack.c.bf16 %v91_v20, %v84_v19  ;;  %v98_v34 = vld [vmem:[%s12149_s1 + $0x1e0] sm:$0xff]  ;;  %v5756_v37 = vpack.c.bf16 %v93_v27, %v86_v26 }
 0x102   :  { %5485 = vmatpush1.bf16.msra.mxu1 %v5484_v41  ;;  %5487 = vmatprep.subr.bf16.mxu0 %v5486_v42  ;;  %v219_v30 = vld [vmem:[%s12149_s1 + $0x5a8] sm:$0xff]  ;;  %v105_v35 = vld [vmem:[%s12149_s1 + $0x218] sm:$0xff]  ;;  %v120_v38 = vld [vmem:[%s12149_s1 + $0x290] sm:$0xff] }
 0x103   :  { %5743 = vmatprep.subr.bf16.mxu1 %v5742_v47  ;;  %v113_v36 = vld [vmem:[%s12149_s1 + $0x258] sm:$0xff]  ;;  %v5758_v40 = vpack.c.bf16 %v219_v30, %v212_v28  ;;  %v100_v41 = vld [vmem:[%s12149_s1 + $0x1f0] sm:$0xff]  ;;  %v107_v42 = vld [vmem:[%s12149_s1 + $0x228] sm:$0xff]  ;;  %v5504_v45 = vpack.c.bf16 %v105_v35, %v98_v34 }
 0x104   :  { %1293 = vmatmul.mubr.f32.vlgmr.msra.gmra.mrb[0].mxu0 %v8066_v14  ;;  %v226_v43 = vld [vmem:[%s12149_s1 + $0x5e0] sm:$0xff]  ;;  %v233_v44 = vld [vmem:[%s12149_s1 + $0x618] sm:$0xff]  ;;  %v5506_v46 = vpack.c.bf16 %v120_v38, %v113_v36  ;;  %v112_v47 = vld [vmem:[%s12149_s1 + $0x250] sm:$0xff]  ;;  %v5760_v51 = vpack.c.bf16 %v107_v42, %v100_v41 }
 0x105   :  { %1577 = vmatmul.mubr.f32.vlgmr.msra.gmra.mrb[0].mxu1 %v8066_v14  ;;  %5489 = vmatpush1.bf16.msra.mxu0 %v5488_v53  ;;  %v119_v48 = vld [vmem:[%s12149_s1 + $0x288] sm:$0xff]  ;;  %v134_v52 = vld [vmem:[%s12149_s1 + $0x300] sm:$0xff]  ;;  %v5762_v53 = vpack.c.bf16 %v233_v44, %v226_v43  ;;  %v121_v56 = vld [vmem:[%s12149_s1 + $0x298] sm:$0xff] }
 0x106   :  { %5491 = vmatprep.subr.bf16.mxu0 %v5490_v54  ;;  %5745 = vmatpush3.bf16.msra.mxu1 %v5744_v59  ;;  %v127_v50 = vld [vmem:[%s12149_s1 + $0x2c8] sm:$0xff]  ;;  %v114_v54 = vld [vmem:[%s12149_s1 + $0x260] sm:$0xff]  ;;  %v240_v57 = vld [vmem:[%s12149_s1 + $0x650] sm:$0xff]  ;;  %v5508_v59 = vpack.c.bf16 %v119_v48, %v112_v47 }
 0x107   :  { %5747 = vmatprep.subr.bf16.mxu1 %v5746_v62  ;;  %1931 = vmatprep.mubr.f32.mxu1 %v7156_v32  ;;  %v247_v58 = vld [vmem:[%s12149_s1 + $0x688] sm:$0xff]  ;;  %v5510_v60 = vpack.c.bf16 %v134_v52, %v127_v50  ;;  %v126_v62 = vld [vmem:[%s12149_s1 + $0x2c0] sm:$0xff]  ;;  %v133_v0 = vld [vmem:[%s12149_s1 + $0x2f8] sm:$0xff]  ;;  %v5764_v2 = vpack.c.bf16 %v121_v56, %v114_v54 }
 0x108   :  { %1647 = vmatprep.mubr.f32.mxu0 %v7156_v32  ;;  %v106_v32 = vld [vmem:[%s12149_s1 + $0x220] sm:$0xff]  ;;  %v141_v1 = vld [vmem:[%s12149_s1 + $0x338] sm:$0xff]  ;;  %v148_v3 = vld [vmem:[%s12149_s1 + $0x370] sm:$0xff] }
 0x109   :  { %5493 = vmatpush1.bf16.msra.mxu0 %v5492_v4  ;;  %v5502_v33 = vpack.c.bf16 %v106_v32, %v99_v21  ;;  %v5766_v4 = vpack.c.bf16 %v247_v58, %v240_v57  ;;  %v135_v6 = vld [vmem:[%s12149_s1 + $0x308] sm:$0xff]  ;;  %v254_v7 = vld [vmem:[%s12149_s1 + $0x6c0] sm:$0xff]  ;;  %v261_v49 = vld [vmem:[%s12149_s1 + $0x6f8] sm:$0xff]  ;;  %v5514_v9 = vpack.c.bf16 %v148_v3, %v141_v1 }
 0x10a   :  { %5495 = vmatprep.subr.bf16.mxu0 %v5494_v5  ;;  %5749 = vmatpush3.bf16.msra.mxu1 %v5748_v8  ;;  %v128_v5 = vld [vmem:[%s12149_s1 + $0x2d0] sm:$0xff]  ;;  %v5512_v8 = vpack.c.bf16 %v133_v0, %v126_v62  ;;  %v147_v12 = vld [vmem:[%s12149_s1 + $0x368] sm:$0xff]  ;;  %v162_v16 = vld [vmem:[%s12149_s1 + $0x3e0] sm:$0xff] }
 0x10b   :  { %5751 = vmatprep.subr.bf16.mxu1 %v5750_v10  ;;  %v140_v10 = vld [vmem:[%s12149_s1 + $0x330] sm:$0xff]  ;;  %v155_v13 = vld [vmem:[%s12149_s1 + $0x3a8] sm:$0xff]  ;;  %v5768_v15 = vpack.c.bf16 %v135_v6, %v128_v5  ;;  %v149_v19 = vld [vmem:[%s12149_s1 + $0x378] sm:$0xff] }
 0x10c   :  { %v380_v20 = vld [vmem:[%s12149_s1 + $0xab0] sm:$0xff]  ;;  %v387_v21 = vld [vmem:[%s12149_s1 + $0xae8] sm:$0xff]  ;;  %v5518_v32 = vpack.c.bf16 %v162_v16, %v155_v13  ;;  %v161_v26 = vld [vmem:[%s12149_s1 + $0x3d8] sm:$0xff] }
 0x10d   :  { %5497 = vmatpush1.bf16.msra.mxu0 %v5496_v17  ;;  %v5770_v17 = vpack.c.bf16 %v261_v49, %v254_v7  ;;  %v169_v27 = vld [vmem:[%s12149_s1 + $0x418] sm:$0xff]  ;;  %v176_v30 = vld [vmem:[%s12149_s1 + $0x450] sm:$0xff]  ;;  %v275_v34 = vld [vmem:[%s12149_s1 + $0x768] sm:$0xff] }
 0x10e   :  { %5499 = vmatprep.subr.bf16.mxu0 %v5498_v18  ;;  %5753 = vmatpush3.bf16.msra.mxu1 %v5752_v22  ;;  %v142_v18 = vld [vmem:[%s12149_s1 + $0x340] sm:$0xff]  ;;  %v5516_v22 = vpack.c.bf16 %v147_v12, %v140_v10  ;;  %v401_v36 = vld [vmem:[%s12149_s1 + $0xb58] sm:$0xff]  ;;  %v5522_v38 = vpack.c.bf16 %v176_v30, %v169_v27  ;;  %v175_v41 = vld [vmem:[%s12149_s1 + $0x448] sm:$0xff] }
 0x10f   :  { %5755 = vmatprep.subr.bf16.mxu1 %v5754_v23  ;;  %v154_v23 = vld [vmem:[%s12149_s1 + $0x3a0] sm:$0xff]  ;;  %v5772_v28 = vpack.c.bf16 %v149_v19, %v142_v18  ;;  %v183_v42 = vld [vmem:[%s12149_s1 + $0x488] sm:$0xff]  ;;  %v289_v47 = vld [vmem:[%s12149_s1 + $0x7d8] sm:$0xff] }
 0x110   :  { %v394_v35 = vld [vmem:[%s12149_s1 + $0xb20] sm:$0xff]  ;;  %v408_v48 = vld [vmem:[%s12149_s1 + $0xb90] sm:$0xff]  ;;  %v415_v50 = vld [vmem:[%s12149_s1 + $0xbc8] sm:$0xff] }
 0x111   :  { %5501 = vmatpush1.bf16.msra.mxu0 %v5500_v31  ;;  %v5774_v31 = vpack.c.bf16 %v387_v21, %v380_v20  ;;  %v190_v44 = vld [vmem:[%s12149_s1 + $0x4c0] sm:$0xff]  ;;  %v189_v54 = vld [vmem:[%s12149_s1 + $0x4b8] sm:$0xff]  ;;  %v204_v58 = vld [vmem:[%s12149_s1 + $0x530] sm:$0xff] }
 0x112   :  { %5503 = vmatprep.subr.bf16.mxu0 %v5502_v33  ;;  %5757 = vmatpush3.bf16.msra.mxu1 %v5756_v37  ;;  %v268_v33 = vld [vmem:[%s12149_s1 + $0x730] sm:$0xff]  ;;  %v5520_v37 = vpack.c.bf16 %v161_v26, %v154_v23  ;;  %v5526_v52 = vpack.c.bf16 %v190_v44, %v183_v42  ;;  %v197_v56 = vld [vmem:[%s12149_s1 + $0x4f8] sm:$0xff]  ;;  %v303_v62 = vld [vmem:[%s12149_s1 + $0x848] sm:$0xff] }
 0x113   :  { %5759 = vmatprep.subr.bf16.mxu1 %v5758_v40  ;;  %v168_v40 = vld [vmem:[%s12149_s1 + $0x410] sm:$0xff]  ;;  %v5776_v43 = vpack.c.bf16 %v275_v34, %v268_v33  ;;  %v422_v0 = vld [vmem:[%s12149_s1 + $0xc00] sm:$0xff]  ;;  %v429_v1 = vld [vmem:[%s12149_s1 + $0xc38] sm:$0xff]  ;;  %v5530_v3 = vpack.c.bf16 %v204_v58, %v197_v56 }
 0x114   :  { %v203_v5 = vld [vmem:[%s12149_s1 + $0x528] sm:$0xff]  ;;  %v218_v49 = vld [vmem:[%s12149_s1 + $0x5a0] sm:$0xff]  ;;  %v317_v10 = vld [vmem:[%s12149_s1 + $0x8b8] sm:$0xff] }
 0x115   :  { %5505 = vmatpush1.bf16.msra.mxu0 %v5504_v45  ;;  %v5778_v45 = vpack.c.bf16 %v401_v36, %v394_v35  ;;  %v211_v6 = vld [vmem:[%s12149_s1 + $0x568] sm:$0xff]  ;;  %v436_v12 = vld [vmem:[%s12149_s1 + $0xc70] sm:$0xff]  ;;  %v217_v18 = vld [vmem:[%s12149_s1 + $0x598] sm:$0xff] }
 0x116   :  { %5507 = vmatprep.subr.bf16.mxu0 %v5506_v46  ;;  %5761 = vmatpush3.bf16.msra.mxu1 %v5760_v51  ;;  %v282_v46 = vld [vmem:[%s12149_s1 + $0x7a0] sm:$0xff]  ;;  %v5524_v51 = vpack.c.bf16 %v175_v41, %v168_v40  ;;  %v443_v13 = vld [vmem:[%s12149_s1 + $0xca8] sm:$0xff]  ;;  %v5534_v16 = vpack.c.bf16 %v218_v49, %v211_v6  ;;  %v225_v19 = vld [vmem:[%s12149_s1 + $0x5d8] sm:$0xff] }
 0x117   :  { %5763 = vmatprep.subr.bf16.mxu1 %v5762_v53  ;;  %v182_v53 = vld [vmem:[%s12149_s1 + $0x480] sm:$0xff]  ;;  %v5780_v57 = vpack.c.bf16 %v289_v47, %v282_v46  ;;  %v232_v21 = vld [vmem:[%s12149_s1 + $0x610] sm:$0xff]  ;;  %v331_v23 = vld [vmem:[%s12149_s1 + $0x928] sm:$0xff] }
 0x118   :  { %v450_v26 = vld [vmem:[%s12149_s1 + $0xce0] sm:$0xff]  ;;  %v457_v27 = vld [vmem:[%s12149_s1 + $0xd18] sm:$0xff]  ;;  %v5538_v30 = vpack.c.bf16 %v232_v21, %v225_v19  ;;  %v231_v33 = vld [vmem:[%s12149_s1 + $0x608] sm:$0xff] }
 0x119   :  { %5509 = vmatpush1.bf16.msra.mxu0 %v5508_v59  ;;  %v5782_v59 = vpack.c.bf16 %v415_v50, %v408_v48  ;;  %v239_v34 = vld [vmem:[%s12149_s1 + $0x648] sm:$0xff]  ;;  %v246_v36 = vld [vmem:[%s12149_s1 + $0x680] sm:$0xff]  ;;  %v345_v40 = vld [vmem:[%s12149_s1 + $0x998] sm:$0xff] }
 0x11a   :  { %5511 = vmatprep.subr.bf16.mxu0 %v5510_v60  ;;  %5765 = vmatpush3.bf16.msra.mxu1 %v5764_v2  ;;  %v296_v60 = vld [vmem:[%s12149_s1 + $0x810] sm:$0xff]  ;;  %v5528_v2 = vpack.c.bf16 %v189_v54, %v182_v53  ;;  %v471_v42 = vld [vmem:[%s12149_s1 + $0xd88] sm:$0xff]  ;;  %v5542_v44 = vpack.c.bf16 %v246_v36, %v239_v34  ;;  %v245_v46 = vld [vmem:[%s12149_s1 + $0x678] sm:$0xff] }
 0x11b   :  { %5767 = vmatprep.subr.bf16.mxu1 %v5766_v4  ;;  %v196_v4 = vld [vmem:[%s12149_s1 + $0x4f0] sm:$0xff]  ;;  %v5784_v7 = vpack.c.bf16 %v303_v62, %v296_v60  ;;  %v253_v47 = vld [vmem:[%s12149_s1 + $0x6b8] sm:$0xff]  ;;  %v359_v53 = vld [vmem:[%s12149_s1 + $0xa08] sm:$0xff] }
 0x11c   :  { %v464_v41 = vld [vmem:[%s12149_s1 + $0xd50] sm:$0xff]  ;;  %v478_v54 = vld [vmem:[%s12149_s1 + $0xdc0] sm:$0xff]  ;;  %v485_v56 = vld [vmem:[%s12149_s1 + $0xdf8] sm:$0xff] }
 0x11d   :  { %5513 = vmatpush1.bf16.msra.mxu0 %v5512_v8  ;;  %v5786_v8 = vpack.c.bf16 %v429_v1, %v422_v0  ;;  %v260_v50 = vld [vmem:[%s12149_s1 + $0x6f0] sm:$0xff]  ;;  %v259_v60 = vld [vmem:[%s12149_s1 + $0x6e8] sm:$0xff]  ;;  %v274_v1 = vld [vmem:[%s12149_s1 + $0x760] sm:$0xff] }
 0x11e   :  { %5515 = vmatprep.subr.bf16.mxu0 %v5514_v9  ;;  %5769 = vmatpush3.bf16.msra.mxu1 %v5768_v15  ;;  %v310_v9 = vld [vmem:[%s12149_s1 + $0x880] sm:$0xff]  ;;  %v5532_v15 = vpack.c.bf16 %v203_v5, %v196_v4  ;;  %v5546_v58 = vpack.c.bf16 %v260_v50, %v253_v47  ;;  %v267_v62 = vld [vmem:[%s12149_s1 + $0x728] sm:$0xff]  ;;  %v373_v4 = vld [vmem:[%s12149_s1 + $0xa78] sm:$0xff] }
 0x11f   :  { %5771 = vmatprep.subr.bf16.mxu1 %v5770_v17  ;;  %v210_v17 = vld [vmem:[%s12149_s1 + $0x560] sm:$0xff]  ;;  %v5788_v20 = vpack.c.bf16 %v317_v10, %v310_v9  ;;  %v604_v5 = vld [vmem:[%s12149_s1 + $0x11b0] sm:$0xff]  ;;  %v611_v6 = vld [vmem:[%s12149_s1 + $0x11e8] sm:$0xff]  ;;  %v5550_v49 = vpack.c.bf16 %v274_v1, %v267_v62 }
 0x120   :  { %v273_v9 = vld [vmem:[%s12149_s1 + $0x758] sm:$0xff]  ;;  %v639_v34 = vld [vmem:[%s12149_s1 + $0x12c8] sm:$0xff]  ;;  %v308_v50 = vld [vmem:[%s12149_s1 + $0x870] sm:$0xff] }
 0x121   :  { %5517 = vmatpush1.bf16.msra.mxu0 %v5516_v22  ;;  %v5790_v22 = vpack.c.bf16 %v443_v13, %v436_v12  ;;  %v281_v10 = vld [vmem:[%s12149_s1 + $0x798] sm:$0xff]  ;;  %v288_v13 = vld [vmem:[%s12149_s1 + $0x7d0] sm:$0xff]  ;;  %vm4065_vm5 = vmor %vm4064_vm3, %vm4063_vm2 }
 0x122   :  { %5519 = vmatprep.subr.bf16.mxu0 %v5518_v32  ;;  %5773 = vmatpush3.bf16.msra.mxu1 %v5772_v28  ;;  %v324_v32 = vld [vmem:[%s12149_s1 + $0x8f0] sm:$0xff]  ;;  %v5536_v28 = vpack.c.bf16 %v217_v18, %v210_v17  ;;  %v499_v17 = vld [vmem:[%s12149_s1 + $0xe68] sm:$0xff]  ;;  %v618_v18 = vld [vmem:[%s12149_s1 + $0x1220] sm:$0xff]  ;;  %v5554_v21 = vpack.c.bf16 %v288_v13, %v281_v10 }
 0x123   :  { %5775 = vmatprep.subr.bf16.mxu1 %v5774_v31  ;;  %v224_v31 = vld [vmem:[%s12149_s1 + $0x5d0] sm:$0xff]  ;;  %v5792_v35 = vpack.c.bf16 %v331_v23, %v324_v32  ;;  %v625_v19 = vld [vmem:[%s12149_s1 + $0x1258] sm:$0xff]  ;;  %v287_v32 = vld [vmem:[%s12149_s1 + $0x7c8] sm:$0xff] }
 0x124   :  { %v295_v23 = vld [vmem:[%s12149_s1 + $0x808] sm:$0xff]  ;;  %v329_v1 = vld [vmem:[%s12149_s1 + $0x918] sm:$0xff]  ;;  %vm4067_vm7 = vmor %vm4066_vm6, %vm4065_vm5 }
 0x125   :  { %5521 = vmatpush1.bf16.msra.mxu0 %v5520_v37  ;;  %1932 = vmatmul.mubr.f32.vlgmr.msra.gmra.mrb[2].mxu1 %v7143_v25  ;;  %v5794_v37 = vpack.c.bf16 %v457_v27, %v450_v26  ;;  %v302_v27 = vld [vmem:[%s12149_s1 + $0x840] sm:$0xff]  ;;  %v343_v13 = vld [vmem:[%s12149_s1 + $0x988] sm:$0xff] }
 0x126   :  { %5523 = vmatprep.subr.bf16.mxu0 %v5522_v38  ;;  %5777 = vmatpush3.bf16.msra.mxu1 %v5776_v43  ;;  %v338_v38 = vld [vmem:[%s12149_s1 + $0x960] sm:$0xff]  ;;  %v5540_v43 = vpack.c.bf16 %v231_v33, %v224_v31  ;;  %v513_v31 = vld [vmem:[%s12149_s1 + $0xed8] sm:$0xff]  ;;  %v632_v33 = vld [vmem:[%s12149_s1 + $0x1290] sm:$0xff]  ;;  %v5558_v36 = vpack.c.bf16 %v302_v27, %v295_v23 }
 0x127   :  { %5779 = vmatprep.subr.bf16.mxu1 %v5778_v45  ;;  %2001 = vmatprep.mubr.f32.mxu1 %v7296_v39  ;;  %v238_v45 = vld [vmem:[%s12149_s1 + $0x640] sm:$0xff]  ;;  %v5796_v48 = vpack.c.bf16 %v345_v40, %v338_v38  ;;  %v309_v38 = vld [vmem:[%s12149_s1 + $0x878] sm:$0xff] }
 0x128   :  { %v357_v27 = vld [vmem:[%s12149_s1 + $0x9f8] sm:$0xff] }
 0x129   :  { %5525 = vmatpush1.bf16.msra.mxu0 %v5524_v51  ;;  %v5798_v51 = vpack.c.bf16 %v471_v42, %v464_v41  ;;  %v316_v41 = vld [vmem:[%s12149_s1 + $0x8b0] sm:$0xff]  ;;  %v5814_v42 = vpack.c.bf16 %v639_v34, %v632_v33 }
 0x12a   :  { %5527 = vmatprep.subr.bf16.mxu0 %v5526_v52  ;;  %5781 = vmatpush3.bf16.msra.mxu1 %v5780_v57  ;;  %v352_v52 = vld [vmem:[%s12149_s1 + $0x9d0] sm:$0xff]  ;;  %v5544_v57 = vpack.c.bf16 %v245_v46, %v238_v45  ;;  %v646_v45 = vld [vmem:[%s12149_s1 + $0x1300] sm:$0xff]  ;;  %v653_v46 = vld [vmem:[%s12149_s1 + $0x1338] sm:$0xff] }
 0x12b   :  { %5783 = vmatprep.subr.bf16.mxu1 %v5782_v59  ;;  %v252_v59 = vld [vmem:[%s12149_s1 + $0x6b0] sm:$0xff]  ;;  %v5800_v0 = vpack.c.bf16 %v359_v53, %v352_v52  ;;  %v323_v52 = vld [vmem:[%s12149_s1 + $0x8e8] sm:$0xff] }
 0x12c   :  { %v576_v34 = vld [vmem:[%s12149_s1 + $0x10d0] sm:$0xff] }
 0x12d   :  { %5529 = vmatpush1.bf16.msra.mxu0 %v5528_v2  ;;  %v5802_v2 = vpack.c.bf16 %v485_v56, %v478_v54  ;;  %v5818_v54 = vpack.c.bf16 %v653_v46, %v646_v45  ;;  %v534_v56 = vld [vmem:[%s12149_s1 + $0xf80] sm:$0xff] }
 0x12e   :  { %5531 = vmatprep.subr.bf16.mxu0 %v5530_v3  ;;  %5785 = vmatpush3.bf16.msra.mxu1 %v5784_v7  ;;  %v366_v3 = vld [vmem:[%s12149_s1 + $0xa40] sm:$0xff]  ;;  %v5548_v7 = vpack.c.bf16 %v259_v60, %v252_v59  ;;  %v667_v59 = vld [vmem:[%s12149_s1 + $0x13a8] sm:$0xff] }
 0x12f   :  { %5787 = vmatprep.subr.bf16.mxu1 %v5786_v8  ;;  %v266_v8 = vld [vmem:[%s12149_s1 + $0x720] sm:$0xff]  ;;  %v5804_v12 = vpack.c.bf16 %v373_v4, %v366_v3  ;;  %v344_v4 = vld [vmem:[%s12149_s1 + $0x990] sm:$0xff] }
 0x130   :  { %v590_v46 = vld [vmem:[%s12149_s1 + $0x1140] sm:$0xff] }
 0x131   :  { %5533 = vmatpush1.bf16.msra.mxu0 %v5532_v15  ;;  %v5806_v15 = vpack.c.bf16 %v611_v6, %v604_v5  ;;  %v548_v6 = vld [vmem:[%s12149_s1 + $0xff0] sm:$0xff] }
 0x132   :  { %5535 = vmatprep.subr.bf16.mxu0 %v5534_v16  ;;  %5789 = vmatpush3.bf16.msra.mxu1 %v5788_v20  ;;  %v492_v16 = vld [vmem:[%s12149_s1 + $0xe30] sm:$0xff]  ;;  %v5552_v20 = vpack.c.bf16 %v273_v9, %v266_v8  ;;  %v681_v8 = vld [vmem:[%s12149_s1 + $0x1418] sm:$0xff] }
 0x133   :  { %5791 = vmatprep.subr.bf16.mxu1 %v5790_v22  ;;  %v280_v22 = vld [vmem:[%s12149_s1 + $0x790] sm:$0xff]  ;;  %v5808_v26 = vpack.c.bf16 %v499_v17, %v492_v16  ;;  %v358_v17 = vld [vmem:[%s12149_s1 + $0xa00] sm:$0xff] }
 0x135   :  { %5537 = vmatpush1.bf16.msra.mxu0 %v5536_v28  ;;  %v5810_v28 = vpack.c.bf16 %v625_v19, %v618_v18  ;;  %v562_v19 = vld [vmem:[%s12149_s1 + $0x1060] sm:$0xff] }
 0x136   :  { %5539 = vmatprep.subr.bf16.mxu0 %v5538_v30  ;;  %5793 = vmatpush3.bf16.msra.mxu1 %v5792_v35  ;;  %v506_v30 = vld [vmem:[%s12149_s1 + $0xea0] sm:$0xff]  ;;  %v5556_v35 = vpack.c.bf16 %v287_v32, %v280_v22  ;;  %v695_v22 = vld [vmem:[%s12149_s1 + $0x1488] sm:$0xff] }
 0x137   :  { %5795 = vmatprep.subr.bf16.mxu1 %v5794_v37  ;;  %v294_v37 = vld [vmem:[%s12149_s1 + $0x800] sm:$0xff]  ;;  %v5812_v40 = vpack.c.bf16 %v513_v31, %v506_v30  ;;  %v372_v31 = vld [vmem:[%s12149_s1 + $0xa70] sm:$0xff] }
 0x139   :  { %5541 = vmatpush1.bf16.msra.mxu0 %v5540_v43  ;;  %v520_v43 = vld [vmem:[%s12149_s1 + $0xf10] sm:$0xff] }
 0x13a   :  { %5543 = vmatprep.subr.bf16.mxu0 %v5542_v44  ;;  %5797 = vmatpush3.bf16.msra.mxu1 %v5796_v48  ;;  %v527_v44 = vld [vmem:[%s12149_s1 + $0xf48] sm:$0xff]  ;;  %v5562_v48 = vpack.c.bf16 %v316_v41, %v309_v38 }
 0x13b   :  { %5799 = vmatprep.subr.bf16.mxu1 %v5798_v51  ;;  %v315_v51 = vld [vmem:[%s12149_s1 + $0x8a8] sm:$0xff]  ;;  %v5816_v53 = vpack.c.bf16 %v527_v44, %v520_v43  ;;  %v386_v44 = vld [vmem:[%s12149_s1 + $0xae0] sm:$0xff] }
 0x13c   :  { %v5564_v60 = vpack.c.bf16 %v315_v51, %v308_v50  ;;  %v371_v41 = vld [vmem:[%s12149_s1 + $0xa68] sm:$0xff] }
 0x13d   :  { %5545 = vmatpush1.bf16.msra.mxu0 %v5544_v57  ;;  %v541_v57 = vld [vmem:[%s12149_s1 + $0xfb8] sm:$0xff]  ;;  %v835_v50 = vld [vmem:[%s12149_s1 + $0x18e8] sm:$0xff] }
 0x13e   :  { %5547 = vmatprep.subr.bf16.mxu0 %v5546_v58  ;;  %5801 = vmatpush3.bf16.msra.mxu1 %v5800_v0  ;;  %v660_v58 = vld [vmem:[%s12149_s1 + $0x1370] sm:$0xff]  ;;  %v322_v0 = vld [vmem:[%s12149_s1 + $0x8e0] sm:$0xff]  ;;  %v5820_v3 = vpack.c.bf16 %v541_v57, %v534_v56 }
 0x13f   :  { %5803 = vmatprep.subr.bf16.mxu1 %v5802_v2  ;;  %v337_v2 = vld [vmem:[%s12149_s1 + $0x958] sm:$0xff]  ;;  %v5822_v5 = vpack.c.bf16 %v667_v59, %v660_v58  ;;  %v5568_v9 = vpack.c.bf16 %v329_v1, %v322_v0  ;;  %v400_v57 = vld [vmem:[%s12149_s1 + $0xb50] sm:$0xff] }
 0x140   :  { %v5570_v10 = vpack.c.bf16 %v344_v4, %v337_v2  ;;  %v716_v59 = vld [vmem:[%s12149_s1 + $0x1530] sm:$0xff]  ;;  %v849_v0 = vld [vmem:[%s12149_s1 + $0x1958] sm:$0xff]  ;;  %v399_v4 = vld [vmem:[%s12149_s1 + $0xb48] sm:$0xff] }
 0x141   :  { %5549 = vmatpush1.bf16.msra.mxu0 %v5548_v7  ;;  %v555_v7 = vld [vmem:[%s12149_s1 + $0x1028] sm:$0xff] }
 0x142   :  { %5551 = vmatprep.subr.bf16.mxu0 %v5550_v49  ;;  %5805 = vmatpush3.bf16.msra.mxu1 %v5804_v12  ;;  %v674_v49 = vld [vmem:[%s12149_s1 + $0x13e0] sm:$0xff]  ;;  %v336_v12 = vld [vmem:[%s12149_s1 + $0x950] sm:$0xff]  ;;  %v5824_v16 = vpack.c.bf16 %v555_v7, %v548_v6 }
 0x143   :  { %5807 = vmatprep.subr.bf16.mxu1 %v5806_v15  ;;  %v351_v15 = vld [vmem:[%s12149_s1 + $0x9c8] sm:$0xff]  ;;  %v5826_v18 = vpack.c.bf16 %v681_v8, %v674_v49  ;;  %v5572_v32 = vpack.c.bf16 %v343_v13, %v336_v12  ;;  %v414_v7 = vld [vmem:[%s12149_s1 + $0xbc0] sm:$0xff] }
 0x144   :  { %1648 = vmatmul.mubr.f32.vlgmr.msra.gmra.mrb[2].mxu0 %v7143_v25  ;;  %v301_v25 = vld [vmem:[%s12149_s1 + $0x838] sm:$0xff]  ;;  %v5574_v23 = vpack.c.bf16 %v358_v17, %v351_v15  ;;  %v730_v8 = vld [vmem:[%s12149_s1 + $0x15a0] sm:$0xff]  ;;  %v863_v12 = vld [vmem:[%s12149_s1 + $0x19c8] sm:$0xff] }
 0x145   :  { %5553 = vmatpush1.bf16.msra.mxu0 %v5552_v20  ;;  %2002 = vmatmul.mubr.f32.vlgmr.msra.gmra.mrb[4].mxu1 %v7268_v24  ;;  %v5560_v47 = vpack.c.bf16 %v301_v25, %v294_v37  ;;  %v569_v20 = vld [vmem:[%s12149_s1 + $0x1098] sm:$0xff] }
 0x146   :  { %5555 = vmatprep.subr.bf16.mxu0 %v5554_v21  ;;  %5809 = vmatpush3.bf16.msra.mxu1 %v5808_v26  ;;  %v688_v21 = vld [vmem:[%s12149_s1 + $0x1450] sm:$0xff]  ;;  %v350_v26 = vld [vmem:[%s12149_s1 + $0x9c0] sm:$0xff]  ;;  %v5828_v30 = vpack.c.bf16 %v569_v20, %v562_v19  ;;  %v709_v37 = vld [vmem:[%s12149_s1 + $0x14f8] sm:$0xff] }
 0x147   :  { %5811 = vmatprep.subr.bf16.mxu1 %v5810_v28  ;;  %2071 = vmatprep.mubr.f32.mxu1 %v7704_v63  ;;  %v365_v28 = vld [vmem:[%s12149_s1 + $0xa38] sm:$0xff]  ;;  %v5830_v33 = vpack.c.bf16 %v695_v22, %v688_v21  ;;  %v5576_v25 = vpack.c.bf16 %v357_v27, %v350_v26  ;;  %v428_v20 = vld [vmem:[%s12149_s1 + $0xc30] sm:$0xff] }
 0x148   :  { %1718 = vmatprep.mubr.f32.mxu0 %v7296_v39  ;;  %v330_v39 = vld [vmem:[%s12149_s1 + $0x920] sm:$0xff]  ;;  %v5578_v38 = vpack.c.bf16 %v372_v31, %v365_v28  ;;  %v413_v17 = vld [vmem:[%s12149_s1 + $0xbb8] sm:$0xff]  ;;  %v744_v22 = vld [vmem:[%s12149_s1 + $0x1610] sm:$0xff] }
 0x149   :  { %5557 = vmatpush1.bf16.msra.mxu0 %v5556_v35  ;;  %v5566_v62 = vpack.c.bf16 %v330_v39, %v323_v52  ;;  %v583_v35 = vld [vmem:[%s12149_s1 + $0x1108] sm:$0xff]  ;;  %v385_v39 = vld [vmem:[%s12149_s1 + $0xad8] sm:$0xff] }
 0x14a   :  { %5559 = vmatprep.subr.bf16.mxu0 %v5558_v36  ;;  %5813 = vmatpush3.bf16.msra.mxu1 %v5812_v40  ;;  %v702_v36 = vld [vmem:[%s12149_s1 + $0x14c0] sm:$0xff]  ;;  %v364_v40 = vld [vmem:[%s12149_s1 + $0xa30] sm:$0xff]  ;;  %v5832_v43 = vpack.c.bf16 %v583_v35, %v576_v34  ;;  %v877_v26 = vld [vmem:[%s12149_s1 + $0x1a38] sm:$0xff] }
 0x14b   :  { %5815 = vmatprep.subr.bf16.mxu1 %v5814_v42  ;;  %v379_v42 = vld [vmem:[%s12149_s1 + $0xaa8] sm:$0xff]  ;;  %v5834_v45 = vpack.c.bf16 %v709_v37, %v702_v36  ;;  %v5580_v51 = vpack.c.bf16 %v371_v41, %v364_v40  ;;  %v442_v35 = vld [vmem:[%s12149_s1 + $0xca0] sm:$0xff] }
 0x14c   :  { %v5582_v52 = vpack.c.bf16 %v386_v44, %v379_v42  ;;  %v427_v31 = vld [vmem:[%s12149_s1 + $0xc28] sm:$0xff]  ;;  %v758_v37 = vld [vmem:[%s12149_s1 + $0x1680] sm:$0xff]  ;;  %v441_v44 = vld [vmem:[%s12149_s1 + $0xc98] sm:$0xff] }
 0x14d   :  { %5561 = vmatpush1.bf16.msra.mxu0 %v5560_v47  ;;  %v597_v47 = vld [vmem:[%s12149_s1 + $0x1178] sm:$0xff]  ;;  %v891_v40 = vld [vmem:[%s12149_s1 + $0x1aa8] sm:$0xff] }
 0x14e   :  { %5563 = vmatprep.subr.bf16.mxu0 %v5562_v48  ;;  %5817 = vmatpush3.bf16.msra.mxu1 %v5816_v53  ;;  %v828_v48 = vld [vmem:[%s12149_s1 + $0x18b0] sm:$0xff]  ;;  %v378_v53 = vld [vmem:[%s12149_s1 + $0xaa0] sm:$0xff]  ;;  %v5836_v56 = vpack.c.bf16 %v597_v47, %v590_v46 }
 0x14f   :  { %5819 = vmatprep.subr.bf16.mxu1 %v5818_v54  ;;  %v393_v54 = vld [vmem:[%s12149_s1 + $0xb18] sm:$0xff]  ;;  %v5838_v58 = vpack.c.bf16 %v835_v50, %v828_v48  ;;  %v5584_v1 = vpack.c.bf16 %v385_v39, %v378_v53  ;;  %v456_v47 = vld [vmem:[%s12149_s1 + $0xd10] sm:$0xff] }
 0x150   :  { %v5586_v2 = vpack.c.bf16 %v400_v57, %v393_v54  ;;  %v772_v50 = vld [vmem:[%s12149_s1 + $0x16f0] sm:$0xff]  ;;  %v905_v53 = vld [vmem:[%s12149_s1 + $0x1b18] sm:$0xff]  ;;  %v455_v57 = vld [vmem:[%s12149_s1 + $0xd08] sm:$0xff] }
 0x151   :  { %5565 = vmatpush1.bf16.msra.mxu0 %v5564_v60  ;;  %v723_v60 = vld [vmem:[%s12149_s1 + $0x1568] sm:$0xff] }
 0x152   :  { %5567 = vmatprep.subr.bf16.mxu0 %v5566_v62  ;;  %5821 = vmatpush3.bf16.msra.mxu1 %v5820_v3  ;;  %v842_v62 = vld [vmem:[%s12149_s1 + $0x1920] sm:$0xff]  ;;  %v392_v3 = vld [vmem:[%s12149_s1 + $0xb10] sm:$0xff]  ;;  %v5840_v6 = vpack.c.bf16 %v723_v60, %v716_v59 }
 0x153   :  { %5823 = vmatprep.subr.bf16.mxu1 %v5822_v5  ;;  %v407_v5 = vld [vmem:[%s12149_s1 + $0xb88] sm:$0xff]  ;;  %v5842_v49 = vpack.c.bf16 %v849_v0, %v842_v62  ;;  %v5588_v13 = vpack.c.bf16 %v399_v4, %v392_v3  ;;  %v470_v60 = vld [vmem:[%s12149_s1 + $0xd80] sm:$0xff] }
 0x154   :  { %v5590_v15 = vpack.c.bf16 %v414_v7, %v407_v5  ;;  %v786_v0 = vld [vmem:[%s12149_s1 + $0x1760] sm:$0xff]  ;;  %v919_v3 = vld [vmem:[%s12149_s1 + $0x1b88] sm:$0xff]  ;;  %v469_v7 = vld [vmem:[%s12149_s1 + $0xd78] sm:$0xff] }
 0x155   :  { %5569 = vmatpush1.bf16.msra.mxu0 %v5568_v9  ;;  %v737_v9 = vld [vmem:[%s12149_s1 + $0x15d8] sm:$0xff] }
 0x156   :  { %5571 = vmatprep.subr.bf16.mxu0 %v5570_v10  ;;  %5825 = vmatpush3.bf16.msra.mxu1 %v5824_v16  ;;  %v856_v10 = vld [vmem:[%s12149_s1 + $0x1990] sm:$0xff]  ;;  %v406_v16 = vld [vmem:[%s12149_s1 + $0xb80] sm:$0xff]  ;;  %v5844_v19 = vpack.c.bf16 %v737_v9, %v730_v8 }
 0x157   :  { %5827 = vmatprep.subr.bf16.mxu1 %v5826_v18  ;;  %v421_v18 = vld [vmem:[%s12149_s1 + $0xbf8] sm:$0xff]  ;;  %v5846_v21 = vpack.c.bf16 %v863_v12, %v856_v10  ;;  %v5592_v27 = vpack.c.bf16 %v413_v17, %v406_v16  ;;  %v484_v9 = vld [vmem:[%s12149_s1 + $0xdf0] sm:$0xff] }
 0x158   :  { %v5594_v28 = vpack.c.bf16 %v428_v20, %v421_v18  ;;  %v800_v12 = vld [vmem:[%s12149_s1 + $0x17d0] sm:$0xff]  ;;  %v933_v16 = vld [vmem:[%s12149_s1 + $0x1bf8] sm:$0xff]  ;;  %v483_v20 = vld [vmem:[%s12149_s1 + $0xde8] sm:$0xff] }
 0x159   :  { %5573 = vmatpush1.bf16.msra.mxu0 %v5572_v32  ;;  %v751_v32 = vld [vmem:[%s12149_s1 + $0x1648] sm:$0xff] }
 0x15a   :  { %5575 = vmatprep.subr.bf16.mxu0 %v5574_v23  ;;  %5829 = vmatpush3.bf16.msra.mxu1 %v5828_v30  ;;  %v870_v23 = vld [vmem:[%s12149_s1 + $0x1a00] sm:$0xff]  ;;  %v420_v30 = vld [vmem:[%s12149_s1 + $0xbf0] sm:$0xff]  ;;  %v5848_v34 = vpack.c.bf16 %v751_v32, %v744_v22 }
 0x15b   :  { %5831 = vmatprep.subr.bf16.mxu1 %v5830_v33  ;;  %v435_v33 = vld [vmem:[%s12149_s1 + $0xc68] sm:$0xff]  ;;  %v5850_v36 = vpack.c.bf16 %v877_v26, %v870_v23  ;;  %v5596_v41 = vpack.c.bf16 %v427_v31, %v420_v30  ;;  %v498_v32 = vld [vmem:[%s12149_s1 + $0xe60] sm:$0xff] }
 0x15c   :  { %v5598_v42 = vpack.c.bf16 %v442_v35, %v435_v33  ;;  %v814_v26 = vld [vmem:[%s12149_s1 + $0x1840] sm:$0xff]  ;;  %v497_v35 = vld [vmem:[%s12149_s1 + $0xe58] sm:$0xff] }
 0x15d   :  { %5577 = vmatpush1.bf16.msra.mxu0 %v5576_v25  ;;  %v765_v25 = vld [vmem:[%s12149_s1 + $0x16b8] sm:$0xff]  ;;  %v2162_v30 = vld [vmem:[%s12151_s3 + $0x40] sm:$0xff] }
 0x15e   :  { %5579 = vmatprep.subr.bf16.mxu0 %v5578_v38  ;;  %5833 = vmatpush3.bf16.msra.mxu1 %v5832_v43  ;;  %v884_v38 = vld [vmem:[%s12149_s1 + $0x1a70] sm:$0xff]  ;;  %v434_v43 = vld [vmem:[%s12149_s1 + $0xc60] sm:$0xff]  ;;  %v5852_v46 = vpack.c.bf16 %v765_v25, %v758_v37 }
 0x15f   :  { %5835 = vmatprep.subr.bf16.mxu1 %v5834_v45  ;;  %v449_v45 = vld [vmem:[%s12149_s1 + $0xcd8] sm:$0xff]  ;;  %v5854_v48 = vpack.c.bf16 %v891_v40, %v884_v38  ;;  %v5600_v39 = vpack.c.bf16 %v441_v44, %v434_v43  ;;  %v512_v25 = vld [vmem:[%s12149_s1 + $0xed0] sm:$0xff]  ;;  %v2154_v40 = vld [vmem:[%s12151_s3] sm:$0xff] }
 0x160   :  { %v5602_v54 = vpack.c.bf16 %v456_v47, %v449_v45  ;;  %v2176_v43 = vld [vmem:[%s12151_s3 + $0xb0] sm:$0xff]  ;;  %v511_v47 = vld [vmem:[%s12149_s1 + $0xec8] sm:$0xff] }
 0x161   :  { %5581 = vmatpush1.bf16.msra.mxu0 %v5580_v51  ;;  %v779_v51 = vld [vmem:[%s12149_s1 + $0x1728] sm:$0xff] }
 0x162   :  { %5583 = vmatprep.subr.bf16.mxu0 %v5582_v52  ;;  %5837 = vmatpush3.bf16.msra.mxu1 %v5836_v56  ;;  %v898_v52 = vld [vmem:[%s12149_s1 + $0x1ae0] sm:$0xff]  ;;  %v448_v56 = vld [vmem:[%s12149_s1 + $0xcd0] sm:$0xff]  ;;  %v5856_v59 = vpack.c.bf16 %v779_v51, %v772_v50 }
 0x163   :  { %5839 = vmatprep.subr.bf16.mxu1 %v5838_v58  ;;  %v463_v58 = vld [vmem:[%s12149_s1 + $0xd48] sm:$0xff]  ;;  %v5858_v62 = vpack.c.bf16 %v905_v53, %v898_v52  ;;  %v5604_v4 = vpack.c.bf16 %v455_v57, %v448_v56  ;;  %v526_v51 = vld [vmem:[%s12149_s1 + $0xf40] sm:$0xff]  ;;  %v2168_v53 = vld [vmem:[%s12151_s3 + $0x70] sm:$0xff] }
 0x164   :  { %v5606_v5 = vpack.c.bf16 %v470_v60, %v463_v58  ;;  %v2190_v56 = vld [vmem:[%s12151_s3 + $0x120] sm:$0xff]  ;;  %v533_v60 = vld [vmem:[%s12149_s1 + $0xf78] sm:$0xff] }
 0x165   :  { %5585 = vmatpush1.bf16.msra.mxu0 %v5584_v1  ;;  %2072 = vmatmul.mubr.f32.vlgmr.msra.gmra.mrb[6].mxu1 %v7684_v55  ;;  %v793_v1 = vld [vmem:[%s12149_s1 + $0x1798] sm:$0xff] }
 0x166   :  { %5587 = vmatprep.subr.bf16.mxu0 %v5586_v2  ;;  %5841 = vmatpush3.bf16.msra.mxu1 %v5840_v6  ;;  %v912_v2 = vld [vmem:[%s12149_s1 + $0x1b50] sm:$0xff]  ;;  %v462_v6 = vld [vmem:[%s12149_s1 + $0xd40] sm:$0xff]  ;;  %v5860_v8 = vpack.c.bf16 %v793_v1, %v786_v0 }
 0x167   :  { %5843 = vmatprep.subr.bf16.mxu1 %v5842_v49  ;;  %2141 = vmatprep.mubr.f32.mxu1 %v8094_v29  ;;  %v477_v49 = vld [vmem:[%s12149_s1 + $0xdb8] sm:$0xff]  ;;  %v5862_v10 = vpack.c.bf16 %v919_v3, %v912_v2  ;;  %v5608_v17 = vpack.c.bf16 %v469_v7, %v462_v6  ;;  %v540_v0 = vld [vmem:[%s12149_s1 + $0xfb0] sm:$0xff]  ;;  %v2182_v2 = vld [vmem:[%s12151_s3 + $0xe0] sm:$0xff] }
 0x168   :  { %v5610_v18 = vpack.c.bf16 %v484_v9, %v477_v49  ;;  %v2189_v3 = vld [vmem:[%s12151_s3 + $0x118] sm:$0xff]  ;;  %v5626_v7 = vpack.c.bf16 %v540_v0, %v533_v60  ;;  %v532_v49 = vld [vmem:[%s12149_s1 + $0xf70] sm:$0xff]  ;;  %v595_v60 = vld [vmem:[%s12149_s1 + $0x1168] sm:$0xff] }
 0x169   :  { %5589 = vmatpush1.bf16.msra.mxu0 %v5588_v13  ;;  %v807_v13 = vld [vmem:[%s12149_s1 + $0x1808] sm:$0xff]  ;;  %v5880_v9 = vpack.c.bf16 %v2189_v3, %v2182_v2  ;;  %v2252_v3 = vld [vmem:[%s12151_s3 + $0x310] sm:$0xff] }
 0x16a   :  { %5591 = vmatprep.subr.bf16.mxu0 %v5590_v15  ;;  %5845 = vmatpush3.bf16.msra.mxu1 %v5844_v19  ;;  %v926_v15 = vld [vmem:[%s12149_s1 + $0x1bc0] sm:$0xff]  ;;  %v476_v19 = vld [vmem:[%s12149_s1 + $0xdb0] sm:$0xff]  ;;  %v5864_v22 = vpack.c.bf16 %v807_v13, %v800_v12 }
 0x16b   :  { %5847 = vmatprep.subr.bf16.mxu1 %v5846_v21  ;;  %v491_v21 = vld [vmem:[%s12149_s1 + $0xe28] sm:$0xff]  ;;  %v5866_v23 = vpack.c.bf16 %v933_v16, %v926_v15  ;;  %v5612_v31 = vpack.c.bf16 %v483_v20, %v476_v19  ;;  %v2196_v13 = vld [vmem:[%s12151_s3 + $0x150] sm:$0xff]  ;;  %v546_v20 = vld [vmem:[%s12149_s1 + $0xfe0] sm:$0xff] }
 0x16c   :  { %v5614_v33 = vpack.c.bf16 %v498_v32, %v491_v21  ;;  %v2203_v15 = vld [vmem:[%s12151_s3 + $0x188] sm:$0xff]  ;;  %v553_v21 = vld [vmem:[%s12149_s1 + $0x1018] sm:$0xff] }
 0x16d   :  { %5593 = vmatpush1.bf16.msra.mxu0 %v5592_v27  ;;  %v821_v27 = vld [vmem:[%s12149_s1 + $0x1878] sm:$0xff]  ;;  %v2211_v16 = vld [vmem:[%s12151_s3 + $0x1c8] sm:$0xff]  ;;  %v5884_v32 = vpack.c.bf16 %v2203_v15, %v2196_v13  ;;  %v2266_v15 = vld [vmem:[%s12151_s3 + $0x380] sm:$0xff] }
 0x16e   :  { %5595 = vmatprep.subr.bf16.mxu0 %v5594_v28  ;;  %5849 = vmatpush3.bf16.msra.mxu1 %v5848_v34  ;;  %v2155_v28 = vld [vmem:[%s12151_s3 + $0x8] sm:$0xff]  ;;  %v490_v34 = vld [vmem:[%s12149_s1 + $0xe20] sm:$0xff]  ;;  %v5868_v37 = vpack.c.bf16 %v821_v27, %v814_v26 }
 0x16f   :  { %5851 = vmatprep.subr.bf16.mxu1 %v5850_v36  ;;  %v505_v36 = vld [vmem:[%s12149_s1 + $0xe98] sm:$0xff]  ;;  %v5870_v38 = vpack.c.bf16 %v2162_v30, %v2155_v28  ;;  %v5616_v44 = vpack.c.bf16 %v497_v35, %v490_v34  ;;  %v2210_v27 = vld [vmem:[%s12151_s3 + $0x1c0] sm:$0xff]  ;;  %v560_v35 = vld [vmem:[%s12149_s1 + $0x1050] sm:$0xff] }
 0x170   :  { %v5618_v45 = vpack.c.bf16 %v512_v25, %v505_v36  ;;  %v2217_v28 = vld [vmem:[%s12151_s3 + $0x1f8] sm:$0xff]  ;;  %v567_v36 = vld [vmem:[%s12149_s1 + $0x1088] sm:$0xff] }
 0x171   :  { %5597 = vmatpush1.bf16.msra.mxu0 %v5596_v41  ;;  %v2161_v41 = vld [vmem:[%s12151_s3 + $0x38] sm:$0xff]  ;;  %v5888_v25 = vpack.c.bf16 %v2217_v28, %v2210_v27  ;;  %v2280_v28 = vld [vmem:[%s12151_s3 + $0x3f0] sm:$0xff] }
 0x172   :  { %5599 = vmatprep.subr.bf16.mxu0 %v5598_v42  ;;  %5853 = vmatpush3.bf16.msra.mxu1 %v5852_v46  ;;  %v2169_v42 = vld [vmem:[%s12151_s3 + $0x78] sm:$0xff]  ;;  %v504_v46 = vld [vmem:[%s12149_s1 + $0xe90] sm:$0xff]  ;;  %v5872_v50 = vpack.c.bf16 %v2161_v41, %v2154_v40 }
 0x173   :  { %5855 = vmatprep.subr.bf16.mxu1 %v5854_v48  ;;  %v519_v48 = vld [vmem:[%s12149_s1 + $0xf08] sm:$0xff]  ;;  %v5874_v52 = vpack.c.bf16 %v2176_v43, %v2169_v42  ;;  %v5620_v57 = vpack.c.bf16 %v511_v47, %v504_v46  ;;  %v2225_v30 = vld [vmem:[%s12151_s3 + $0x238] sm:$0xff]  ;;  %v2224_v41 = vld [vmem:[%s12151_s3 + $0x230] sm:$0xff] }
 0x174   :  { %v5622_v58 = vpack.c.bf16 %v526_v51, %v519_v48  ;;  %v2231_v42 = vld [vmem:[%s12151_s3 + $0x268] sm:$0xff]  ;;  %v574_v47 = vld [vmem:[%s12149_s1 + $0x10c0] sm:$0xff]  ;;  %v581_v48 = vld [vmem:[%s12149_s1 + $0x10f8] sm:$0xff] }
 0x175   :  { %5601 = vmatpush1.bf16.msra.mxu0 %v5600_v39  ;;  %v2175_v39 = vld [vmem:[%s12151_s3 + $0xa8] sm:$0xff]  ;;  %v5892_v51 = vpack.c.bf16 %v2231_v42, %v2224_v41  ;;  %v2294_v42 = vld [vmem:[%s12151_s3 + $0x460] sm:$0xff] }
 0x176   :  { %5603 = vmatprep.subr.bf16.mxu0 %v5602_v54  ;;  %5857 = vmatpush3.bf16.msra.mxu1 %v5856_v59  ;;  %v2183_v54 = vld [vmem:[%s12151_s3 + $0xe8] sm:$0xff]  ;;  %v518_v59 = vld [vmem:[%s12149_s1 + $0xf00] sm:$0xff] }
 0x177   :  { %5859 = vmatprep.subr.bf16.mxu1 %v5858_v62  ;;  %v5876_v62 = vpack.c.bf16 %v2175_v39, %v2168_v53  ;;  %v5878_v1 = vpack.c.bf16 %v2190_v56, %v2183_v54  ;;  %v2239_v43 = vld [vmem:[%s12151_s3 + $0x2a8] sm:$0xff]  ;;  %v2238_v39 = vld [vmem:[%s12151_s3 + $0x2a0] sm:$0xff]  ;;  %v2245_v54 = vld [vmem:[%s12151_s3 + $0x2d8] sm:$0xff] }
 0x178   :  { %v2253_v56 = vld [vmem:[%s12151_s3 + $0x318] sm:$0xff]  ;;  %v5896_v0 = vpack.c.bf16 %v2245_v54, %v2238_v39  ;;  %v2308_v54 = vld [vmem:[%s12151_s3 + $0x4d0] sm:$0xff] }
 0x179   :  { %5605 = vmatpush1.bf16.msra.mxu0 %v5604_v4  ;;  %v2197_v4 = vld [vmem:[%s12151_s3 + $0x158] sm:$0xff] }
 0x17a   :  { %5607 = vmatprep.subr.bf16.mxu0 %v5606_v5  ;;  %5861 = vmatpush3.bf16.msra.mxu1 %v5860_v8  ;;  %v2204_v5 = vld [vmem:[%s12151_s3 + $0x190] sm:$0xff]  ;;  %v547_v8 = vld [vmem:[%s12149_s1 + $0xfe8] sm:$0xff] }
 0x17b   :  { %5863 = vmatprep.subr.bf16.mxu1 %v5862_v10  ;;  %v554_v10 = vld [vmem:[%s12149_s1 + $0x1020] sm:$0xff]  ;;  %v5882_v12 = vpack.c.bf16 %v2204_v5, %v2197_v4  ;;  %v2259_v4 = vld [vmem:[%s12151_s3 + $0x348] sm:$0xff] }
 0x17c   :  { %v5630_v19 = vpack.c.bf16 %v554_v10, %v547_v8  ;;  %v2267_v5 = vld [vmem:[%s12151_s3 + $0x388] sm:$0xff]  ;;  %v609_v8 = vld [vmem:[%s12149_s1 + $0x11d8] sm:$0xff]  ;;  %v5900_v10 = vpack.c.bf16 %v2259_v4, %v2252_v3  ;;  %v2322_v4 = vld [vmem:[%s12151_s3 + $0x540] sm:$0xff] }
 0x17d   :  { %5609 = vmatpush1.bf16.msra.mxu0 %v5608_v17  ;;  %v2218_v17 = vld [vmem:[%s12151_s3 + $0x200] sm:$0xff] }
 0x17e   :  { %5611 = vmatprep.subr.bf16.mxu0 %v5610_v18  ;;  %5865 = vmatpush3.bf16.msra.mxu1 %v5864_v22  ;;  %v561_v22 = vld [vmem:[%s12149_s1 + $0x1058] sm:$0xff]  ;;  %v5886_v26 = vpack.c.bf16 %v2218_v17, %v2211_v16 }
 0x17f   :  { %5867 = vmatprep.subr.bf16.mxu1 %v5866_v23  ;;  %v568_v23 = vld [vmem:[%s12149_s1 + $0x1090] sm:$0xff]  ;;  %v2273_v16 = vld [vmem:[%s12151_s3 + $0x3b8] sm:$0xff] }
 0x180   :  { %v5634_v34 = vpack.c.bf16 %v568_v23, %v561_v22  ;;  %v2281_v17 = vld [vmem:[%s12151_s3 + $0x3f8] sm:$0xff]  ;;  %v623_v22 = vld [vmem:[%s12149_s1 + $0x1248] sm:$0xff]  ;;  %v5904_v23 = vpack.c.bf16 %v2273_v16, %v2266_v15  ;;  %v2336_v16 = vld [vmem:[%s12151_s3 + $0x5b0] sm:$0xff] }
 0x181   :  { %5613 = vmatpush1.bf16.msra.mxu0 %v5612_v31  ;;  %v2232_v31 = vld [vmem:[%s12151_s3 + $0x270] sm:$0xff] }
 0x182   :  { %5615 = vmatprep.subr.bf16.mxu0 %v5614_v33  ;;  %5869 = vmatpush3.bf16.msra.mxu1 %v5868_v37  ;;  %v5632_v33 = vpack.c.bf16 %v553_v21, %v546_v20  ;;  %v575_v37 = vld [vmem:[%s12149_s1 + $0x10c8] sm:$0xff]  ;;  %v5890_v40 = vpack.c.bf16 %v2232_v31, %v2225_v30  ;;  %v616_v21 = vld [vmem:[%s12149_s1 + $0x1210] sm:$0xff] }
 0x183   :  { %5871 = vmatprep.subr.bf16.mxu1 %v5870_v38  ;;  %v582_v38 = vld [vmem:[%s12149_s1 + $0x1100] sm:$0xff]  ;;  %v2287_v30 = vld [vmem:[%s12151_s3 + $0x428] sm:$0xff] }
 0x184   :  { %1719 = vmatmul.mubr.f32.vlgmr.msra.gmra.mrb[2].mxu0 %v7268_v24  ;;  %v525_v24 = vld [vmem:[%s12149_s1 + $0xf38] sm:$0xff]  ;;  %v5638_v46 = vpack.c.bf16 %v582_v38, %v575_v37  ;;  %v2295_v31 = vld [vmem:[%s12151_s3 + $0x468] sm:$0xff]  ;;  %v5908_v38 = vpack.c.bf16 %v2287_v30, %v2280_v28  ;;  %v2350_v30 = vld [vmem:[%s12151_s3 + $0x620] sm:$0xff] }
 0x185   :  { %5617 = vmatpush1.bf16.msra.mxu0 %v5616_v44  ;;  %2142 = vmatmul.mubr.f32.vlgmr.msra.gmra.mrb[8].mxu1 %v8066_v14  ;;  %v5624_v6 = vpack.c.bf16 %v525_v24, %v518_v59  ;;  %v2246_v44 = vld [vmem:[%s12151_s3 + $0x2e0] sm:$0xff]  ;;  %v588_v24 = vld [vmem:[%s12149_s1 + $0x1130] sm:$0xff]  ;;  %v637_v37 = vld [vmem:[%s12149_s1 + $0x12b8] sm:$0xff] }
 0x186   :  { %5619 = vmatprep.subr.bf16.mxu0 %v5618_v45  ;;  %5873 = vmatpush1.bf16.msra.mxu1 %v5872_v50  ;;  %v5636_v45 = vpack.c.bf16 %v567_v36, %v560_v35  ;;  %v589_v50 = vld [vmem:[%s12149_s1 + $0x1138] sm:$0xff]  ;;  %v5894_v53 = vpack.c.bf16 %v2246_v44, %v2239_v43  ;;  %v630_v36 = vld [vmem:[%s12149_s1 + $0x1280] sm:$0xff] }
 0x187   :  { %5875 = vmatprep.subr.bf16.mxu1 %v5874_v52  ;;  %1789 = vmatprep.mubr.f32.mxu0 %v7704_v63  ;;  %v539_v63 = vld [vmem:[%s12149_s1 + $0xfa8] sm:$0xff]  ;;  %v596_v52 = vld [vmem:[%s12149_s1 + $0x1170] sm:$0xff]  ;;  %v2301_v43 = vld [vmem:[%s12151_s3 + $0x498] sm:$0xff] }
 0x188   :  { %v5628_v18 = vpack.c.bf16 %v539_v63, %v532_v49  ;;  %v5642_v59 = vpack.c.bf16 %v596_v52, %v589_v50  ;;  %v602_v63 = vld [vmem:[%s12149_s1 + $0x11a0] sm:$0xff]  ;;  %v2309_v44 = vld [vmem:[%s12151_s3 + $0x4d8] sm:$0xff]  ;;  %v651_v50 = vld [vmem:[%s12149_s1 + $0x1328] sm:$0xff]  ;;  %v5912_v52 = vpack.c.bf16 %v2301_v43, %v2294_v42 }
 0x189   :  { %5621 = vmatpush1.bf16.msra.mxu0 %v5620_v57  ;;  %v2260_v57 = vld [vmem:[%s12151_s3 + $0x350] sm:$0xff] }
 0x18a   :  { %5623 = vmatprep.subr.bf16.mxu0 %v5622_v58  ;;  %5877 = vmatpush1.bf16.msra.mxu1 %v5876_v62  ;;  %v5640_v58 = vpack.c.bf16 %v581_v48, %v574_v47  ;;  %v603_v62 = vld [vmem:[%s12149_s1 + $0x11a8] sm:$0xff]  ;;  %v5898_v2 = vpack.c.bf16 %v2260_v57, %v2253_v56  ;;  %v644_v48 = vld [vmem:[%s12149_s1 + $0x12f0] sm:$0xff] }
 0x18b   :  { %5879 = vmatprep.subr.bf16.mxu1 %v5878_v1  ;;  %v610_v1 = vld [vmem:[%s12149_s1 + $0x11e0] sm:$0xff]  ;;  %v2315_v56 = vld [vmem:[%s12151_s3 + $0x508] sm:$0xff]  ;;  %v2364_v43 = vld [vmem:[%s12151_s3 + $0x690] sm:$0xff] }
 0x18c   :  { %v5646_v49 = vpack.c.bf16 %v610_v1, %v603_v62  ;;  %v2323_v57 = vld [vmem:[%s12151_s3 + $0x548] sm:$0xff]  ;;  %v665_v62 = vld [vmem:[%s12149_s1 + $0x1398] sm:$0xff]  ;;  %v5916_v1 = vpack.c.bf16 %v2315_v56, %v2308_v54 }
 0x18d   :  { %5625 = vmatpush1.bf16.msra.mxu0 %v5624_v6  ;;  %v2274_v6 = vld [vmem:[%s12151_s3 + $0x3c0] sm:$0xff] }
 0x18e   :  { %5627 = vmatprep.subr.bf16.mxu0 %v5626_v7  ;;  %5881 = vmatpush1.bf16.msra.mxu1 %v5880_v9  ;;  %v5644_v7 = vpack.c.bf16 %v595_v60, %v588_v24  ;;  %v617_v9 = vld [vmem:[%s12149_s1 + $0x1218] sm:$0xff]  ;;  %v5902_v13 = vpack.c.bf16 %v2274_v6, %v2267_v5  ;;  %v658_v60 = vld [vmem:[%s12149_s1 + $0x1360] sm:$0xff] }
 0x18f   :  { %5883 = vmatprep.subr.bf16.mxu1 %v5882_v12  ;;  %v624_v12 = vld [vmem:[%s12149_s1 + $0x1250] sm:$0xff]  ;;  %v2329_v5 = vld [vmem:[%s12151_s3 + $0x578] sm:$0xff] }
 0x190   :  { %v5650_v20 = vpack.c.bf16 %v624_v12, %v617_v9  ;;  %v2337_v6 = vld [vmem:[%s12151_s3 + $0x5b8] sm:$0xff]  ;;  %v679_v9 = vld [vmem:[%s12149_s1 + $0x1408] sm:$0xff]  ;;  %v5920_v12 = vpack.c.bf16 %v2329_v5, %v2322_v4  ;;  %v756_v5 = vld [vmem:[%s12149_s1 + $0x1670] sm:$0xff] }
 0x191   :  { %5629 = vmatpush1.bf16.msra.mxu0 %v5628_v18  ;;  %v2288_v18 = vld [vmem:[%s12151_s3 + $0x430] sm:$0xff] }
 0x192   :  { %5631 = vmatprep.subr.bf16.mxu0 %v5630_v19  ;;  %5885 = vmatpush1.bf16.msra.mxu1 %v5884_v32  ;;  %v5648_v19 = vpack.c.bf16 %v609_v8, %v602_v63  ;;  %v631_v32 = vld [vmem:[%s12149_s1 + $0x1288] sm:$0xff]  ;;  %v5906_v27 = vpack.c.bf16 %v2288_v18, %v2281_v17  ;;  %v672_v8 = vld [vmem:[%s12149_s1 + $0x13d0] sm:$0xff] }
 0x193   :  { %5887 = vmatprep.subr.bf16.mxu1 %v5886_v26  ;;  %v638_v26 = vld [vmem:[%s12149_s1 + $0x12c0] sm:$0xff]  ;;  %v2343_v17 = vld [vmem:[%s12151_s3 + $0x5e8] sm:$0xff] }
 0x194   :  { %v5654_v35 = vpack.c.bf16 %v638_v26, %v631_v32  ;;  %v2351_v18 = vld [vmem:[%s12151_s3 + $0x628] sm:$0xff]  ;;  %v693_v32 = vld [vmem:[%s12149_s1 + $0x1478] sm:$0xff]  ;;  %v5924_v26 = vpack.c.bf16 %v2343_v17, %v2336_v16  ;;  %v9675_v17 = vld [vmem:[%s12150_s2] sm:$0x7f] }
 0x195   :  { %5633 = vmatpush1.bf16.msra.mxu0 %v5632_v33  ;;  %v2302_v33 = vld [vmem:[%s12151_s3 + $0x4a0] sm:$0xff] }
 0x196   :  { %5635 = vmatprep.subr.bf16.mxu0 %v5634_v34  ;;  %5889 = vmatpush1.bf16.msra.mxu1 %v5888_v25  ;;  %v5652_v34 = vpack.c.bf16 %v623_v22, %v616_v21  ;;  %v645_v25 = vld [vmem:[%s12149_s1 + $0x12f8] sm:$0xff]  ;;  %v5910_v41 = vpack.c.bf16 %v2302_v33, %v2295_v31  ;;  %v686_v22 = vld [vmem:[%s12149_s1 + $0x1440] sm:$0xff] }
 0x197   :  { %5891 = vmatprep.subr.bf16.mxu1 %v5890_v40  ;;  %v652_v40 = vld [vmem:[%s12149_s1 + $0x1330] sm:$0xff]  ;;  %v2357_v31 = vld [vmem:[%s12151_s3 + $0x658] sm:$0xff] }
 0x198   :  { %v5658_v47 = vpack.c.bf16 %v652_v40, %v645_v25  ;;  %v2365_v33 = vld [vmem:[%s12151_s3 + $0x698] sm:$0xff]  ;;  %v707_v25 = vld [vmem:[%s12149_s1 + $0x14e8] sm:$0xff]  ;;  %v5928_v40 = vpack.c.bf16 %v2357_v31, %v2350_v30 }
 0x199   :  { %5637 = vmatpush1.bf16.msra.mxu0 %v5636_v45  ;;  %v2316_v45 = vld [vmem:[%s12151_s3 + $0x510] sm:$0xff] }
 0x19a   :  { %5639 = vmatprep.subr.bf16.mxu0 %v5638_v46  ;;  %5893 = vmatpush1.bf16.msra.mxu1 %v5892_v51  ;;  %v5656_v46 = vpack.c.bf16 %v637_v37, %v630_v36  ;;  %v659_v51 = vld [vmem:[%s12149_s1 + $0x1368] sm:$0xff]  ;;  %v5914_v39 = vpack.c.bf16 %v2316_v45, %v2309_v44  ;;  %v700_v37 = vld [vmem:[%s12149_s1 + $0x14b0] sm:$0xff] }
 0x19b   :  { %5895 = vmatprep.subr.bf16.mxu1 %v5894_v53  ;;  %v666_v53 = vld [vmem:[%s12149_s1 + $0x13a0] sm:$0xff]  ;;  %v2371_v44 = vld [vmem:[%s12151_s3 + $0x6c8] sm:$0xff] }
 0x19c   :  { %v5662_v24 = vpack.c.bf16 %v666_v53, %v659_v51  ;;  %v2379_v45 = vld [vmem:[%s12151_s3 + $0x708] sm:$0xff]  ;;  %v721_v51 = vld [vmem:[%s12149_s1 + $0x1558] sm:$0xff] }
 0x19d   :  { %5641 = vmatpush1.bf16.msra.mxu0 %v5640_v58  ;;  %v2330_v58 = vld [vmem:[%s12151_s3 + $0x580] sm:$0xff]  ;;  %v729_v53 = vld [vmem:[%s12149_s1 + $0x1598] sm:$0xff] }
 0x19e   :  { %5643 = vmatprep.subr.bf16.mxu0 %v5642_v59  ;;  %5897 = vmatpush1.bf16.msra.mxu1 %v5896_v0  ;;  %v5660_v59 = vpack.c.bf16 %v651_v50, %v644_v48  ;;  %v673_v0 = vld [vmem:[%s12149_s1 + $0x13d8] sm:$0xff]  ;;  %v5918_v3 = vpack.c.bf16 %v2330_v58, %v2323_v57  ;;  %v714_v50 = vld [vmem:[%s12149_s1 + $0x1520] sm:$0xff]  ;;  %v728_v58 = vld [vmem:[%s12149_s1 + $0x1590] sm:$0xff] }
 0x19f   :  { %5899 = vmatprep.subr.bf16.mxu1 %v5898_v2  ;;  %v680_v2 = vld [vmem:[%s12149_s1 + $0x1410] sm:$0xff]  ;;  %v5680_v56 = vpack.c.bf16 %v721_v51, %v714_v50 }
 0x1a0   :  { %v5666_v63 = vpack.c.bf16 %v680_v2, %v673_v0  ;;  %v749_v2 = vld [vmem:[%s12149_s1 + $0x1638] sm:$0xff]  ;;  %v812_v51 = vld [vmem:[%s12149_s1 + $0x1830] sm:$0xff] }
 0x1a1   :  { %5645 = vmatpush1.bf16.msra.mxu0 %v5644_v7  ;;  %v2344_v7 = vld [vmem:[%s12151_s3 + $0x5f0] sm:$0xff] }
 0x1a2   :  { %5647 = vmatprep.subr.bf16.mxu0 %v5646_v49  ;;  %5901 = vmatpush1.bf16.msra.mxu1 %v5900_v10  ;;  %v5664_v49 = vpack.c.bf16 %v665_v62, %v658_v60  ;;  %v687_v10 = vld [vmem:[%s12149_s1 + $0x1448] sm:$0xff]  ;;  %v5922_v15 = vpack.c.bf16 %v2344_v7, %v2337_v6  ;;  %v750_v60 = vld [vmem:[%s12149_s1 + $0x1640] sm:$0xff] }
 0x1a3   :  { %5903 = vmatprep.subr.bf16.mxu1 %v5902_v13  ;;  %v694_v13 = vld [vmem:[%s12149_s1 + $0x1480] sm:$0xff]  ;;  %v763_v6 = vld [vmem:[%s12149_s1 + $0x16a8] sm:$0xff] }
 0x1a4   :  { %v5670_v21 = vpack.c.bf16 %v694_v13, %v687_v10  ;;  %v771_v7 = vld [vmem:[%s12149_s1 + $0x16e8] sm:$0xff]  ;;  %v777_v10 = vld [vmem:[%s12149_s1 + $0x1718] sm:$0xff]  ;;  %v792_v13 = vld [vmem:[%s12149_s1 + $0x1790] sm:$0xff] }
 0x1a5   :  { %5649 = vmatpush1.bf16.msra.mxu0 %v5648_v19  ;;  %v2358_v19 = vld [vmem:[%s12151_s3 + $0x660] sm:$0xff] }
 0x1a6   :  { %5651 = vmatprep.subr.bf16.mxu0 %v5650_v20  ;;  %5905 = vmatpush1.bf16.msra.mxu1 %v5904_v23  ;;  %v5668_v20 = vpack.c.bf16 %v679_v9, %v672_v8  ;;  %v701_v23 = vld [vmem:[%s12149_s1 + $0x14b8] sm:$0xff]  ;;  %v5926_v28 = vpack.c.bf16 %v2358_v19, %v2351_v18  ;;  %v770_v9 = vld [vmem:[%s12149_s1 + $0x16e0] sm:$0xff]  ;;  %v942_v18 = vsub.s32 1, %v7083_v61  ;;  %v950_v19 = vsub.s32 3, %v7083_v61 }
 0x1a7   :  { %5907 = vmatprep.subr.bf16.mxu1 %v5906_v27  ;;  %v708_v27 = vld [vmem:[%s12149_s1 + $0x14f0] sm:$0xff]  ;;  %v5696_v16 = vpack.c.bf16 %v777_v10, %v770_v9 }
 0x1a8   :  { %v5674_v36 = vpack.c.bf16 %v708_v27, %v701_v23  ;;  %v806_v23 = vld [vmem:[%s12149_s1 + $0x1800] sm:$0xff]  ;;  %v943_v27 = vrot.slane %v9675_v17, %v942_v18  ;;  %v951_v30 = vrot.slane %v9675_v17, %v950_v19  ;;  %v2428_v9 = vld [vmem:[%s12151_s3 + $0x890] sm:$0xff] }
 0x1a9   :  { %5653 = vmatpush1.bf16.msra.mxu0 %v5652_v34  ;;  %v2372_v34 = vld [vmem:[%s12151_s3 + $0x6d0] sm:$0xff] }
 0x1aa   :  { %5655 = vmatprep.subr.bf16.mxu0 %v5654_v35  ;;  %5909 = vmatpush1.bf16.msra.mxu1 %v5908_v38  ;;  %v5672_v35 = vpack.c.bf16 %v693_v32, %v686_v22  ;;  %v715_v38 = vld [vmem:[%s12149_s1 + $0x1528] sm:$0xff]  ;;  %v5930_v42 = vpack.c.bf16 %v2372_v34, %v2365_v33  ;;  %v798_v33 = vld [vmem:[%s12149_s1 + $0x17c0] sm:$0xff]  ;;  %v805_v34 = vld [vmem:[%s12149_s1 + $0x17f8] sm:$0xff] }
 0x1ab   :  { %5911 = vmatprep.subr.bf16.mxu1 %v5910_v41  ;;  %v722_v41 = vld [vmem:[%s12149_s1 + $0x1560] sm:$0xff]  ;;  %v791_v22 = vld [vmem:[%s12149_s1 + $0x1788] sm:$0xff] }
 0x1ac   :  { %v5678_v48 = vpack.c.bf16 %v722_v41, %v715_v38  ;;  %v799_v32 = vld [vmem:[%s12149_s1 + $0x17c8] sm:$0xff]  ;;  %v2378_v41 = vld [vmem:[%s12151_s3 + $0x700] sm:$0xff] }
 0x1ad   :  { %5657 = vmatpush1.bf16.msra.mxu0 %v5656_v46  ;;  %v2386_v46 = vld [vmem:[%s12151_s3 + $0x740] sm:$0xff]  ;;  %v5702_v31 = vpack.c.bf16 %v806_v23, %v799_v32  ;;  %v2420_v32 = vld [vmem:[%s12151_s3 + $0x850] sm:$0xff]  ;;  %v2427_v23 = vld [vmem:[%s12151_s3 + $0x888] sm:$0xff] }
 0x1ae   :  { %5659 = vmatprep.subr.bf16.mxu0 %v5658_v47  ;;  %5913 = vmatpush1.bf16.msra.mxu1 %v5912_v52  ;;  %v5676_v47 = vpack.c.bf16 %v707_v25, %v700_v37  ;;  %v5932_v52 = vpack.c.bf16 %v2371_v44, %v2364_v43  ;;  %v5934_v54 = vpack.c.bf16 %v2386_v46, %v2379_v45  ;;  %v820_v37 = vld [vmem:[%s12149_s1 + $0x1870] sm:$0xff]  ;;  %v2393_v46 = vld [vmem:[%s12151_s3 + $0x778] sm:$0xff] }
 0x1af   :  { %5915 = vmatprep.subr.bf16.mxu1 %v5914_v39  ;;  %v736_v39 = vld [vmem:[%s12149_s1 + $0x15d0] sm:$0xff]  ;;  %v5704_v45 = vpack.c.bf16 %v805_v34, %v798_v33  ;;  %v861_v33 = vld [vmem:[%s12149_s1 + $0x19b8] sm:$0xff]  ;;  %v5948_v34 = vpack.c.bf16 %v2427_v23, %v2420_v32  ;;  %v910_v23 = vld [vmem:[%s12149_s1 + $0x1b40] sm:$0xff] }
 0x1b0   :  { %v5682_v57 = vpack.c.bf16 %v736_v39, %v729_v53 }
 0x1b1   :  { %5661 = vmatpush1.bf16.msra.mxu0 %v5660_v59  ;;  %v735_v59 = vld [vmem:[%s12149_s1 + $0x15c8] sm:$0xff] }
 0x1b2   :  { %5663 = vmatprep.subr.bf16.mxu0 %v5662_v24  ;;  %5917 = vmatpush1.bf16.msra.mxu1 %v5916_v1  ;;  %v743_v24 = vld [vmem:[%s12149_s1 + $0x1608] sm:$0xff]  ;;  %v5684_v62 = vpack.c.bf16 %v735_v59, %v728_v58  ;;  %v742_v1 = vld [vmem:[%s12149_s1 + $0x1600] sm:$0xff]  ;;  %v2392_v59 = vld [vmem:[%s12151_s3 + $0x770] sm:$0xff] }
 0x1b3   :  { %5919 = vmatprep.subr.bf16.mxu1 %v5918_v3  ;;  %v5686_v0 = vpack.c.bf16 %v750_v60, %v743_v24  ;;  %v757_v3 = vld [vmem:[%s12149_s1 + $0x1678] sm:$0xff]  ;;  %v2399_v24 = vld [vmem:[%s12151_s3 + $0x7a8] sm:$0xff] }
 0x1b5   :  { %5665 = vmatpush1.bf16.msra.mxu0 %v5664_v49  ;;  %v778_v49 = vld [vmem:[%s12149_s1 + $0x1720] sm:$0xff] }
 0x1b6   :  { %5667 = vmatprep.subr.bf16.mxu0 %v5666_v63  ;;  %5921 = vmatpush1.bf16.msra.mxu1 %v5920_v12  ;;  %v5692_v63 = vpack.c.bf16 %v763_v6, %v756_v5  ;;  %v5694_v8 = vpack.c.bf16 %v778_v49, %v771_v7  ;;  %v785_v12 = vld [vmem:[%s12149_s1 + $0x1758] sm:$0xff]  ;;  %v848_v5 = vld [vmem:[%s12149_s1 + $0x1950] sm:$0xff]  ;;  %v2406_v7 = vld [vmem:[%s12151_s3 + $0x7e0] sm:$0xff] }
 0x1b7   :  { %5923 = vmatprep.subr.bf16.mxu1 %v5922_v15  ;;  %v938_v15 = vsub.s32 0, %v7083_v61  ;;  %v2413_v49 = vld [vmem:[%s12151_s3 + $0x818] sm:$0xff] }
 0x1b9   :  { %5669 = vmatpush1.bf16.msra.mxu0 %v5668_v20  ;;  %v5698_v20 = vpack.c.bf16 %v792_v13, %v785_v12  ;;  %v840_v12 = vld [vmem:[%s12149_s1 + $0x1910] sm:$0xff]  ;;  %v847_v13 = vld [vmem:[%s12149_s1 + $0x1948] sm:$0xff] }
 0x1ba   :  { %5671 = vmatprep.subr.bf16.mxu0 %v5670_v21  ;;  %5925 = vmatpush1.bf16.msra.mxu1 %v5924_v26  ;;  %v784_v21 = vld [vmem:[%s12149_s1 + $0x1750] sm:$0xff]  ;;  %v939_v26 = vrot.slane %v9675_v17, %v938_v15 }
 0x1bb   :  { %5927 = vmatprep.subr.bf16.mxu1 %v5926_v28  ;;  %v5700_v28 = vpack.c.bf16 %v791_v22, %v784_v21  ;;  %v862_v21 = vld [vmem:[%s12149_s1 + $0x19c0] sm:$0xff] }
 0x1bd   :  { %5673 = vmatpush1.bf16.msra.mxu0 %v5672_v35 }
 0x1be   :  { %5675 = vmatprep.subr.bf16.mxu0 %v5674_v36  ;;  %5929 = vmatpush1.bf16.msra.mxu1 %v5928_v40  ;;  %v813_v36 = vld [vmem:[%s12149_s1 + $0x1838] sm:$0xff] }
 0x1bf   :  { %5931 = vmatprep.subr.bf16.mxu1 %v5930_v42  ;;  %v2385_v42 = vld [vmem:[%s12151_s3 + $0x738] sm:$0xff]  ;;  %v5706_v50 = vpack.c.bf16 %v820_v37, %v813_v36  ;;  %v876_v36 = vld [vmem:[%s12149_s1 + $0x1a30] sm:$0xff] }
 0x1c0   :  { %v5936_v39 = vpack.c.bf16 %v2385_v42, %v2378_v41  ;;  %v2449_v42 = vld [vmem:[%s12151_s3 + $0x938] sm:$0xff] }
 0x1c1   :  { %5677 = vmatpush1.bf16.msra.mxu0 %v5676_v47  ;;  %v2400_v47 = vld [vmem:[%s12151_s3 + $0x7b0] sm:$0xff] }
 0x1c2   :  { %5679 = vmatprep.subr.bf16.mxu0 %v5678_v48  ;;  %5933 = vmatpush1.bf16.msra.mxu1 %v5932_v52  ;;  %v819_v52 = vld [vmem:[%s12149_s1 + $0x1868] sm:$0xff]  ;;  %v5938_v58 = vpack.c.bf16 %v2400_v47, %v2393_v46 }
 0x1c3   :  { %5935 = vmatprep.subr.bf16.mxu1 %v5934_v54  ;;  %v827_v54 = vld [vmem:[%s12149_s1 + $0x18a8] sm:$0xff] }
 0x1c4   :  { %1790 = vmatmul.mubr.f32.vlgmr.msra.gmra.mrb[2].mxu0 %v7684_v55  ;;  %v764_v55 = vld [vmem:[%s12149_s1 + $0x16b0] sm:$0xff]  ;;  %v875_v46 = vld [vmem:[%s12149_s1 + $0x1a28] sm:$0xff] }
 0x1c5   :  { %5681 = vmatpush1.bf16.msra.mxu0 %v5680_v56  ;;  %1860 = vmatprep.mubr.f32.mxu0 %v8094_v29  ;;  %v5688_v29 = vpack.c.bf16 %v749_v2, %v742_v1  ;;  %v5690_v4 = vpack.c.bf16 %v764_v55, %v757_v3  ;;  %v834_v56 = vld [vmem:[%s12149_s1 + $0x18e0] sm:$0xff]  ;;  %v833_v55 = vld [vmem:[%s12149_s1 + $0x18d8] sm:$0xff] }
 0x1c6   :  { %5683 = vmatprep.subr.bf16.mxu0 %v5682_v57  ;;  %v2414_v1 = vld [vmem:[%s12151_s3 + $0x820] sm:$0xff]  ;;  %v5710_v2 = vpack.c.bf16 %v834_v56, %v827_v54  ;;  %v2463_v56 = vld [vmem:[%s12151_s3 + $0x9a8] sm:$0xff] }
 0x1c7   :  { %v826_v3 = vld [vmem:[%s12149_s1 + $0x18a0] sm:$0xff] }
 0x1c9   :  { %5685 = vmatpush1.bf16.msra.mxu0 %v5684_v62  ;;  %v5708_v62 = vpack.c.bf16 %v819_v52, %v812_v51  ;;  %v2448_v52 = vld [vmem:[%s12151_s3 + $0x930] sm:$0xff] }
 0x1ca   :  { %5687 = vmatprep.subr.bf16.mxu0 %v5686_v0  ;;  %v2407_v0 = vld [vmem:[%s12151_s3 + $0x7e8] sm:$0xff] }
 0x1cb   :  { %v5942_v6 = vpack.c.bf16 %v2414_v1, %v2407_v0  ;;  %v897_v1 = vld [vmem:[%s12149_s1 + $0x1ad8] sm:$0xff] }
 0x1cd   :  { %5689 = vmatpush1.bf16.msra.mxu0 %v5688_v29  ;;  %v5940_v29 = vpack.c.bf16 %v2399_v24, %v2392_v59  ;;  %v882_v24 = vld [vmem:[%s12149_s1 + $0x1a60] sm:$0xff] }
 0x1ce   :  { %5691 = vmatprep.subr.bf16.mxu0 %v5690_v4  ;;  %v841_v4 = vld [vmem:[%s12149_s1 + $0x1918] sm:$0xff] }
 0x1cf   :  { %v5714_v10 = vpack.c.bf16 %v848_v5, %v841_v4  ;;  %v2477_v5 = vld [vmem:[%s12151_s3 + $0xa18] sm:$0xff] }
 0x1d1   :  { %5693 = vmatpush1.bf16.msra.mxu0 %v5692_v63  ;;  %v5712_v63 = vpack.c.bf16 %v833_v55, %v826_v3  ;;  %v2462_v55 = vld [vmem:[%s12151_s3 + $0x9a0] sm:$0xff] }
 0x1d2   :  { %5695 = vmatprep.subr.bf16.mxu0 %v5694_v8  ;;  %v2421_v8 = vld [vmem:[%s12151_s3 + $0x858] sm:$0xff] }
 0x1d3   :  { %v5946_v22 = vpack.c.bf16 %v2428_v9, %v2421_v8  ;;  %v911_v9 = vld [vmem:[%s12149_s1 + $0x1b48] sm:$0xff] }
 0x1d5   :  { %5697 = vmatpush1.bf16.msra.mxu0 %v5696_v16  ;;  %v5944_v16 = vpack.c.bf16 %v2413_v49, %v2406_v7  ;;  %v896_v49 = vld [vmem:[%s12149_s1 + $0x1ad0] sm:$0xff] }
 0x1d6   :  { %5699 = vmatprep.subr.bf16.mxu0 %v5698_v20  ;;  %v855_v20 = vld [vmem:[%s12149_s1 + $0x1988] sm:$0xff] }
 0x1d7   :  { %v1294_v35 = vpop.f32.mrb[0].mxu0 }
 0x1d8   :  { %v6665_v25 = vadd.f32 %v1294_v35, %v939_v26  ;;  %v9712_v38 = vpop.f32.mrb[0].mxu1  ;;  %v1296_v40 = vpop.f32.mrb[1].mxu0  ;;  %v5716_v26 = vpack.c.bf16 %v847_v13, %v840_v12  ;;  %v869_v35 = vld [vmem:[%s12149_s1 + $0x19f8] sm:$0xff]  ;;  %v2476_v13 = vld [vmem:[%s12151_s3 + $0xa10] sm:$0xff] }
 0x1d9   :  { %v6666_v43 = vadd.f32 %v1296_v40, %v943_v27  ;;  %v1580_v44 = vpop.f32.mrb[1].mxu1  ;;  %5701 = vmatpush1.bf16.msra.mxu0 %v5700_v28  ;;  %v2435_v27 = vld [vmem:[%s12151_s3 + $0x8c8] sm:$0xff]  ;;  %v2442_v28 = vld [vmem:[%s12151_s3 + $0x900] sm:$0xff]  ;;  %v2441_v40 = vld [vmem:[%s12151_s3 + $0x8f8] sm:$0xff] }
 0x1da   :  { %v6668_v48 = vadd.f32 %v1580_v44, %v951_v30  ;;  %5703 = vmatprep.subr.bf16.mxu0 %v5702_v31  ;;  %v9740_v57 = vmax.f32 %v6665_v25, 0.0  ;;  %v5718_v30 = vpack.c.bf16 %v862_v21, %v855_v20  ;;  %v854_v31 = vld [vmem:[%s12149_s1 + $0x1980] sm:$0xff]  ;;  %v5950_v37 = vpack.c.bf16 %v2442_v28, %v2435_v27  ;;  %v2491_v21 = vld [vmem:[%s12151_s3 + $0xa88] sm:$0xff]  ;;  %v925_v28 = vld [vmem:[%s12149_s1 + $0x1bb8] sm:$0xff] }
 0x1db   :  { %v9732_v53 = vmax.f32 %v6666_v43, 0.0  ;;  %v2434_v25 = vld [vmem:[%s12151_s3 + $0x8c0] sm:$0xff]  ;;  %v5720_v41 = vpack.c.bf16 %v861_v33, %v854_v31  ;;  %v2456_v43 = vld [vmem:[%s12151_s3 + $0x970] sm:$0xff]  ;;  %v5722_v44 = vpack.c.bf16 %v876_v36, %v869_v35  ;;  %v2505_v36 = vld [vmem:[%s12151_s3 + $0xaf8] sm:$0xff] }
 0x1dc   :  { %v9748_v60 = vmax.f32 %v6668_v48, 0.0  ;;  %v5952_v47 = vpack.c.bf16 %v2441_v40, %v2434_v25  ;;  %v883_v48 = vld [vmem:[%s12149_s1 + $0x1a68] sm:$0xff]  ;;  %v5954_v51 = vpack.c.bf16 %v2456_v43, %v2449_v42  ;;  %v2490_v33 = vld [vmem:[%s12151_s3 + $0xa80] sm:$0xff]  ;;  %v924_v40 = vld [vmem:[%s12149_s1 + $0x1bb0] sm:$0xff] }
 0x1dd   :  { %5705 = vmatpush1.bf16.msra.mxu0 %v5704_v45  ;;  %2945 = vmatprep.mubr.f32.mxu1 %v9732_v53  ;;  %v868_v45 = vld [vmem:[%s12149_s1 + $0x19f0] sm:$0xff]  ;;  %v2157_v43 = vld [vmem:[%s12151_s3 + $0x18] sm:$0xff] }
 0x1de   :  { %2946 = vmatmul.mubr.f32.vlgmr.msra.gmra.mrb[10].mxu1 %v9740_v57  ;;  %5707 = vmatprep.subr.bf16.mxu0 %v5706_v50  ;;  %v890_v50 = vld [vmem:[%s12149_s1 + $0x1aa0] sm:$0xff]  ;;  %v5724_v54 = vpack.c.bf16 %v875_v46, %v868_v45  ;;  %v2504_v46 = vld [vmem:[%s12151_s3 + $0xaf0] sm:$0xff] }
 0x1df   :  { %5937 = vmatpush1.bf16.msra.mxu1 %v5936_v39  ;;  %3016 = vmatprep.mubr.f32.mxu1 %v9748_v60  ;;  %v2455_v39 = vld [vmem:[%s12151_s3 + $0x968] sm:$0xff]  ;;  %v5726_v59 = vpack.c.bf16 %v890_v50, %v883_v48 }
 0x1e0   :  { %5939 = vmatprep.subr.bf16.mxu1 %v5938_v58  ;;  %v2470_v58 = vld [vmem:[%s12151_s3 + $0x9e0] sm:$0xff]  ;;  %v5956_v0 = vpack.c.bf16 %v2455_v39, %v2448_v52  ;;  %v2519_v50 = vld [vmem:[%s12151_s3 + $0xb68] sm:$0xff] }
 0x1e1   :  { %5709 = vmatpush1.bf16.msra.mxu0 %v5708_v62  ;;  %v889_v62 = vld [vmem:[%s12149_s1 + $0x1a98] sm:$0xff]  ;;  %v5958_v3 = vpack.c.bf16 %v2470_v58, %v2463_v56  ;;  %v2163_v56 = vld [vmem:[%s12151_s3 + $0x48] sm:$0xff] }
 0x1e2   :  { %5711 = vmatprep.subr.bf16.mxu0 %v5710_v2  ;;  %v904_v2 = vld [vmem:[%s12149_s1 + $0x1b10] sm:$0xff]  ;;  %v5728_v4 = vpack.c.bf16 %v889_v62, %v882_v24  ;;  %v2171_v24 = vld [vmem:[%s12151_s3 + $0x88] sm:$0xff]  ;;  %v2178_v62 = vld [vmem:[%s12151_s3 + $0xc0] sm:$0xff] }
 0x1e3   :  { %5941 = vmatpush1.bf16.msra.mxu1 %v5940_v29  ;;  %v2469_v29 = vld [vmem:[%s12151_s3 + $0x9d8] sm:$0xff]  ;;  %v5730_v7 = vpack.c.bf16 %v904_v2, %v897_v1  ;;  %v2518_v2 = vld [vmem:[%s12151_s3 + $0xb60] sm:$0xff] }
 0x1e4   :  { %5943 = vmatprep.subr.bf16.mxu1 %v5942_v6  ;;  %v2484_v6 = vld [vmem:[%s12151_s3 + $0xa50] sm:$0xff]  ;;  %v5960_v8 = vpack.c.bf16 %v2469_v29, %v2462_v55  ;;  %v2533_v29 = vld [vmem:[%s12151_s3 + $0xbd8] sm:$0xff] }
 0x1e5   :  { %5713 = vmatpush1.bf16.msra.mxu0 %v5712_v63  ;;  %v903_v63 = vld [vmem:[%s12149_s1 + $0x1b08] sm:$0xff]  ;;  %v5962_v12 = vpack.c.bf16 %v2484_v6, %v2477_v5  ;;  %v6070_v5 = vpack.c.bf16 %v2178_v62, %v2171_v24  ;;  %v2170_v6 = vld [vmem:[%s12151_s3 + $0x80] sm:$0xff]  ;;  %v2581_v24 = vld [vmem:[%s12151_s3 + $0xd58] sm:$0xff]  ;;  %v962_v62 = vsub.s32 6, %v7083_v61 }
 0x1e6   :  { %5715 = vmatprep.subr.bf16.mxu0 %v5714_v10  ;;  %v918_v10 = vld [vmem:[%s12149_s1 + $0x1b80] sm:$0xff]  ;;  %v5732_v20 = vpack.c.bf16 %v903_v63, %v896_v49  ;;  %v2185_v63 = vld [vmem:[%s12151_s3 + $0xf8] sm:$0xff] }
 0x1e7   :  { %5945 = vmatpush1.bf16.msra.mxu1 %v5944_v16  ;;  %v2483_v16 = vld [vmem:[%s12151_s3 + $0xa48] sm:$0xff]  ;;  %v5734_v32 = vpack.c.bf16 %v918_v10, %v911_v9  ;;  %v2532_v10 = vld [vmem:[%s12151_s3 + $0xbd0] sm:$0xff] }
 0x1e8   :  { %5947 = vmatprep.subr.bf16.mxu1 %v5946_v22  ;;  %v2498_v22 = vld [vmem:[%s12151_s3 + $0xac0] sm:$0xff]  ;;  %v5964_v27 = vpack.c.bf16 %v2483_v16, %v2476_v13  ;;  %v2547_v16 = vld [vmem:[%s12151_s3 + $0xc48] sm:$0xff] }
 0x1e9   :  { %5717 = vmatpush1.bf16.msra.mxu0 %v5716_v26  ;;  %v917_v26 = vld [vmem:[%s12149_s1 + $0x1b78] sm:$0xff]  ;;  %v5966_v31 = vpack.c.bf16 %v2498_v22, %v2491_v21  ;;  %v2184_v21 = vld [vmem:[%s12151_s3 + $0xf0] sm:$0xff]  ;;  %v2191_v22 = vld [vmem:[%s12151_s3 + $0x128] sm:$0xff] }
 0x1ea   :  { %5719 = vmatprep.subr.bf16.mxu0 %v5718_v30  ;;  %v932_v30 = vld [vmem:[%s12149_s1 + $0x1bf0] sm:$0xff]  ;;  %v5736_v35 = vpack.c.bf16 %v917_v26, %v910_v23  ;;  %v2199_v23 = vld [vmem:[%s12151_s3 + $0x168] sm:$0xff]  ;;  %v2206_v26 = vld [vmem:[%s12151_s3 + $0x1a0] sm:$0xff] }
 0x1eb   :  { %5949 = vmatpush1.bf16.msra.mxu1 %v5948_v34  ;;  %v2497_v34 = vld [vmem:[%s12151_s3 + $0xab8] sm:$0xff]  ;;  %v5738_v25 = vpack.c.bf16 %v932_v30, %v925_v28  ;;  %v2546_v28 = vld [vmem:[%s12151_s3 + $0xc40] sm:$0xff] }
 0x1ec   :  { %5951 = vmatprep.subr.bf16.mxu1 %v5950_v37  ;;  %v2512_v37 = vld [vmem:[%s12151_s3 + $0xb30] sm:$0xff]  ;;  %v5968_v42 = vpack.c.bf16 %v2497_v34, %v2490_v33  ;;  %v2553_v30 = vld [vmem:[%s12151_s3 + $0xc78] sm:$0xff] }
 0x1ed   :  { %5721 = vmatpush1.bf16.msra.mxu0 %v5720_v41  ;;  %v931_v41 = vld [vmem:[%s12149_s1 + $0x1be8] sm:$0xff]  ;;  %v5970_v45 = vpack.c.bf16 %v2512_v37, %v2505_v36  ;;  %v2561_v33 = vld [vmem:[%s12151_s3 + $0xcb8] sm:$0xff]  ;;  %v2568_v34 = vld [vmem:[%s12151_s3 + $0xcf0] sm:$0xff] }
 0x1ee   :  { %5723 = vmatprep.subr.bf16.mxu0 %v5722_v44  ;;  %v2164_v44 = vld [vmem:[%s12151_s3 + $0x50] sm:$0xff]  ;;  %v5740_v48 = vpack.c.bf16 %v931_v41, %v924_v40  ;;  %v2198_v36 = vld [vmem:[%s12151_s3 + $0x160] sm:$0xff]  ;;  %v2205_v37 = vld [vmem:[%s12151_s3 + $0x198] sm:$0xff] }
 0x1ef   :  { %5953 = vmatpush1.bf16.msra.mxu1 %v5952_v47  ;;  %v2511_v47 = vld [vmem:[%s12151_s3 + $0xb28] sm:$0xff]  ;;  %v6066_v39 = vpack.c.bf16 %v2164_v44, %v2157_v43  ;;  %v2213_v40 = vld [vmem:[%s12151_s3 + $0x1d8] sm:$0xff]  ;;  %v2220_v41 = vld [vmem:[%s12151_s3 + $0x210] sm:$0xff] }
 0x1f0   :  { %5955 = vmatprep.subr.bf16.mxu1 %v5954_v51  ;;  %v2526_v51 = vld [vmem:[%s12151_s3 + $0xba0] sm:$0xff]  ;;  %v2560_v43 = vld [vmem:[%s12151_s3 + $0xcb0] sm:$0xff]  ;;  %v2567_v44 = vld [vmem:[%s12151_s3 + $0xce8] sm:$0xff] }
 0x1f1   :  { %5725 = vmatpush1.bf16.msra.mxu0 %v5724_v54  ;;  %v2156_v54 = vld [vmem:[%s12151_s3 + $0x10] sm:$0xff]  ;;  %v5974_v1 = vpack.c.bf16 %v2526_v51, %v2519_v50  ;;  %v2219_v51 = vld [vmem:[%s12151_s3 + $0x208] sm:$0xff] }
 0x1f2   :  { %5727 = vmatprep.subr.bf16.mxu0 %v5726_v59  ;;  %v5972_v59 = vpack.c.bf16 %v2511_v47, %v2504_v46  ;;  %v6068_v55 = vpack.c.bf16 %v2163_v56, %v2156_v54  ;;  %v2575_v46 = vld [vmem:[%s12151_s3 + $0xd28] sm:$0xff]  ;;  %v2582_v47 = vld [vmem:[%s12151_s3 + $0xd60] sm:$0xff]  ;;  %v2212_v50 = vld [vmem:[%s12151_s3 + $0x1d0] sm:$0xff]  ;;  %v946_v56 = vsub.s32 2, %v7083_v61 }
 0x1f3   :  { %5957 = vmatpush1.bf16.msra.mxu1 %v5956_v0  ;;  %v2234_v54 = vld [vmem:[%s12151_s3 + $0x280] sm:$0xff] }
 0x1f4   :  { %5959 = vmatprep.subr.bf16.mxu1 %v5958_v3  ;;  %v2525_v3 = vld [vmem:[%s12151_s3 + $0xb98] sm:$0xff] }
 0x1f5   :  { %5729 = vmatpush1.bf16.msra.mxu0 %v5728_v4  ;;  %v2540_v4 = vld [vmem:[%s12151_s3 + $0xc10] sm:$0xff]  ;;  %v5976_v49 = vpack.c.bf16 %v2525_v3, %v2518_v2  ;;  %v2589_v2 = vld [vmem:[%s12151_s3 + $0xd98] sm:$0xff] }
 0x1f6   :  { %5731 = vmatprep.subr.bf16.mxu0 %v5730_v7  ;;  %v2177_v7 = vld [vmem:[%s12151_s3 + $0xb8] sm:$0xff]  ;;  %v5978_v9 = vpack.c.bf16 %v2540_v4, %v2533_v29  ;;  %v2596_v3 = vld [vmem:[%s12151_s3 + $0xdd0] sm:$0xff]  ;;  %v2226_v29 = vld [vmem:[%s12151_s3 + $0x240] sm:$0xff] }
 0x1f7   :  { %5961 = vmatpush1.bf16.msra.mxu1 %v5960_v8  ;;  %v2192_v8 = vld [vmem:[%s12151_s3 + $0x130] sm:$0xff]  ;;  %v6072_v13 = vpack.c.bf16 %v2177_v7, %v2170_v6  ;;  %v2233_v4 = vld [vmem:[%s12151_s3 + $0x278] sm:$0xff] }
 0x1f8   :  { %5963 = vmatprep.subr.bf16.mxu1 %v5962_v12  ;;  %v4614_v52 = vpop.f32.mrb[2].mxu1  ;;  %v2539_v12 = vld [vmem:[%s12151_s3 + $0xc08] sm:$0xff]  ;;  %v2241_v6 = vld [vmem:[%s12151_s3 + $0x2b8] sm:$0xff]  ;;  %v2248_v7 = vld [vmem:[%s12151_s3 + $0x2f0] sm:$0xff] }
 0x1f9   :  { %5733 = vmatpush1.bf16.msra.mxu0 %v5732_v20  ;;  %v4615_v58 = vpop.f32.mrb[3].mxu1  ;;  %v6074_v20 = vpack.c.bf16 %v2192_v8, %v2185_v63  ;;  %v5994_v63 = vpack.c.bf16 %v2596_v3, %v2589_v2  ;;  %v2588_v8 = vld [vmem:[%s12151_s3 + $0xd90] sm:$0xff]  ;;  %v2630_v2 = vld [vmem:[%s12151_s3 + $0xee0] sm:$0xff]  ;;  %v2637_v3 = vld [vmem:[%s12151_s3 + $0xf18] sm:$0xff] }
 0x1fa   :  { %5735 = vmatprep.subr.bf16.mxu0 %v5734_v32  ;;  %v9963_v0 = vadd.f32 %v4615_v58, %v4614_v52  ;;  %v5980_v32 = vpack.c.bf16 %v2539_v12, %v2532_v10  ;;  %v5988_v52 = vpack.c.bf16 %v2567_v44, %v2560_v43  ;;  %v5990_v58 = vpack.c.bf16 %v2582_v47, %v2575_v46  ;;  %v2616_v46 = vld [vmem:[%s12151_s3 + $0xe70] sm:$0xff]  ;;  %v2623_v47 = vld [vmem:[%s12151_s3 + $0xea8] sm:$0xff] }
 0x1fb   :  { %5965 = vmatpush1.bf16.msra.mxu1 %v5964_v27  ;;  %v963_v10 = vrot.slane %v9675_v17, %v962_v62  ;;  %v6088_v12 = vpack.c.bf16 %v2233_v4, %v2226_v29  ;;  %v2645_v29 = vld [vmem:[%s12151_s3 + $0xf58] sm:$0xff]  ;;  %v2652_v4 = vld [vmem:[%s12151_s3 + $0xf90] sm:$0xff] }
 0x1fc   :  { %5967 = vmatprep.subr.bf16.mxu1 %v5966_v31  ;;  %v6076_v31 = vpack.c.bf16 %v2191_v22, %v2184_v21  ;;  %v2255_v22 = vld [vmem:[%s12151_s3 + $0x328] sm:$0xff] }
 0x1fd   :  { %5737 = vmatpush1.bf16.msra.mxu0 %v5736_v35  ;;  %v6078_v35 = vpack.c.bf16 %v2206_v26, %v2199_v23  ;;  %v1934_v26 = vadd.f32 %v9963_v0, %v963_v10  ;;  %v2624_v0 = vld [vmem:[%s12151_s3 + $0xeb0] sm:$0xff] }
 0x1fe   :  { %5739 = vmatprep.subr.bf16.mxu0 %v5738_v25  ;;  %v5984_v25 = vpack.c.bf16 %v2553_v30, %v2546_v28  ;;  %v2602_v30 = vld [vmem:[%s12151_s3 + $0xe00] sm:$0xff]  ;;  %v2644_v10 = vld [vmem:[%s12151_s3 + $0xf50] sm:$0xff] }
 0x1ff   :  { %5969 = vmatpush1.bf16.msra.mxu1 %v5968_v42  ;;  %v5986_v42 = vpack.c.bf16 %v2568_v34, %v2561_v33 }
 0x200   :  { %5971 = vmatprep.subr.bf16.mxu1 %v5970_v45  ;;  %v6080_v45 = vpack.c.bf16 %v2205_v37, %v2198_v36  ;;  %v2254_v36 = vld [vmem:[%s12151_s3 + $0x320] sm:$0xff]  ;;  %v2261_v37 = vld [vmem:[%s12151_s3 + $0x358] sm:$0xff] }
 0x201   :  { %5741 = vmatpush1.bf16.msra.mxu0 %v5740_v48  ;;  %v6082_v48 = vpack.c.bf16 %v2220_v41, %v2213_v40  ;;  %v2269_v40 = vld [vmem:[%s12151_s3 + $0x398] sm:$0xff]  ;;  %v2276_v41 = vld [vmem:[%s12151_s3 + $0x3d0] sm:$0xff] }
 0x202   :  { %6067 = vmatprep.subr.bf16.mxu0 %v6066_v39  ;;  %v2227_v39 = vld [vmem:[%s12151_s3 + $0x248] sm:$0xff] }
 0x203   :  { %5973 = vmatpush1.bf16.msra.mxu1 %v5972_v59  ;;  %v2574_v59 = vld [vmem:[%s12151_s3 + $0xd20] sm:$0xff] }
 0x204   :  { %1861 = vmatmul.mubr.f32.vlgmr.msra.gmra.mrb[2].mxu0 %v8066_v14  ;;  %5975 = vmatprep.subr.bf16.mxu1 %v5974_v1  ;;  %v2554_v14 = vld [vmem:[%s12151_s3 + $0xc80] sm:$0xff]  ;;  %v6084_v1 = vpack.c.bf16 %v2219_v51, %v2212_v50  ;;  %v2631_v50 = vld [vmem:[%s12151_s3 + $0xee8] sm:$0xff] }
 0x205   :  { %6069 = vmatpush1.bf16.msra.mxu0 %v6068_v55  ;;  %3229 = vmatprep.mubr.f32.mxu0 %v9732_v53  ;;  %v5982_v27 = vpack.c.bf16 %v2554_v14, %v2547_v16  ;;  %v6086_v55 = vpack.c.bf16 %v2234_v54, %v2227_v39  ;;  %v2610_v16 = vld [vmem:[%s12151_s3 + $0xe40] sm:$0xff]  ;;  %v6090_v14 = vpack.c.bf16 %v2248_v7, %v2241_v6  ;;  %v2268_v39 = vld [vmem:[%s12151_s3 + $0x390] sm:$0xff]  ;;  %v2275_v54 = vld [vmem:[%s12151_s3 + $0x3c8] sm:$0xff] }
 0x206   :  { %6071 = vmatprep.subr.bf16.mxu0 %v6070_v5  ;;  %v5992_v5 = vpack.c.bf16 %v2581_v24, %v2574_v59  ;;  %v2638_v51 = vld [vmem:[%s12151_s3 + $0xf20] sm:$0xff]  ;;  %v6004_v24 = vpack.c.bf16 %v2623_v47, %v2616_v46  ;;  %v2289_v7 = vld [vmem:[%s12151_s3 + $0x438] sm:$0xff] }
 0x207   :  { %5977 = vmatpush1.bf16.msra.mxu1 %v5976_v49  ;;  %v947_v49 = vrot.slane %v9675_v17, %v946_v56  ;;  %v2247_v17 = vld [vmem:[%s12151_s3 + $0x2e8] sm:$0xff]  ;;  %v2290_v59 = vld [vmem:[%s12151_s3 + $0x440] sm:$0xff] }
 0x208   :  { %5979 = vmatprep.subr.bf16.mxu1 %v5978_v9  ;;  %v2595_v9 = vld [vmem:[%s12151_s3 + $0xdc8] sm:$0xff]  ;;  %v2282_v6 = vld [vmem:[%s12151_s3 + $0x400] sm:$0xff] }
 0x209   :  { %6073 = vmatpush1.bf16.msra.mxu0 %v6072_v13  ;;  %v2603_v13 = vld [vmem:[%s12151_s3 + $0xe08] sm:$0xff]  ;;  %v5996_v21 = vpack.c.bf16 %v2595_v9, %v2588_v8  ;;  %v6667_v23 = vadd.f32 %v9712_v38, %v947_v49  ;;  %v2617_v38 = vld [vmem:[%s12151_s3 + $0xe78] sm:$0xff]  ;;  %v6008_v8 = vpack.c.bf16 %v2637_v3, %v2630_v2  ;;  %v6010_v9 = vpack.c.bf16 %v2652_v4, %v2645_v29  ;;  %v2694_v46 = vld [vmem:[%s12151_s3 + $0x10e0] sm:$0xff] }
 0x20a   :  { %6075 = vmatprep.subr.bf16.mxu0 %v6074_v20  ;;  %v2240_v20 = vld [vmem:[%s12151_s3 + $0x2b0] sm:$0xff]  ;;  %v5998_v28 = vpack.c.bf16 %v2610_v16, %v2603_v13  ;;  %v2297_v49 = vld [vmem:[%s12151_s3 + $0x478] sm:$0xff]  ;;  %v6104_v13 = vpack.c.bf16 %v2289_v7, %v2282_v6  ;;  %v2659_v16 = vld [vmem:[%s12151_s3 + $0xfc8] sm:$0xff] }
 0x20b   :  { %5981 = vmatpush1.bf16.msra.mxu1 %v5980_v32  ;;  %v2262_v32 = vld [vmem:[%s12151_s3 + $0x360] sm:$0xff]  ;;  %v6092_v33 = vpack.c.bf16 %v2247_v17, %v2240_v20  ;;  %v10145_v43 = vmax.f32 %v6667_v23, 0.0  ;;  %v2296_v17 = vld [vmem:[%s12151_s3 + $0x470] sm:$0xff]  ;;  %v2345_v29 = vld [vmem:[%s12151_s3 + $0x5f8] sm:$0xff] }
 0x20c   :  { %5983 = vmatprep.subr.bf16.mxu1 %v5982_v27  ;;  %v2708_v2 = vld [vmem:[%s12151_s3 + $0x1150] sm:$0xff]  ;;  %v2353_v4 = vld [vmem:[%s12151_s3 + $0x638] sm:$0xff] }
 0x20d   :  { %6077 = vmatpush1.bf16.msra.mxu0 %v6076_v31  ;;  %v2609_v31 = vld [vmem:[%s12151_s3 + $0xe38] sm:$0xff] }
 0x20e   :  { %6079 = vmatprep.subr.bf16.mxu0 %v6078_v35  ;;  %v6094_v35 = vpack.c.bf16 %v2262_v32, %v2255_v22  ;;  %v2311_v22 = vld [vmem:[%s12151_s3 + $0x4e8] sm:$0xff]  ;;  %v2318_v32 = vld [vmem:[%s12151_s3 + $0x520] sm:$0xff] }
 0x20f   :  { %5985 = vmatpush1.bf16.msra.mxu1 %v5984_v25 }
 0x210   :  { %5987 = vmatprep.subr.bf16.mxu1 %v5986_v42  ;;  %v6000_v42 = vpack.c.bf16 %v2609_v31, %v2602_v30  ;;  %v2673_v31 = vld [vmem:[%s12151_s3 + $0x1038] sm:$0xff] }
 0x211   :  { %6081 = vmatpush1.bf16.msra.mxu0 %v6080_v45  ;;  %v6002_v45 = vpack.c.bf16 %v2624_v0, %v2617_v38  ;;  %v2310_v38 = vld [vmem:[%s12151_s3 + $0x4e0] sm:$0xff]  ;;  %v2317_v0 = vld [vmem:[%s12151_s3 + $0x518] sm:$0xff] }
 0x212   :  { %6083 = vmatprep.subr.bf16.mxu0 %v6082_v48  ;;  %v6096_v48 = vpack.c.bf16 %v2261_v37, %v2254_v36  ;;  %v2332_v36 = vld [vmem:[%s12151_s3 + $0x590] sm:$0xff] }
 0x213   :  { %5989 = vmatpush1.bf16.msra.mxu1 %v5988_v52  ;;  %v6098_v52 = vpack.c.bf16 %v2276_v41, %v2269_v40  ;;  %v2672_v40 = vld [vmem:[%s12151_s3 + $0x1030] sm:$0xff]  ;;  %v2679_v41 = vld [vmem:[%s12151_s3 + $0x1068] sm:$0xff] }
 0x214   :  { %5991 = vmatprep.subr.bf16.mxu1 %v5990_v58  ;;  %v2283_v58 = vld [vmem:[%s12151_s3 + $0x408] sm:$0xff] }
 0x215   :  { %6085 = vmatpush1.bf16.msra.mxu0 %v6084_v1  ;;  %v6006_v1 = vpack.c.bf16 %v2638_v51, %v2631_v50  ;;  %v2331_v50 = vld [vmem:[%s12151_s3 + $0x588] sm:$0xff] }
 0x216   :  { %6087 = vmatprep.subr.bf16.mxu0 %v6086_v55  ;;  %v6100_v55 = vpack.c.bf16 %v2275_v54, %v2268_v39  ;;  %v2339_v51 = vld [vmem:[%s12151_s3 + $0x5c8] sm:$0xff]  ;;  %v6020_v39 = vpack.c.bf16 %v2679_v41, %v2672_v40  ;;  %v2728_v40 = vld [vmem:[%s12151_s3 + $0x11f0] sm:$0xff] }
 0x217   :  { %5993 = vmatpush1.bf16.msra.mxu1 %v5992_v5  ;;  %v6102_v5 = vpack.c.bf16 %v2290_v59, %v2283_v58  ;;  %v2686_v58 = vld [vmem:[%s12151_s3 + $0x10a0] sm:$0xff]  ;;  %v2693_v59 = vld [vmem:[%s12151_s3 + $0x10d8] sm:$0xff]  ;;  %v2735_v41 = vld [vmem:[%s12151_s3 + $0x1228] sm:$0xff] }
 0x218   :  { %5995 = vmatprep.subr.bf16.mxu1 %v5994_v63  ;;  %v4649_v27 = vpop.f32.mrb[4].mxu1  ;;  %v2304_v63 = vld [vmem:[%s12151_s3 + $0x4b0] sm:$0xff]  ;;  %v6024_v6 = vpack.c.bf16 %v2693_v59, %v2686_v58  ;;  %v2749_v58 = vld [vmem:[%s12151_s3 + $0x1298] sm:$0xff] }
 0x219   :  { %6089 = vmatpush1.bf16.msra.mxu0 %v6088_v12  ;;  %v4650_v34 = vpop.f32.mrb[5].mxu1  ;;  %v2651_v12 = vld [vmem:[%s12151_s3 + $0xf88] sm:$0xff]  ;;  %v6106_v20 = vpack.c.bf16 %v2304_v63, %v2297_v49  ;;  %v2700_v49 = vld [vmem:[%s12151_s3 + $0x1110] sm:$0xff] }
 0x21a   :  { %6091 = vmatprep.subr.bf16.mxu0 %v6090_v14  ;;  %v4651_v25 = vadd.f32 %v4650_v34, %v4649_v27  ;;  %v2666_v14 = vld [vmem:[%s12151_s3 + $0x1000] sm:$0xff]  ;;  %v6012_v23 = vpack.c.bf16 %v2651_v12, %v2644_v10  ;;  %v6110_v34 = vpack.c.bf16 %v2318_v32, %v2311_v22  ;;  %v2707_v63 = vld [vmem:[%s12151_s3 + $0x1148] sm:$0xff] }
 0x21b   :  { %5997 = vmatpush1.bf16.msra.mxu1 %v5996_v21  ;;  %v2303_v21 = vld [vmem:[%s12151_s3 + $0x4a8] sm:$0xff]  ;;  %v2658_v27 = vld [vmem:[%s12151_s3 + $0xfc0] sm:$0xff] }
 0x21c   :  { %v10147_v44 = vadd.f32 %v4651_v25, %v1934_v26  ;;  %5999 = vmatprep.subr.bf16.mxu1 %v5998_v28  ;;  %v6014_v26 = vpack.c.bf16 %v2666_v14, %v2659_v16  ;;  %v2665_v28 = vld [vmem:[%s12151_s3 + $0xff8] sm:$0xff]  ;;  %v6108_v30 = vpack.c.bf16 %v2303_v21, %v2296_v17  ;;  %v2722_v10 = vld [vmem:[%s12151_s3 + $0x11c0] sm:$0xff]  ;;  %v2359_v16 = vld [vmem:[%s12151_s3 + $0x668] sm:$0xff]  ;;  %v6028_v17 = vpack.c.bf16 %v2707_v63, %v2700_v49 }
 0x21d   :  { %6093 = vmatpush1.bf16.msra.mxu0 %v6092_v33  ;;  %v2680_v33 = vld [vmem:[%s12151_s3 + $0x1070] sm:$0xff]  ;;  %v6016_v37 = vpack.c.bf16 %v2665_v28, %v2658_v27  ;;  %v2367_v14 = vld [vmem:[%s12151_s3 + $0x6a8] sm:$0xff]  ;;  %v2714_v32 = vld [vmem:[%s12151_s3 + $0x1180] sm:$0xff] }
 0x21e   :  { %3017 = vmatmul.mubr.f32.vlgmr.msra.gmra.mrb[10].mxu1 %v10145_v43  ;;  %6095 = vmatprep.subr.bf16.mxu0 %v6094_v35  ;;  %v2325_v35 = vld [vmem:[%s12151_s3 + $0x558] sm:$0xff]  ;;  %v6018_v25 = vpack.c.bf16 %v2680_v33, %v2673_v31  ;;  %v2366_v33 = vld [vmem:[%s12151_s3 + $0x6a0] sm:$0xff]  ;;  %v2763_v49 = vld [vmem:[%s12151_s3 + $0x1308] sm:$0xff] }
 0x21f   :  { %6001 = vmatpush1.bf16.msra.mxu1 %v6000_v42  ;;  %v6112_v42 = vpack.c.bf16 %v2317_v0, %v2310_v38  ;;  %v6114_v47 = vpack.c.bf16 %v2332_v36, %v2325_v35  ;;  %v2729_v28 = vld [vmem:[%s12151_s3 + $0x11f8] sm:$0xff]  ;;  %v2388_v35 = vld [vmem:[%s12151_s3 + $0x750] sm:$0xff] }
 0x220   :  { %6003 = vmatprep.subr.bf16.mxu1 %v6002_v45  ;;  %v2687_v45 = vld [vmem:[%s12151_s3 + $0x10a8] sm:$0xff]  ;;  %v2381_v0 = vld [vmem:[%s12151_s3 + $0x718] sm:$0xff] }
 0x221   :  { %6097 = vmatpush1.bf16.msra.mxu0 %v6096_v48  ;;  %v2324_v48 = vld [vmem:[%s12151_s3 + $0x550] sm:$0xff]  ;;  %v6022_v54 = vpack.c.bf16 %v2694_v46, %v2687_v45  ;;  %v2743_v45 = vld [vmem:[%s12151_s3 + $0x1268] sm:$0xff]  ;;  %v6130_v46 = vpack.c.bf16 %v2388_v35, %v2381_v0 }
 0x222   :  { %6099 = vmatprep.subr.bf16.mxu0 %v6098_v52  ;;  %v2346_v52 = vld [vmem:[%s12151_s3 + $0x600] sm:$0xff]  ;;  %v2784_v0 = vld [vmem:[%s12151_s3 + $0x13b0] sm:$0xff]  ;;  %v2791_v35 = vld [vmem:[%s12151_s3 + $0x13e8] sm:$0xff] }
 0x223   :  { %6005 = vmatpush1.bf16.msra.mxu1 %v6004_v24  ;;  %v6116_v24 = vpack.c.bf16 %v2331_v50, %v2324_v48  ;;  %v6118_v3 = vpack.c.bf16 %v2346_v52, %v2339_v51  ;;  %v2387_v48 = vld [vmem:[%s12151_s3 + $0x748] sm:$0xff]  ;;  %v2402_v51 = vld [vmem:[%s12151_s3 + $0x7c0] sm:$0xff]  ;;  %v6036_v52 = vpack.c.bf16 %v2735_v41, %v2728_v40 }
 0x224   :  { %6007 = vmatprep.subr.bf16.mxu1 %v6006_v1  ;;  %v2701_v1 = vld [vmem:[%s12151_s3 + $0x1118] sm:$0xff]  ;;  %v2395_v50 = vld [vmem:[%s12151_s3 + $0x788] sm:$0xff]  ;;  %v2806_v40 = vld [vmem:[%s12151_s3 + $0x1460] sm:$0xff] }
 0x225   :  { %6101 = vmatpush1.bf16.msra.mxu0 %v6100_v55  ;;  %v2338_v55 = vld [vmem:[%s12151_s3 + $0x5c0] sm:$0xff]  ;;  %v6026_v7 = vpack.c.bf16 %v2708_v2, %v2701_v1  ;;  %v2764_v1 = vld [vmem:[%s12151_s3 + $0x1310] sm:$0xff]  ;;  %v6134_v2 = vpack.c.bf16 %v2402_v51, %v2395_v50 }
 0x226   :  { %6103 = vmatprep.subr.bf16.mxu0 %v6102_v5  ;;  %v2360_v5 = vld [vmem:[%s12151_s3 + $0x670] sm:$0xff] }
 0x227   :  { %6009 = vmatpush1.bf16.msra.mxu1 %v6008_v8  ;;  %v6120_v8 = vpack.c.bf16 %v2345_v29, %v2338_v55  ;;  %v6122_v12 = vpack.c.bf16 %v2360_v5, %v2353_v4  ;;  %v2401_v55 = vld [vmem:[%s12151_s3 + $0x7b8] sm:$0xff]  ;;  %v2416_v4 = vld [vmem:[%s12151_s3 + $0x830] sm:$0xff] }
 0x228   :  { %6011 = vmatprep.subr.bf16.mxu1 %v6010_v9  ;;  %v2715_v9 = vld [vmem:[%s12151_s3 + $0x1188] sm:$0xff]  ;;  %v2409_v29 = vld [vmem:[%s12151_s3 + $0x7f8] sm:$0xff] }
 0x229   :  { %6105 = vmatpush1.bf16.msra.mxu0 %v6104_v13  ;;  %v2352_v13 = vld [vmem:[%s12151_s3 + $0x630] sm:$0xff]  ;;  %v6030_v22 = vpack.c.bf16 %v2722_v10, %v2715_v9  ;;  %v2778_v9 = vld [vmem:[%s12151_s3 + $0x1380] sm:$0xff]  ;;  %v6138_v10 = vpack.c.bf16 %v2416_v4, %v2409_v29  ;;  %v2479_v4 = vld [vmem:[%s12151_s3 + $0xa28] sm:$0xff] }
 0x22a   :  { %6107 = vmatprep.subr.bf16.mxu0 %v6106_v20  ;;  %v2374_v20 = vld [vmem:[%s12151_s3 + $0x6e0] sm:$0xff] }
 0x22b   :  { %6013 = vmatpush1.bf16.msra.mxu1 %v6012_v23  ;;  %v2721_v23 = vld [vmem:[%s12151_s3 + $0x11b8] sm:$0xff]  ;;  %v6126_v31 = vpack.c.bf16 %v2374_v20, %v2367_v14  ;;  %v2430_v14 = vld [vmem:[%s12151_s3 + $0x8a0] sm:$0xff] }
 0x22c   :  { %6015 = vmatprep.subr.bf16.mxu1 %v6014_v26  ;;  %v6124_v26 = vpack.c.bf16 %v2359_v16, %v2352_v13  ;;  %v6032_v36 = vpack.c.bf16 %v2721_v23, %v2714_v32  ;;  %v2415_v13 = vld [vmem:[%s12151_s3 + $0x828] sm:$0xff]  ;;  %v2785_v23 = vld [vmem:[%s12151_s3 + $0x13b8] sm:$0xff] }
 0x22d   :  { %6109 = vmatpush1.bf16.msra.mxu0 %v6108_v30  ;;  %v2736_v30 = vld [vmem:[%s12151_s3 + $0x1230] sm:$0xff]  ;;  %v2423_v16 = vld [vmem:[%s12151_s3 + $0x868] sm:$0xff] }
 0x22e   :  { %6111 = vmatprep.subr.bf16.mxu0 %v6110_v34  ;;  %v2373_v34 = vld [vmem:[%s12151_s3 + $0x6d8] sm:$0xff] }
 0x22f   :  { %6017 = vmatpush1.bf16.msra.mxu1 %v6016_v37 }
 0x230   :  { %6019 = vmatprep.subr.bf16.mxu1 %v6018_v25  ;;  %v6034_v25 = vpack.c.bf16 %v2736_v30, %v2729_v28  ;;  %v2422_v28 = vld [vmem:[%s12151_s3 + $0x860] sm:$0xff]  ;;  %v2429_v30 = vld [vmem:[%s12151_s3 + $0x898] sm:$0xff] }
 0x231   :  { %6113 = vmatpush1.bf16.msra.mxu0 %v6112_v42  ;;  %v6128_v42 = vpack.c.bf16 %v2373_v34, %v2366_v33  ;;  %v2444_v33 = vld [vmem:[%s12151_s3 + $0x910] sm:$0xff] }
 0x232   :  { %6115 = vmatprep.subr.bf16.mxu0 %v6114_v47  ;;  %v2380_v47 = vld [vmem:[%s12151_s3 + $0x710] sm:$0xff] }
 0x233   :  { %6021 = vmatpush1.bf16.msra.mxu1 %v6020_v39  ;;  %v6132_v59 = vpack.c.bf16 %v2387_v48, %v2380_v47  ;;  %v6052_v47 = vpack.c.bf16 %v2791_v35, %v2784_v0  ;;  %v2506_v35 = vld [vmem:[%s12151_s3 + $0xb00] sm:$0xff] }
 0x234   :  { %6023 = vmatprep.subr.bf16.mxu1 %v6022_v54  ;;  %v2742_v54 = vld [vmem:[%s12151_s3 + $0x1260] sm:$0xff] }
 0x235   :  { %6117 = vmatpush1.bf16.msra.mxu0 %v6116_v24  ;;  %v2757_v24 = vld [vmem:[%s12151_s3 + $0x12d8] sm:$0xff]  ;;  %v6040_v5 = vpack.c.bf16 %v2749_v58, %v2742_v54  ;;  %v2472_v58 = vld [vmem:[%s12151_s3 + $0x9f0] sm:$0xff] }
 0x236   :  { %6119 = vmatprep.subr.bf16.mxu0 %v6118_v3  ;;  %v2394_v3 = vld [vmem:[%s12151_s3 + $0x780] sm:$0xff]  ;;  %v2465_v54 = vld [vmem:[%s12151_s3 + $0x9b8] sm:$0xff] }
 0x237   :  { %6025 = vmatpush1.bf16.msra.mxu1 %v6024_v6  ;;  %v6042_v6 = vpack.c.bf16 %v2764_v1, %v2757_v24  ;;  %v6136_v63 = vpack.c.bf16 %v2401_v55, %v2394_v3  ;;  %v2798_v24 = vld [vmem:[%s12151_s3 + $0x1420] sm:$0xff]  ;;  %v2805_v1 = vld [vmem:[%s12151_s3 + $0x1458] sm:$0xff]  ;;  %v2464_v3 = vld [vmem:[%s12151_s3 + $0x9b0] sm:$0xff] }
 0x238   :  { %v4684_v21 = vpop.f32.mrb[6].mxu1  ;;  %6027 = vmatprep.subr.bf16.mxu1 %v6026_v7  ;;  %v2756_v7 = vld [vmem:[%s12151_s3 + $0x12d0] sm:$0xff]  ;;  %v2471_v55 = vld [vmem:[%s12151_s3 + $0x9e8] sm:$0xff]  ;;  %v6056_v29 = vpack.c.bf16 %v2805_v1, %v2798_v24 }
 0x239   :  { %6121 = vmatpush1.bf16.msra.mxu0 %v6120_v8  ;;  %v4685_v27 = vpop.f32.mrb[7].mxu1  ;;  %v2771_v8 = vld [vmem:[%s12151_s3 + $0x1348] sm:$0xff]  ;;  %v6044_v20 = vpack.c.bf16 %v2763_v49, %v2756_v7  ;;  %v2813_v7 = vld [vmem:[%s12151_s3 + $0x1498] sm:$0xff]  ;;  %v2820_v49 = vld [vmem:[%s12151_s3 + $0x14d0] sm:$0xff] }
 0x23a   :  { %6123 = vmatprep.subr.bf16.mxu0 %v6122_v12  ;;  %v4686_v38 = vadd.f32 %v4685_v27, %v4684_v21  ;;  %v2408_v12 = vld [vmem:[%s12151_s3 + $0x7f0] sm:$0xff]  ;;  %v2770_v21 = vld [vmem:[%s12151_s3 + $0x1340] sm:$0xff]  ;;  %v6142_v27 = vpack.c.bf16 %v2430_v14, %v2423_v16  ;;  %v2485_v14 = vld [vmem:[%s12151_s3 + $0xa58] sm:$0xff] }
 0x23b   :  { %6029 = vmatpush1.bf16.msra.mxu1 %v6028_v17  ;;  %v6046_v17 = vpack.c.bf16 %v2778_v9, %v2771_v8  ;;  %v6140_v32 = vpack.c.bf16 %v2415_v13, %v2408_v12  ;;  %v6058_v9 = vpack.c.bf16 %v2820_v49, %v2813_v7  ;;  %v2819_v12 = vld [vmem:[%s12151_s3 + $0x14c8] sm:$0xff]  ;;  %v2478_v16 = vld [vmem:[%s12151_s3 + $0xa20] sm:$0xff]  ;;  %v2548_v24 = vld [vmem:[%s12151_s3 + $0xc50] sm:$0xff] }
 0x23c   :  { %v10343_v37 = vadd.f32 %v4686_v38, %v10147_v44  ;;  %6031 = vmatprep.subr.bf16.mxu1 %v6030_v22  ;;  %v2750_v44 = vld [vmem:[%s12151_s3 + $0x12a0] sm:$0xff]  ;;  %v2777_v22 = vld [vmem:[%s12151_s3 + $0x1378] sm:$0xff]  ;;  %v2555_v1 = vld [vmem:[%s12151_s3 + $0xc88] sm:$0xff] }
 0x23d   :  { %6125 = vmatpush1.bf16.msra.mxu0 %v6124_v26  ;;  %v6038_v39 = vpack.c.bf16 %v2750_v44, %v2743_v45  ;;  %v2792_v26 = vld [vmem:[%s12151_s3 + $0x13f0] sm:$0xff]  ;;  %v6048_v34 = vpack.c.bf16 %v2777_v22, %v2770_v21  ;;  %v2443_v45 = vld [vmem:[%s12151_s3 + $0x908] sm:$0xff]  ;;  %v2493_v21 = vld [vmem:[%s12151_s3 + $0xa98] sm:$0xff] }
 0x23e   :  { %6127 = vmatprep.subr.bf16.mxu0 %v6126_v31  ;;  %v2437_v31 = vld [vmem:[%s12151_s3 + $0x8d8] sm:$0xff]  ;;  %v6050_v38 = vpack.c.bf16 %v2792_v26, %v2785_v23  ;;  %v2451_v44 = vld [vmem:[%s12151_s3 + $0x948] sm:$0xff]  ;;  %v2500_v22 = vld [vmem:[%s12151_s3 + $0xad0] sm:$0xff]  ;;  %v6160_v23 = vpack.c.bf16 %v2485_v14, %v2478_v16 }
 0x23f   :  { %6033 = vmatpush1.bf16.msra.mxu1 %v6032_v36  ;;  %v6144_v36 = vpack.c.bf16 %v2429_v30, %v2422_v28  ;;  %v6146_v41 = vpack.c.bf16 %v2444_v33, %v2437_v31  ;;  %v2492_v26 = vld [vmem:[%s12151_s3 + $0xa90] sm:$0xff]  ;;  %v2499_v28 = vld [vmem:[%s12151_s3 + $0xac8] sm:$0xff]  ;;  %v2514_v33 = vld [vmem:[%s12151_s3 + $0xb40] sm:$0xff] }
 0x240   :  { %6035 = vmatprep.subr.bf16.mxu1 %v6034_v25  ;;  %v2799_v25 = vld [vmem:[%s12151_s3 + $0x1428] sm:$0xff]  ;;  %v2584_v7 = vld [vmem:[%s12151_s3 + $0xd70] sm:$0xff]  ;;  %v2590_v14 = vld [vmem:[%s12151_s3 + $0xda0] sm:$0xff] }
 0x241   :  { %6129 = vmatpush1.bf16.msra.mxu0 %v6128_v42  ;;  %v2436_v42 = vld [vmem:[%s12151_s3 + $0x8d0] sm:$0xff]  ;;  %v6054_v48 = vpack.c.bf16 %v2806_v40, %v2799_v25  ;;  %v2827_v30 = vld [vmem:[%s12151_s3 + $0x1508] sm:$0xff]  ;;  %v2521_v25 = vld [vmem:[%s12151_s3 + $0xb78] sm:$0xff] }
 0x242   :  { %6131 = vmatprep.subr.bf16.mxu0 %v6130_v46  ;;  %v2458_v46 = vld [vmem:[%s12151_s3 + $0x980] sm:$0xff]  ;;  %v6148_v50 = vpack.c.bf16 %v2443_v45, %v2436_v42  ;;  %v2507_v31 = vld [vmem:[%s12151_s3 + $0xb08] sm:$0xff]  ;;  %v2528_v40 = vld [vmem:[%s12151_s3 + $0xbb0] sm:$0xff] }
 0x243   :  { %6037 = vmatpush1.bf16.msra.mxu1 %v6036_v52  ;;  %v6150_v51 = vpack.c.bf16 %v2458_v46, %v2451_v44  ;;  %v2450_v52 = vld [vmem:[%s12151_s3 + $0x940] sm:$0xff]  ;;  %v6166_v0 = vpack.c.bf16 %v2514_v33, %v2507_v31  ;;  %v6170_v42 = vpack.c.bf16 %v2528_v40, %v2521_v25  ;;  %v2520_v45 = vld [vmem:[%s12151_s3 + $0xb70] sm:$0xff]  ;;  %v2527_v44 = vld [vmem:[%s12151_s3 + $0xba8] sm:$0xff] }
 0x244   :  { %3230 = vmatmul.mubr.f32.vlgmr.msra.gmra.mrb[4].mxu0 %v9740_v57  ;;  %6039 = vmatprep.subr.bf16.mxu1 %v6038_v39  ;;  %v2457_v39 = vld [vmem:[%s12151_s3 + $0x978] sm:$0xff]  ;;  %v2535_v46 = vld [vmem:[%s12151_s3 + $0xbe8] sm:$0xff]  ;;  %v2618_v33 = vld [vmem:[%s12151_s3 + $0xe80] sm:$0xff] }
 0x245   :  { %6133 = vmatpush1.bf16.msra.mxu0 %v6132_v59  ;;  %3300 = vmatprep.mubr.f32.mxu0 %v9748_v60  ;;  %v6152_v59 = vpack.c.bf16 %v2457_v39, %v2450_v52  ;;  %v2541_v52 = vld [vmem:[%s12151_s3 + $0xc18] sm:$0xff]  ;;  %v2632_v25 = vld [vmem:[%s12151_s3 + $0xef0] sm:$0xff]  ;;  %v2639_v40 = vld [vmem:[%s12151_s3 + $0xf28] sm:$0xff] }
 0x246   :  { %6135 = vmatprep.subr.bf16.mxu0 %v6134_v2  ;;  %v6154_v2 = vpack.c.bf16 %v2472_v58, %v2465_v54  ;;  %v2549_v39 = vld [vmem:[%s12151_s3 + $0xc58] sm:$0xff]  ;;  %v2556_v54 = vld [vmem:[%s12151_s3 + $0xc90] sm:$0xff] }
 0x247   :  { %6041 = vmatpush1.bf16.msra.mxu1 %v6040_v5  ;;  %v2486_v5 = vld [vmem:[%s12151_s3 + $0xa60] sm:$0xff] }
 0x248   :  { %6043 = vmatprep.subr.bf16.mxu1 %v6042_v6  ;;  %v6158_v13 = vpack.c.bf16 %v2486_v5, %v2479_v4  ;;  %v2562_v4 = vld [vmem:[%s12151_s3 + $0xcc0] sm:$0xff]  ;;  %v2569_v5 = vld [vmem:[%s12151_s3 + $0xcf8] sm:$0xff] }
 0x249   :  { %6137 = vmatpush1.bf16.msra.mxu0 %v6136_v63  ;;  %v6156_v63 = vpack.c.bf16 %v2471_v55, %v2464_v3  ;;  %v2570_v3 = vld [vmem:[%s12151_s3 + $0xd00] sm:$0xff]  ;;  %v6180_v55 = vpack.c.bf16 %v2555_v1, %v2548_v24  ;;  %v6184_v49 = vpack.c.bf16 %v2569_v5, %v2562_v4 }
 0x24a   :  { %6139 = vmatprep.subr.bf16.mxu0 %v6138_v10  ;;  %v2812_v10 = vld [vmem:[%s12151_s3 + $0x1490] sm:$0xff] }
 0x24b   :  { %6045 = vmatpush1.bf16.msra.mxu1 %v6044_v20 }
 0x24c   :  { %6047 = vmatprep.subr.bf16.mxu1 %v6046_v17  ;;  %v6060_v17 = vpack.c.bf16 %v2819_v12, %v2812_v10  ;;  %v2591_v10 = vld [vmem:[%s12151_s3 + $0xda8] sm:$0xff]  ;;  %v2598_v12 = vld [vmem:[%s12151_s3 + $0xde0] sm:$0xff] }
 0x24d   :  { %6141 = vmatpush1.bf16.msra.mxu0 %v6140_v32  ;;  %v6190_v16 = vpack.c.bf16 %v2598_v12, %v2591_v10  ;;  %v2702_v10 = vld [vmem:[%s12151_s3 + $0x1120] sm:$0xff]  ;;  %v2709_v12 = vld [vmem:[%s12151_s3 + $0x1158] sm:$0xff] }
 0x24e   :  { %6143 = vmatprep.subr.bf16.mxu0 %v6142_v27  ;;  %v6162_v27 = vpack.c.bf16 %v2500_v22, %v2493_v21  ;;  %v2612_v21 = vld [vmem:[%s12151_s3 + $0xe50] sm:$0xff] }
 0x24f   :  { %6049 = vmatpush1.bf16.msra.mxu1 %v6048_v34 }
 0x250   :  { %6051 = vmatprep.subr.bf16.mxu1 %v6050_v38  ;;  %v6164_v38 = vpack.c.bf16 %v2499_v28, %v2492_v26  ;;  %v2604_v26 = vld [vmem:[%s12151_s3 + $0xe10] sm:$0xff]  ;;  %v2619_v28 = vld [vmem:[%s12151_s3 + $0xe88] sm:$0xff] }
 0x251   :  { %6145 = vmatpush1.bf16.msra.mxu0 %v6144_v36  ;;  %v2513_v36 = vld [vmem:[%s12151_s3 + $0xb38] sm:$0xff] }
 0x252   :  { %6147 = vmatprep.subr.bf16.mxu0 %v6146_v41  ;;  %v6168_v41 = vpack.c.bf16 %v2513_v36, %v2506_v35 }
 0x253   :  { %6053 = vmatpush1.bf16.msra.mxu1 %v6052_v47  ;;  %v2542_v47 = vld [vmem:[%s12151_s3 + $0xc20] sm:$0xff] }
 0x254   :  { %6055 = vmatprep.subr.bf16.mxu1 %v6054_v48  ;;  %v6172_v48 = vpack.c.bf16 %v2527_v44, %v2520_v45  ;;  %v6204_v45 = vpack.c.bf16 %v2639_v40, %v2632_v25 }
 0x255   :  { %6149 = vmatpush1.bf16.msra.mxu0 %v6148_v50  ;;  %v6174_v50 = vpack.c.bf16 %v2542_v47, %v2535_v46  ;;  %v2646_v46 = vld [vmem:[%s12151_s3 + $0xf60] sm:$0xff]  ;;  %v2653_v47 = vld [vmem:[%s12151_s3 + $0xf98] sm:$0xff] }
 0x256   :  { %6151 = vmatprep.subr.bf16.mxu0 %v6150_v51  ;;  %v2534_v51 = vld [vmem:[%s12151_s3 + $0xbe0] sm:$0xff] }
 0x257   :  { %6057 = vmatpush1.bf16.msra.mxu1 %v6056_v29  ;;  %v6176_v58 = vpack.c.bf16 %v2541_v52, %v2534_v51  ;;  %v6208_v51 = vpack.c.bf16 %v2653_v47, %v2646_v46 }
 0x258   :  { %v4719_v6 = vpop.f32.mrb[8].mxu1  ;;  %6059 = vmatprep.subr.bf16.mxu1 %v6058_v9  ;;  %v2583_v9 = vld [vmem:[%s12151_s3 + $0xd68] sm:$0xff] }
 0x259   :  { %6153 = vmatpush1.bf16.msra.mxu0 %v6152_v59  ;;  %v4720_v8 = vpop.f32.mrb[9].mxu1  ;;  %v6178_v59 = vpack.c.bf16 %v2556_v54, %v2549_v39  ;;  %v2660_v39 = vld [vmem:[%s12151_s3 + $0xfd0] sm:$0xff]  ;;  %v2667_v54 = vld [vmem:[%s12151_s3 + $0x1008] sm:$0xff] }
 0x25a   :  { %6155 = vmatprep.subr.bf16.mxu0 %v6154_v2  ;;  %v4721_v20 = vadd.f32 %v4720_v8, %v4719_v6  ;;  %v2563_v2 = vld [vmem:[%s12151_s3 + $0xcc8] sm:$0xff]  ;;  %v2577_v6 = vld [vmem:[%s12151_s3 + $0xd38] sm:$0xff]  ;;  %v2576_v8 = vld [vmem:[%s12151_s3 + $0xd30] sm:$0xff]  ;;  %v6212_v24 = vpack.c.bf16 %v2667_v54, %v2660_v39 }
 0x25b   :  { %6061 = vmatpush1.bf16.msra.mxu1 %v6060_v17  ;;  %v6182_v29 = vpack.c.bf16 %v2570_v3, %v2563_v2  ;;  %v2605_v17 = vld [vmem:[%s12151_s3 + $0xe18] sm:$0xff]  ;;  %v2674_v2 = vld [vmem:[%s12151_s3 + $0x1040] sm:$0xff] }
 0x25c   :  { %v10522_v32 = vadd.f32 %v4721_v20, %v10343_v37  ;;  %v2834_v37 = vld [vmem:[%s12151_s3 + $0x1540] sm:$0xff]  ;;  %v2597_v20 = vld [vmem:[%s12151_s3 + $0xdd8] sm:$0xff] }
 0x25d   :  { %6157 = vmatpush1.bf16.msra.mxu0 %v6156_v63  ;;  %v6062_v34 = vpack.c.bf16 %v2834_v37, %v2827_v30  ;;  %v6186_v63 = vpack.c.bf16 %v2584_v7, %v2577_v6  ;;  %v6192_v22 = vpack.c.bf16 %v2597_v20, %v2590_v14  ;;  %v2626_v30 = vld [vmem:[%s12151_s3 + $0xec0] sm:$0xff]  ;;  %v2681_v3 = vld [vmem:[%s12151_s3 + $0x1078] sm:$0xff]  ;;  %v2688_v6 = vld [vmem:[%s12151_s3 + $0x10b0] sm:$0xff]  ;;  %v6224_v14 = vpack.c.bf16 %v2709_v12, %v2702_v10 }
 0x25e   :  { %6159 = vmatprep.subr.bf16.mxu0 %v6158_v13  ;;  %v6188_v13 = vpack.c.bf16 %v2583_v9, %v2576_v8  ;;  %v6198_v31 = vpack.c.bf16 %v2626_v30, %v2619_v28  ;;  %v6216_v4 = vpack.c.bf16 %v2681_v3, %v2674_v2  ;;  %v2695_v7 = vld [vmem:[%s12151_s3 + $0x10e8] sm:$0xff]  ;;  %v2730_v28 = vld [vmem:[%s12151_s3 + $0x1200] sm:$0xff]  ;;  %v2737_v30 = vld [vmem:[%s12151_s3 + $0x1238] sm:$0xff] }
 0x25f   :  { %6063 = vmatprep.subr.bf16.mxu1 %v6062_v34  ;;  %v2625_v34 = vld [vmem:[%s12151_s3 + $0xeb8] sm:$0xff]  ;;  %v6220_v8 = vpack.c.bf16 %v2695_v7, %v2688_v6 }
 0x260   :  { %v6200_v35 = vpack.c.bf16 %v2625_v34, %v2618_v33  ;;  %v6232_v33 = vpack.c.bf16 %v2737_v30, %v2730_v28  ;;  %v2826_v28 = vld [vmem:[%s12151_s3 + $0x1500] sm:$0xff]  ;;  %v2833_v30 = vld [vmem:[%s12151_s3 + $0x1538] sm:$0xff] }
 0x261   :  { %6161 = vmatpush1.bf16.msra.mxu0 %v6160_v23  ;;  %v6194_v23 = vpack.c.bf16 %v2612_v21, %v2605_v17  ;;  %v2716_v17 = vld [vmem:[%s12151_s3 + $0x1190] sm:$0xff]  ;;  %v2723_v21 = vld [vmem:[%s12151_s3 + $0x11c8] sm:$0xff] }
 0x262   :  { %6163 = vmatprep.subr.bf16.mxu0 %v6162_v27  ;;  %v2611_v27 = vld [vmem:[%s12151_s3 + $0xe48] sm:$0xff] }
 0x263   :  { %v6196_v37 = vpack.c.bf16 %v2611_v27, %v2604_v26  ;;  %v6228_v26 = vpack.c.bf16 %v2723_v21, %v2716_v17 }
 0x265   :  { %6165 = vmatpush1.bf16.msra.mxu0 %v6164_v38  ;;  %v2633_v38 = vld [vmem:[%s12151_s3 + $0xef8] sm:$0xff] }
 0x266   :  { %6167 = vmatprep.subr.bf16.mxu0 %v6166_v0  ;;  %v2640_v0 = vld [vmem:[%s12151_s3 + $0xf30] sm:$0xff] }
 0x267   :  { %v6202_v36 = vpack.c.bf16 %v2640_v0, %v2633_v38  ;;  %v2744_v38 = vld [vmem:[%s12151_s3 + $0x1270] sm:$0xff]  ;;  %v2751_v0 = vld [vmem:[%s12151_s3 + $0x12a8] sm:$0xff] }
 0x268   :  { %v6236_v25 = vpack.c.bf16 %v2751_v0, %v2744_v38  ;;  %v2836_v38 = vld [vmem:[%s12151_s3 + $0x1550] sm:$0xff] }
 0x269   :  { %6169 = vmatpush1.bf16.msra.mxu0 %v6168_v41  ;;  %v2647_v41 = vld [vmem:[%s12151_s3 + $0xf68] sm:$0xff] }
 0x26a   :  { %6171 = vmatprep.subr.bf16.mxu0 %v6170_v42  ;;  %v2654_v42 = vld [vmem:[%s12151_s3 + $0xfa0] sm:$0xff] }
 0x26b   :  { %v6206_v44 = vpack.c.bf16 %v2654_v42, %v2647_v41  ;;  %v2758_v41 = vld [vmem:[%s12151_s3 + $0x12e0] sm:$0xff]  ;;  %v2765_v42 = vld [vmem:[%s12151_s3 + $0x1318] sm:$0xff] }
 0x26c   :  { %v6240_v46 = vpack.c.bf16 %v2765_v42, %v2758_v41  ;;  %v2174_v41 = vld [vmem:[%s12151_s3 + $0xa0] sm:$0xff]  ;;  %v2181_v42 = vld [vmem:[%s12151_s3 + $0xd8] sm:$0xff] }
 0x26d   :  { %6173 = vmatpush1.bf16.msra.mxu0 %v6172_v48  ;;  %v2661_v48 = vld [vmem:[%s12151_s3 + $0xfd8] sm:$0xff] }
 0x26e   :  { %6175 = vmatprep.subr.bf16.mxu0 %v6174_v50  ;;  %v2668_v50 = vld [vmem:[%s12151_s3 + $0x1010] sm:$0xff] }
 0x26f   :  { %v6210_v52 = vpack.c.bf16 %v2668_v50, %v2661_v48  ;;  %v2772_v48 = vld [vmem:[%s12151_s3 + $0x1350] sm:$0xff]  ;;  %v2779_v50 = vld [vmem:[%s12151_s3 + $0x1388] sm:$0xff] }
 0x270   :  { %v6244_v39 = vpack.c.bf16 %v2779_v50, %v2772_v48  ;;  %v2828_v48 = vld [vmem:[%s12151_s3 + $0x1510] sm:$0xff] }
 0x271   :  { %6177 = vmatpush1.bf16.msra.mxu0 %v6176_v58  ;;  %v2675_v58 = vld [vmem:[%s12151_s3 + $0x1048] sm:$0xff] }
 0x272   :  { %6179 = vmatprep.subr.bf16.mxu0 %v6178_v59  ;;  %v2682_v59 = vld [vmem:[%s12151_s3 + $0x1080] sm:$0xff] }
 0x273   :  { %v6214_v1 = vpack.c.bf16 %v2682_v59, %v2675_v58  ;;  %v2786_v58 = vld [vmem:[%s12151_s3 + $0x13c0] sm:$0xff]  ;;  %v2793_v59 = vld [vmem:[%s12151_s3 + $0x13f8] sm:$0xff] }
 0x274   :  { %v6248_v2 = vpack.c.bf16 %v2793_v59, %v2786_v58  ;;  %v2159_v58 = vld [vmem:[%s12151_s3 + $0x28] sm:$0xff]  ;;  %v2166_v59 = vld [vmem:[%s12151_s3 + $0x60] sm:$0xff] }
 0x275   :  { %6181 = vmatpush1.bf16.msra.mxu0 %v6180_v55  ;;  %v2689_v55 = vld [vmem:[%s12151_s3 + $0x10b8] sm:$0xff] }
 0x276   :  { %6183 = vmatprep.subr.bf16.mxu0 %v6182_v29  ;;  %v2696_v29 = vld [vmem:[%s12151_s3 + $0x10f0] sm:$0xff] }
 0x277   :  { %v6218_v5 = vpack.c.bf16 %v2696_v29, %v2689_v55  ;;  %v2800_v55 = vld [vmem:[%s12151_s3 + $0x1430] sm:$0xff]  ;;  %v2807_v29 = vld [vmem:[%s12151_s3 + $0x1468] sm:$0xff] }
 0x278   :  { %v6252_v6 = vpack.c.bf16 %v2807_v29, %v2800_v55  ;;  %v2158_v55 = vld [vmem:[%s12151_s3 + $0x20] sm:$0xff]  ;;  %v10902_v29 = vmax.f32 %v10522_v32, 0.0  ;;  %v2173_v32 = vld [vmem:[%s12151_s3 + $0x98] sm:$0xff] }
 0x279   :  { %6185 = vmatpush1.bf16.msra.mxu0 %v6184_v49  ;;  %v2703_v49 = vld [vmem:[%s12151_s3 + $0x1128] sm:$0xff] }
 0x27a   :  { %6187 = vmatprep.subr.bf16.mxu0 %v6186_v63  ;;  %v2710_v63 = vld [vmem:[%s12151_s3 + $0x1160] sm:$0xff] }
 0x27b   :  { %v6222_v9 = vpack.c.bf16 %v2710_v63, %v2703_v49  ;;  %v2814_v49 = vld [vmem:[%s12151_s3 + $0x14a0] sm:$0xff]  ;;  %v2821_v63 = vld [vmem:[%s12151_s3 + $0x14d8] sm:$0xff] }
 0x27c   :  { %v6256_v10 = vpack.c.bf16 %v2821_v63, %v2814_v49  ;;  %v2180_v63 = vld [vmem:[%s12151_s3 + $0xd0] sm:$0xff] }
 0x27d   :  { %6189 = vmatpush1.bf16.msra.mxu0 %v6188_v13  ;;  %v2717_v13 = vld [vmem:[%s12151_s3 + $0x1198] sm:$0xff] }
 0x27e   :  { %6191 = vmatprep.subr.bf16.mxu0 %v6190_v16  ;;  %v2724_v16 = vld [vmem:[%s12151_s3 + $0x11d0] sm:$0xff] }
 0x27f   :  { %v6226_v20 = vpack.c.bf16 %v2724_v16, %v2717_v13  ;;  %v954_v13 = vsub.s32 4, %v7083_v61  ;;  %v958_v16 = vsub.s32 5, %v7083_v61 }
 0x281   :  { %6193 = vmatpush1.bf16.msra.mxu0 %v6192_v22  ;;  %v2731_v22 = vld [vmem:[%s12151_s3 + $0x1208] sm:$0xff] }
 0x282   :  { %6195 = vmatprep.subr.bf16.mxu0 %v6194_v23  ;;  %v2738_v23 = vld [vmem:[%s12151_s3 + $0x1240] sm:$0xff] }
 0x283   :  { %v6230_v27 = vpack.c.bf16 %v2738_v23, %v2731_v22  ;;  %v2160_v22 = vld [vmem:[%s12151_s3 + $0x30] sm:$0xff] }
 0x284   :  { %3301 = vmatmul.mubr.f32.vlgmr.msra.gmra.mrb[4].mxu0 %v10145_v43 }
 0x285   :  { %6197 = vmatpush1.bf16.msra.mxu0 %v6196_v37  ;;  %v2745_v37 = vld [vmem:[%s12151_s3 + $0x1278] sm:$0xff] }
 0x286   :  { %6199 = vmatprep.subr.bf16.mxu0 %v6198_v31  ;;  %v2752_v31 = vld [vmem:[%s12151_s3 + $0x12b0] sm:$0xff] }
 0x287   :  { %v6234_v34 = vpack.c.bf16 %v2752_v31, %v2745_v37  ;;  %v2286_v31 = vld [vmem:[%s12151_s3 + $0x420] sm:$0xff] }
 0x289   :  { %6201 = vmatpush1.bf16.msra.mxu0 %v6200_v35  ;;  %v2759_v35 = vld [vmem:[%s12151_s3 + $0x12e8] sm:$0xff] }
 0x28a   :  { %6203 = vmatprep.subr.bf16.mxu0 %v6202_v36  ;;  %v2766_v36 = vld [vmem:[%s12151_s3 + $0x1320] sm:$0xff] }
 0x28b   :  { %v6238_v40 = vpack.c.bf16 %v2766_v36, %v2759_v35  ;;  %v6064_v36 = vpack.c.bf16 %v2833_v30, %v2826_v28  ;;  %v2342_v28 = vld [vmem:[%s12151_s3 + $0x5e0] sm:$0xff]  ;;  %v2349_v30 = vld [vmem:[%s12151_s3 + $0x618] sm:$0xff] }
 0x28d   :  { %6205 = vmatpush1.bf16.msra.mxu0 %v6204_v45  ;;  %v2773_v45 = vld [vmem:[%s12151_s3 + $0x1358] sm:$0xff] }
 0x28e   :  { %6207 = vmatprep.subr.bf16.mxu0 %v6206_v44  ;;  %v2780_v44 = vld [vmem:[%s12151_s3 + $0x1390] sm:$0xff] }
 0x28f   :  { %v6242_v47 = vpack.c.bf16 %v2780_v44, %v2773_v45  ;;  %v2300_v44 = vld [vmem:[%s12151_s3 + $0x490] sm:$0xff] }
 0x291   :  { %6209 = vmatpush1.bf16.msra.mxu0 %v6208_v51  ;;  %v2787_v51 = vld [vmem:[%s12151_s3 + $0x13c8] sm:$0xff] }
 0x292   :  { %6211 = vmatprep.subr.bf16.mxu0 %v6210_v52  ;;  %v2794_v52 = vld [vmem:[%s12151_s3 + $0x1400] sm:$0xff] }
 0x293   :  { %v6246_v54 = vpack.c.bf16 %v2794_v52, %v2787_v51  ;;  %v2835_v51 = vld [vmem:[%s12151_s3 + $0x1548] sm:$0xff]  ;;  %v2188_v52 = vld [vmem:[%s12151_s3 + $0x110] sm:$0xff] }
 0x295   :  { %6213 = vmatpush1.bf16.msra.mxu0 %v6212_v24  ;;  %v2801_v24 = vld [vmem:[%s12151_s3 + $0x1438] sm:$0xff] }
 0x296   :  { %6215 = vmatprep.subr.bf16.mxu0 %v6214_v1  ;;  %v2808_v1 = vld [vmem:[%s12151_s3 + $0x1470] sm:$0xff] }
 0x297   :  { %v6250_v3 = vpack.c.bf16 %v2808_v1, %v2801_v24  ;;  %v2314_v24 = vld [vmem:[%s12151_s3 + $0x500] sm:$0xff]  ;;  %v2321_v1 = vld [vmem:[%s12151_s3 + $0x538] sm:$0xff] }
 0x298   :  { %v6470_v49 = vpack.c.bf16 %v2321_v1, %v2314_v24  ;;  %v2370_v24 = vld [vmem:[%s12151_s3 + $0x6c0] sm:$0xff]  ;;  %v2377_v1 = vld [vmem:[%s12151_s3 + $0x6f8] sm:$0xff] }
 0x299   :  { %6217 = vmatpush1.bf16.msra.mxu0 %v6216_v4  ;;  %v2815_v4 = vld [vmem:[%s12151_s3 + $0x14a8] sm:$0xff] }
 0x29a   :  { %6219 = vmatprep.subr.bf16.mxu0 %v6218_v5  ;;  %v2822_v5 = vld [vmem:[%s12151_s3 + $0x14e0] sm:$0xff] }
 0x29b   :  { %v6254_v7 = vpack.c.bf16 %v2822_v5, %v2815_v4  ;;  %v6262_v4 = vpack.c.bf16 %v2166_v59, %v2159_v58  ;;  %v2165_v5 = vld [vmem:[%s12151_s3 + $0x58] sm:$0xff]  ;;  %v2215_v58 = vld [vmem:[%s12151_s3 + $0x1e8] sm:$0xff]  ;;  %v2222_v59 = vld [vmem:[%s12151_s3 + $0x220] sm:$0xff] }
 0x29d   :  { %6221 = vmatpush1.bf16.msra.mxu0 %v6220_v8  ;;  %v2272_v8 = vld [vmem:[%s12151_s3 + $0x3b0] sm:$0xff] }
 0x29e   :  { %6223 = vmatprep.subr.bf16.mxu0 %v6222_v9  ;;  %v2279_v9 = vld [vmem:[%s12151_s3 + $0x3e8] sm:$0xff] }
 0x29f   :  { %v6458_v12 = vpack.c.bf16 %v2279_v9, %v2272_v8  ;;  %v2328_v8 = vld [vmem:[%s12151_s3 + $0x570] sm:$0xff]  ;;  %v2335_v9 = vld [vmem:[%s12151_s3 + $0x5a8] sm:$0xff] }
 0x2a1   :  { %6225 = vmatpush1.bf16.msra.mxu0 %v6224_v14  ;;  %v6721_v14 = vld [vmem:[%s12150_s2] sm:$0x7f] }
 0x2a2   :  { %6227 = vmatprep.subr.bf16.mxu0 %v6226_v20  ;;  %v955_v20 = vrot.slane %v6721_v14, %v954_v13  ;;  %v959_v17 = vrot.slane %v6721_v14, %v958_v16  ;;  %v2172_v14 = vld [vmem:[%s12151_s3 + $0x90] sm:$0xff] }
 0x2a5   :  { %6229 = vmatpush1.bf16.msra.mxu0 %v6228_v26 }
 0x2a6   :  { %6231 = vmatprep.subr.bf16.mxu0 %v6230_v27  ;;  %v2167_v27 = vld [vmem:[%s12151_s3 + $0x68] sm:$0xff] }
 0x2a7   :  { %v6460_v35 = vpack.c.bf16 %v2167_v27, %v2160_v22  ;;  %v2223_v22 = vld [vmem:[%s12151_s3 + $0x228] sm:$0xff]  ;;  %v2194_v27 = vld [vmem:[%s12151_s3 + $0x140] sm:$0xff] }
 0x2a9   :  { %6233 = vmatpush1.bf16.msra.mxu0 %v6232_v33  ;;  %v2293_v33 = vld [vmem:[%s12151_s3 + $0x458] sm:$0xff] }
 0x2aa   :  { %6235 = vmatprep.subr.bf16.mxu0 %v6234_v34  ;;  %v2829_v34 = vld [vmem:[%s12151_s3 + $0x1518] sm:$0xff] }
 0x2ab   :  { %v6258_v45 = vpack.c.bf16 %v2836_v38, %v2829_v34  ;;  %v2193_v34 = vld [vmem:[%s12151_s3 + $0x138] sm:$0xff] }
 0x2ad   :  { %6237 = vmatpush1.bf16.msra.mxu0 %v6236_v25 }
 0x2ae   :  { %6239 = vmatprep.subr.bf16.mxu0 %v6238_v40  ;;  %v6462_v40 = vpack.c.bf16 %v2293_v33, %v2286_v31  ;;  %v2186_v33 = vld [vmem:[%s12151_s3 + $0x100] sm:$0xff] }
 0x2b1   :  { %6241 = vmatpush1.bf16.msra.mxu0 %v6240_v46  ;;  %v2307_v46 = vld [vmem:[%s12151_s3 + $0x4c8] sm:$0xff] }
 0x2b2   :  { %6243 = vmatprep.subr.bf16.mxu0 %v6242_v47  ;;  %v6464_v47 = vpack.c.bf16 %v2181_v42, %v2174_v41  ;;  %v6466_v50 = vpack.c.bf16 %v2307_v46, %v2300_v44  ;;  %v2201_v41 = vld [vmem:[%s12151_s3 + $0x178] sm:$0xff]  ;;  %v2356_v42 = vld [vmem:[%s12151_s3 + $0x650] sm:$0xff]  ;;  %v6272_v44 = vpack.c.bf16 %v2193_v34, %v2186_v33  ;;  %v2242_v33 = vld [vmem:[%s12151_s3 + $0x2c0] sm:$0xff] }
 0x2b3   :  { %v2249_v34 = vld [vmem:[%s12151_s3 + $0x2f8] sm:$0xff] }
 0x2b5   :  { %6245 = vmatpush1.bf16.msra.mxu0 %v6244_v39  ;;  %v2195_v39 = vld [vmem:[%s12151_s3 + $0x148] sm:$0xff] }
 0x2b6   :  { %6247 = vmatprep.subr.bf16.mxu0 %v6246_v54  ;;  %v6771_v54 = vmov 0.0  }
 0x2b9   :  { %6249 = vmatpush1.bf16.msra.mxu0 %v6248_v2  ;;  %v6260_v2 = vpack.c.bf16 %v2835_v51, %v2828_v48  ;;  %v2207_v48 = vld [vmem:[%s12151_s3 + $0x1a8] sm:$0xff] }
 0x2ba   :  { %6251 = vmatprep.subr.bf16.mxu0 %v6250_v3  ;;  %v6468_v3 = vpack.c.bf16 %v2195_v39, %v2188_v52  ;;  %v2244_v52 = vld [vmem:[%s12151_s3 + $0x2d0] sm:$0xff]  ;;  %v2251_v39 = vld [vmem:[%s12151_s3 + $0x308] sm:$0xff] }
 0x2bd   :  { %6253 = vmatpush1.bf16.msra.mxu0 %v6252_v6  ;;  %v2202_v6 = vld [vmem:[%s12151_s3 + $0x180] sm:$0xff] }
 0x2be   :  { %6255 = vmatprep.subr.bf16.mxu0 %v6254_v7  ;;  %v2209_v7 = vld [vmem:[%s12151_s3 + $0x1b8] sm:$0xff] }
 0x2c1   :  { %6257 = vmatpush1.bf16.msra.mxu0 %v6256_v10  ;;  %v6264_v10 = vpack.c.bf16 %v2165_v5, %v2158_v55  ;;  %v2214_v55 = vld [vmem:[%s12151_s3 + $0x1e0] sm:$0xff]  ;;  %v6278_v5 = vpack.c.bf16 %v2222_v59, %v2215_v58  ;;  %v2271_v58 = vld [vmem:[%s12151_s3 + $0x3a8] sm:$0xff] }
 0x2c2   :  { %6459 = vmatprep.subr.bf16.mxu0 %v6458_v12  ;;  %v6472_v12 = vpack.c.bf16 %v2209_v7, %v2202_v6  ;;  %v6486_v6 = vpack.c.bf16 %v2377_v1, %v2370_v24  ;;  %v2258_v7 = vld [vmem:[%s12151_s3 + $0x340] sm:$0xff]  ;;  %v2545_v1 = vld [vmem:[%s12151_s3 + $0xc38] sm:$0xff] }
 0x2c3   :  { %v2278_v59 = vld [vmem:[%s12151_s3 + $0x3e0] sm:$0xff] }
 0x2c4   :  { %v2538_v24 = vld [vmem:[%s12151_s3 + $0xc00] sm:$0xff] }
 0x2d7   :  { %v1862_v21 = vpop.f32.mrb[2].mxu0 }
 0x2d8   :  { %v6669_v23 = vadd.f32 %v1862_v21, %v955_v20  ;;  %v1864_v26 = vpop.f32.mrb[3].mxu0  ;;  %v2179_v20 = vld [vmem:[%s12151_s3 + $0xc8] sm:$0xff]  ;;  %v2216_v21 = vld [vmem:[%s12151_s3 + $0x1f0] sm:$0xff] }
 0x2d9   :  { %v6670_v37 = vadd.f32 %v1864_v26, %v959_v17  ;;  %v6266_v17 = vpack.c.bf16 %v2180_v63, %v2173_v32  ;;  %v6474_v26 = vpack.c.bf16 %v2335_v9, %v2328_v8  ;;  %v6476_v31 = vpack.c.bf16 %v2223_v22, %v2216_v21  ;;  %v2229_v32 = vld [vmem:[%s12151_s3 + $0x258] sm:$0xff]  ;;  %v2236_v63 = vld [vmem:[%s12151_s3 + $0x290] sm:$0xff]  ;;  %v2503_v9 = vld [vmem:[%s12151_s3 + $0xae8] sm:$0xff] }
 0x2da   :  { %v10854_v25 = vmax.f32 %v6669_v23, 0.0  ;;  %v2187_v23 = vld [vmem:[%s12151_s3 + $0x108] sm:$0xff]  ;;  %v2496_v8 = vld [vmem:[%s12151_s3 + $0xab0] sm:$0xff] }
 0x2db   :  { %v10852_v0 = vmax.f32 %v6670_v37, 0.0  ;;  %v6268_v37 = vpack.c.bf16 %v2179_v20, %v2172_v14  ;;  %v6270_v38 = vpack.c.bf16 %v2194_v27, %v2187_v23  ;;  %v2228_v14 = vld [vmem:[%s12151_s3 + $0x250] sm:$0xff]  ;;  %v6282_v20 = vpack.c.bf16 %v2236_v63, %v2229_v32  ;;  %v2235_v21 = vld [vmem:[%s12151_s3 + $0x288] sm:$0xff]  ;;  %v2250_v27 = vld [vmem:[%s12151_s3 + $0x300] sm:$0xff] }
 0x2dc   :  { %v2384_v22 = vld [vmem:[%s12151_s3 + $0x730] sm:$0xff]  ;;  %v2391_v23 = vld [vmem:[%s12151_s3 + $0x768] sm:$0xff]  ;;  %v2285_v32 = vld [vmem:[%s12151_s3 + $0x418] sm:$0xff] }
 0x2dd   :  { %3087 = vmatprep.mubr.f32.mxu1 %v10852_v0  ;;  %3371 = vmatprep.mubr.f32.mxu0 %v10852_v0  ;;  %v2292_v63 = vld [vmem:[%s12151_s3 + $0x450] sm:$0xff] }
 0x2de   :  { %3088 = vmatmul.mubr.f32.vlgmr.msra.gmra.mrb[10].mxu1 %v10854_v25  ;;  %3372 = vmatmul.mubr.f32.vlgmr.msra.gmra.mrb[4].mxu0 %v10854_v25 }
 0x2df   :  { %6461 = vmatpush3.bf16.msra.mxu0 %v6460_v35  ;;  %6065 = vmatpush1.bf16.msra.mxu1 %v6064_v36  ;;  %v6478_v35 = vpack.c.bf16 %v2349_v30, %v2342_v28  ;;  %v2230_v36 = vld [vmem:[%s12151_s3 + $0x260] sm:$0xff]  ;;  %v2517_v30 = vld [vmem:[%s12151_s3 + $0xb58] sm:$0xff] }
 0x2e0   :  { %3797 = vmatprep.mubr.f32.mxu0 %v9732_v53  ;;  %6463 = vmatprep.subr.bf16.mxu0 %v6462_v40  ;;  %v2237_v40 = vld [vmem:[%s12151_s3 + $0x298] sm:$0xff]  ;;  %v2510_v28 = vld [vmem:[%s12151_s3 + $0xb20] sm:$0xff] }
 0x2e1   :  { %3158 = vmatprep.mubr.f32.mxu1 %v6771_v54  ;;  %6259 = vmatprep.subr.bf16.mxu1 %v6258_v45  ;;  %v2363_v45 = vld [vmem:[%s12151_s3 + $0x688] sm:$0xff]  ;;  %v6480_v46 = vpack.c.bf16 %v2237_v40, %v2230_v36  ;;  %v2405_v36 = vld [vmem:[%s12151_s3 + $0x7d8] sm:$0xff] }
 0x2e2   :  { %v6482_v51 = vpack.c.bf16 %v2363_v45, %v2356_v42  ;;  %v2257_v40 = vld [vmem:[%s12151_s3 + $0x338] sm:$0xff]  ;;  %v2524_v42 = vld [vmem:[%s12151_s3 + $0xb90] sm:$0xff]  ;;  %v2531_v45 = vld [vmem:[%s12151_s3 + $0xbc8] sm:$0xff] }
 0x2e3   :  { %6465 = vmatpush3.bf16.msra.mxu0 %v6464_v47  ;;  %v2200_v47 = vld [vmem:[%s12151_s3 + $0x170] sm:$0xff] }
 0x2e4   :  { %6467 = vmatprep.subr.bf16.mxu0 %v6466_v50 }
 0x2e6   :  { %4574 = vmatmul.mubr.msk.f32.vlgmr.msra.gmra.mrb[10].mxu1 %vm2877_vm0, %v10902_v29 }
 0x2e7   :  { %6261 = vmatpush1.bf16.msra.mxu1 %v6260_v2  ;;  %6469 = vmatpush3.bf16.msra.mxu0 %v6468_v3  ;;  %v6276_v2 = vpack.c.bf16 %v2207_v48, %v2200_v47  ;;  %v6484_v3 = vpack.c.bf16 %v2251_v39, %v2244_v52  ;;  %v2256_v47 = vld [vmem:[%s12151_s3 + $0x330] sm:$0xff]  ;;  %v2263_v48 = vld [vmem:[%s12151_s3 + $0x368] sm:$0xff] }
 0x2e8   :  { %3442 = vmatprep.mubr.f32.mxu1 %v6771_v54  ;;  %6263 = vmatprep.subr.bf16.mxu1 %v6262_v4  ;;  %v2221_v4 = vld [vmem:[%s12151_s3 + $0x218] sm:$0xff]  ;;  %v2412_v52 = vld [vmem:[%s12151_s3 + $0x810] sm:$0xff]  ;;  %v2419_v39 = vld [vmem:[%s12151_s3 + $0x848] sm:$0xff] }
 0x2e9   :  { %6471 = vmatprep.subr.bf16.mxu0 %v6470_v49  ;;  %v2265_v49 = vld [vmem:[%s12151_s3 + $0x378] sm:$0xff] }
 0x2ea   :  { %4575 = vmatmul.mubr.msk.f32.vlgmr.msra.gmra.mrb[12].mxu1 %vm2877_vm0, %v10902_v29 }
 0x2eb   :  { %6265 = vmatpush1.bf16.msra.mxu1 %v6264_v10  ;;  %6473 = vmatpush3.bf16.msra.mxu0 %v6472_v12  ;;  %v6280_v10 = vpack.c.bf16 %v2221_v4, %v2214_v55  ;;  %v6488_v12 = vpack.c.bf16 %v2265_v49, %v2258_v7  ;;  %v2270_v55 = vld [vmem:[%s12151_s3 + $0x3a0] sm:$0xff]  ;;  %v2277_v4 = vld [vmem:[%s12151_s3 + $0x3d8] sm:$0xff] }
 0x2ec   :  { %3513 = vmatprep.mubr.f32.mxu1 %v9732_v53  ;;  %6267 = vmatprep.subr.bf16.mxu1 %v6266_v17  ;;  %v2208_v53 = vld [vmem:[%s12151_s3 + $0x1b0] sm:$0xff]  ;;  %v6490_v17 = vpack.c.bf16 %v2503_v9, %v2496_v8  ;;  %v2426_v7 = vld [vmem:[%s12151_s3 + $0x880] sm:$0xff]  ;;  %v2433_v49 = vld [vmem:[%s12151_s3 + $0x8b8] sm:$0xff] }
 0x2ed   :  { %6475 = vmatprep.subr.bf16.mxu0 %v6474_v26  ;;  %v6274_v50 = vpack.c.bf16 %v2208_v53, %v2201_v41  ;;  %v2243_v26 = vld [vmem:[%s12151_s3 + $0x2c8] sm:$0xff]  ;;  %v6494_v41 = vpack.c.bf16 %v2517_v30, %v2510_v28  ;;  %v2264_v53 = vld [vmem:[%s12151_s3 + $0x370] sm:$0xff]  ;;  %v2566_v28 = vld [vmem:[%s12151_s3 + $0xce0] sm:$0xff] }
 0x2ee   :  { %v2552_v8 = vld [vmem:[%s12151_s3 + $0xc70] sm:$0xff]  ;;  %v2559_v9 = vld [vmem:[%s12151_s3 + $0xca8] sm:$0xff]  ;;  %v2573_v30 = vld [vmem:[%s12151_s3 + $0xd18] sm:$0xff] }
 0x2ef   :  { %6269 = vmatpush1.bf16.msra.mxu1 %v6268_v37  ;;  %6477 = vmatpush3.bf16.msra.mxu0 %v6476_v31  ;;  %v6284_v37 = vpack.c.bf16 %v2235_v21, %v2228_v14  ;;  %v6492_v31 = vpack.c.bf16 %v2391_v23, %v2384_v22  ;;  %v2284_v14 = vld [vmem:[%s12151_s3 + $0x410] sm:$0xff]  ;;  %v6506_v21 = vpack.c.bf16 %v2559_v9, %v2552_v8  ;;  %v2447_v23 = vld [vmem:[%s12151_s3 + $0x928] sm:$0xff] }
 0x2f0   :  { %6271 = vmatprep.subr.bf16.mxu1 %v6270_v38  ;;  %6479 = vmatprep.subr.bf16.mxu0 %v6478_v35  ;;  %v6286_v38 = vpack.c.bf16 %v2250_v27, %v2243_v26  ;;  %v2398_v35 = vld [vmem:[%s12151_s3 + $0x7a0] sm:$0xff]  ;;  %v2440_v22 = vld [vmem:[%s12151_s3 + $0x8f0] sm:$0xff]  ;;  %v2299_v26 = vld [vmem:[%s12151_s3 + $0x488] sm:$0xff] }
 0x2f1   :  { %v2306_v27 = vld [vmem:[%s12151_s3 + $0x4c0] sm:$0xff]  ;;  %v2720_v8 = vld [vmem:[%s12151_s3 + $0x11b0] sm:$0xff]  ;;  %v2727_v9 = vld [vmem:[%s12151_s3 + $0x11e8] sm:$0xff] }
 0x2f3   :  { %6273 = vmatpush1.bf16.msra.mxu1 %v6272_v44  ;;  %6481 = vmatpush3.bf16.msra.mxu0 %v6480_v46  ;;  %v6288_v44 = vpack.c.bf16 %v2249_v34, %v2242_v33  ;;  %v6496_v46 = vpack.c.bf16 %v2405_v36, %v2398_v35  ;;  %v2298_v33 = vld [vmem:[%s12151_s3 + $0x480] sm:$0xff]  ;;  %v2305_v34 = vld [vmem:[%s12151_s3 + $0x4b8] sm:$0xff]  ;;  %v6510_v35 = vpack.c.bf16 %v2573_v30, %v2566_v28 }
 0x2f4   :  { %6275 = vmatprep.subr.bf16.mxu1 %v6274_v50  ;;  %6483 = vmatprep.subr.bf16.mxu0 %v6482_v51  ;;  %v6290_v50 = vpack.c.bf16 %v2264_v53, %v2257_v40  ;;  %v6498_v51 = vpack.c.bf16 %v2531_v45, %v2524_v42  ;;  %v2454_v36 = vld [vmem:[%s12151_s3 + $0x960] sm:$0xff]  ;;  %v2461_v40 = vld [vmem:[%s12151_s3 + $0x998] sm:$0xff]  ;;  %v2320_v53 = vld [vmem:[%s12151_s3 + $0x530] sm:$0xff] }
 0x2f5   :  { %v2580_v42 = vld [vmem:[%s12151_s3 + $0xd50] sm:$0xff]  ;;  %v2587_v45 = vld [vmem:[%s12151_s3 + $0xd88] sm:$0xff]  ;;  %v2734_v28 = vld [vmem:[%s12151_s3 + $0x1220] sm:$0xff] }
 0x2f6   :  { %v2741_v30 = vld [vmem:[%s12151_s3 + $0x1258] sm:$0xff] }
 0x2f7   :  { %6277 = vmatpush1.bf16.msra.mxu1 %v6276_v2  ;;  %6485 = vmatpush3.bf16.msra.mxu0 %v6484_v3  ;;  %v6292_v2 = vpack.c.bf16 %v2263_v48, %v2256_v47  ;;  %v6500_v3 = vpack.c.bf16 %v2419_v39, %v2412_v52  ;;  %v2312_v47 = vld [vmem:[%s12151_s3 + $0x4f0] sm:$0xff]  ;;  %v2319_v48 = vld [vmem:[%s12151_s3 + $0x528] sm:$0xff] }
 0x2f8   :  { %6279 = vmatprep.subr.bf16.mxu1 %v6278_v5  ;;  %6487 = vmatprep.subr.bf16.mxu0 %v6486_v6  ;;  %v6294_v5 = vpack.c.bf16 %v2278_v59, %v2271_v58  ;;  %v6502_v6 = vpack.c.bf16 %v2545_v1, %v2538_v24  ;;  %v2468_v52 = vld [vmem:[%s12151_s3 + $0x9d0] sm:$0xff]  ;;  %v2475_v39 = vld [vmem:[%s12151_s3 + $0xa08] sm:$0xff]  ;;  %v2334_v59 = vld [vmem:[%s12151_s3 + $0x5a0] sm:$0xff] }
 0x2f9   :  { %v2327_v58 = vld [vmem:[%s12151_s3 + $0x568] sm:$0xff]  ;;  %v2594_v24 = vld [vmem:[%s12151_s3 + $0xdc0] sm:$0xff]  ;;  %v2601_v1 = vld [vmem:[%s12151_s3 + $0xdf8] sm:$0xff] }
 0x2fb   :  { %6281 = vmatpush1.bf16.msra.mxu1 %v6280_v10  ;;  %6489 = vmatpush3.bf16.msra.mxu0 %v6488_v12  ;;  %v6296_v10 = vpack.c.bf16 %v2277_v4, %v2270_v55  ;;  %v6504_v12 = vpack.c.bf16 %v2433_v49, %v2426_v7  ;;  %v2326_v55 = vld [vmem:[%s12151_s3 + $0x560] sm:$0xff]  ;;  %v2333_v4 = vld [vmem:[%s12151_s3 + $0x598] sm:$0xff] }
 0x2fc   :  { %6283 = vmatprep.subr.bf16.mxu1 %v6282_v20  ;;  %6491 = vmatprep.subr.bf16.mxu0 %v6490_v17  ;;  %v2291_v20 = vld [vmem:[%s12151_s3 + $0x448] sm:$0xff]  ;;  %v6298_v17 = vpack.c.bf16 %v2292_v63, %v2285_v32  ;;  %v2482_v7 = vld [vmem:[%s12151_s3 + $0xa40] sm:$0xff]  ;;  %v2489_v49 = vld [vmem:[%s12151_s3 + $0xa78] sm:$0xff] }
 0x2fd   :  { %v2341_v32 = vld [vmem:[%s12151_s3 + $0x5d8] sm:$0xff]  ;;  %v2348_v63 = vld [vmem:[%s12151_s3 + $0x610] sm:$0xff] }
 0x2fe   :  { %3798 = vmatmul.mubr.f32.vlgmr.msra.gmra.mrb[6].mxu0 %v9740_v57 }
 0x2ff   :  { %6285 = vmatpush1.bf16.msra.mxu1 %v6284_v37  ;;  %6493 = vmatpush3.bf16.msra.mxu0 %v6492_v31  ;;  %v6300_v37 = vpack.c.bf16 %v2291_v20, %v2284_v14  ;;  %v6508_v31 = vpack.c.bf16 %v2447_v23, %v2440_v22  ;;  %v2340_v14 = vld [vmem:[%s12151_s3 + $0x5d0] sm:$0xff]  ;;  %v6314_v20 = vpack.c.bf16 %v2348_v63, %v2341_v32  ;;  %v2615_v23 = vld [vmem:[%s12151_s3 + $0xe68] sm:$0xff]  ;;  %v2397_v32 = vld [vmem:[%s12151_s3 + $0x798] sm:$0xff] }
 0x300   :  { %3867 = vmatprep.mubr.f32.mxu0 %v9748_v60  ;;  %6287 = vmatprep.subr.bf16.mxu1 %v6286_v38  ;;  %v6302_v38 = vpack.c.bf16 %v2306_v27, %v2299_v26  ;;  %v2608_v22 = vld [vmem:[%s12151_s3 + $0xe30] sm:$0xff]  ;;  %v2355_v26 = vld [vmem:[%s12151_s3 + $0x648] sm:$0xff]  ;;  %v2362_v27 = vld [vmem:[%s12151_s3 + $0x680] sm:$0xff] }
 0x301   :  { %6495 = vmatprep.subr.bf16.mxu0 %v6494_v41  ;;  %v2313_v41 = vld [vmem:[%s12151_s3 + $0x4f8] sm:$0xff]  ;;  %v2404_v63 = vld [vmem:[%s12151_s3 + $0x7d0] sm:$0xff] }
 0x303   :  { %6289 = vmatpush1.bf16.msra.mxu1 %v6288_v44  ;;  %6497 = vmatpush3.bf16.msra.mxu0 %v6496_v46  ;;  %v6304_v44 = vpack.c.bf16 %v2305_v34, %v2298_v33  ;;  %v6512_v46 = vpack.c.bf16 %v2461_v40, %v2454_v36  ;;  %v2354_v33 = vld [vmem:[%s12151_s3 + $0x640] sm:$0xff]  ;;  %v2361_v34 = vld [vmem:[%s12151_s3 + $0x678] sm:$0xff] }
 0x304   :  { %6291 = vmatprep.subr.bf16.mxu1 %v6290_v50  ;;  %6499 = vmatprep.subr.bf16.mxu0 %v6498_v51  ;;  %v6306_v50 = vpack.c.bf16 %v2320_v53, %v2313_v41  ;;  %v6514_v51 = vpack.c.bf16 %v2587_v45, %v2580_v42  ;;  %v2629_v36 = vld [vmem:[%s12151_s3 + $0xed8] sm:$0xff]  ;;  %v6526_v41 = vpack.c.bf16 %v2741_v30, %v2734_v28  ;;  %v2376_v53 = vld [vmem:[%s12151_s3 + $0x6f0] sm:$0xff]  ;;  %v2755_v45 = vld [vmem:[%s12151_s3 + $0x12c8] sm:$0xff] }
 0x305   :  { %v2369_v40 = vld [vmem:[%s12151_s3 + $0x6b8] sm:$0xff]  ;;  %v2748_v42 = vld [vmem:[%s12151_s3 + $0x1290] sm:$0xff]  ;;  %v2790_v28 = vld [vmem:[%s12151_s3 + $0x13e0] sm:$0xff] }
 0x306   :  { %v2797_v30 = vld [vmem:[%s12151_s3 + $0x1418] sm:$0xff] }
 0x307   :  { %6293 = vmatpush1.bf16.msra.mxu1 %v6292_v2  ;;  %6501 = vmatpush3.bf16.msra.mxu0 %v6500_v3  ;;  %v6308_v2 = vpack.c.bf16 %v2319_v48, %v2312_v47  ;;  %v6516_v3 = vpack.c.bf16 %v2475_v39, %v2468_v52  ;;  %v2368_v47 = vld [vmem:[%s12151_s3 + $0x6b0] sm:$0xff]  ;;  %v2375_v48 = vld [vmem:[%s12151_s3 + $0x6e8] sm:$0xff] }
 0x308   :  { %6295 = vmatprep.subr.bf16.mxu1 %v6294_v5  ;;  %6503 = vmatprep.subr.bf16.mxu0 %v6502_v6  ;;  %v6310_v5 = vpack.c.bf16 %v2334_v59, %v2327_v58  ;;  %v6518_v6 = vpack.c.bf16 %v2601_v1, %v2594_v24  ;;  %v2636_v52 = vld [vmem:[%s12151_s3 + $0xf10] sm:$0xff]  ;;  %v2643_v39 = vld [vmem:[%s12151_s3 + $0xf48] sm:$0xff]  ;;  %v2390_v59 = vld [vmem:[%s12151_s3 + $0x760] sm:$0xff] }
 0x309   :  { %v2383_v58 = vld [vmem:[%s12151_s3 + $0x728] sm:$0xff]  ;;  %v2762_v24 = vld [vmem:[%s12151_s3 + $0x1300] sm:$0xff]  ;;  %v2769_v1 = vld [vmem:[%s12151_s3 + $0x1338] sm:$0xff] }
 0x30b   :  { %6297 = vmatpush1.bf16.msra.mxu1 %v6296_v10  ;;  %6505 = vmatpush3.bf16.msra.mxu0 %v6504_v12  ;;  %v6312_v10 = vpack.c.bf16 %v2333_v4, %v2326_v55  ;;  %v6520_v12 = vpack.c.bf16 %v2489_v49, %v2482_v7  ;;  %v6326_v55 = vpack.c.bf16 %v2390_v59, %v2383_v58  ;;  %v2650_v7 = vld [vmem:[%s12151_s3 + $0xf80] sm:$0xff]  ;;  %v2657_v49 = vld [vmem:[%s12151_s3 + $0xfb8] sm:$0xff] }
 0x30c   :  { %6299 = vmatprep.subr.bf16.mxu1 %v6298_v17  ;;  %6507 = vmatprep.subr.bf16.mxu0 %v6506_v21  ;;  %v6522_v17 = vpack.c.bf16 %v2727_v9, %v2720_v8  ;;  %v2347_v21 = vld [vmem:[%s12151_s3 + $0x608] sm:$0xff]  ;;  %v6534_v4 = vpack.c.bf16 %v2769_v1, %v2762_v24  ;;  %v2776_v8 = vld [vmem:[%s12151_s3 + $0x1370] sm:$0xff]  ;;  %v2818_v58 = vld [vmem:[%s12151_s3 + $0x14c0] sm:$0xff] }
 0x30d   :  { %v2783_v9 = vld [vmem:[%s12151_s3 + $0x13a8] sm:$0xff]  ;;  %v2825_v59 = vld [vmem:[%s12151_s3 + $0x14f8] sm:$0xff] }
 0x30f   :  { %6301 = vmatpush1.bf16.msra.mxu1 %v6300_v37  ;;  %6509 = vmatpush3.bf16.msra.mxu0 %v6508_v31  ;;  %v6316_v37 = vpack.c.bf16 %v2347_v21, %v2340_v14  ;;  %v6524_v31 = vpack.c.bf16 %v2615_v23, %v2608_v22  ;;  %v6330_v14 = vpack.c.bf16 %v2404_v63, %v2397_v32  ;;  %v2664_v21 = vld [vmem:[%s12151_s3 + $0xff0] sm:$0xff]  ;;  %v2671_v23 = vld [vmem:[%s12151_s3 + $0x1028] sm:$0xff]  ;;  %v4117_v32 = vld [vmem:[%s12153_s5 + $0x180] sm:$0xff] }
 0x310   :  { %6303 = vmatprep.subr.bf16.mxu1 %v6302_v38  ;;  %6511 = vmatprep.subr.bf16.mxu0 %v6510_v35  ;;  %v6318_v38 = vpack.c.bf16 %v2362_v27, %v2355_v26  ;;  %v2622_v35 = vld [vmem:[%s12151_s3 + $0xea0] sm:$0xff]  ;;  %v6538_v22 = vpack.c.bf16 %v2783_v9, %v2776_v8  ;;  %v2411_v26 = vld [vmem:[%s12151_s3 + $0x808] sm:$0xff] }
 0x311   :  { %v2418_v27 = vld [vmem:[%s12151_s3 + $0x840] sm:$0xff]  ;;  %v4118_v63 = vld [vmem:[%s12153_s5 + $0x188] sm:$0xff] }
 0x313   :  { %6305 = vmatpush1.bf16.msra.mxu1 %v6304_v44  ;;  %6513 = vmatpush3.bf16.msra.mxu0 %v6512_v46  ;;  %v6320_v44 = vpack.c.bf16 %v2361_v34, %v2354_v33  ;;  %v6528_v46 = vpack.c.bf16 %v2629_v36, %v2622_v35  ;;  %v6334_v33 = vpack.c.bf16 %v2418_v27, %v2411_v26  ;;  %v2417_v34 = vld [vmem:[%s12151_s3 + $0x838] sm:$0xff]  ;;  %v4119_v26 = vld [vmem:[%s12153_s5 + $0x190] sm:$0xff] }
 0x314   :  { %6307 = vmatprep.subr.bf16.mxu1 %v6306_v50  ;;  %6515 = vmatprep.subr.bf16.mxu0 %v6514_v51  ;;  %v6322_v50 = vpack.c.bf16 %v2376_v53, %v2369_v40  ;;  %v6530_v51 = vpack.c.bf16 %v2755_v45, %v2748_v42  ;;  %v6542_v35 = vpack.c.bf16 %v2797_v30, %v2790_v28  ;;  %v2425_v36 = vld [vmem:[%s12151_s3 + $0x878] sm:$0xff]  ;;  %v2432_v40 = vld [vmem:[%s12151_s3 + $0x8b0] sm:$0xff]  ;;  %v2811_v53 = vld [vmem:[%s12151_s3 + $0x1488] sm:$0xff] }
 0x315   :  { %v4120_v27 = vld [vmem:[%s12153_s5 + $0x198] sm:$0xff] }
 0x317   :  { %6309 = vmatpush1.bf16.msra.mxu1 %v6308_v2  ;;  %6517 = vmatpush3.bf16.msra.mxu0 %v6516_v3  ;;  %v6324_v2 = vpack.c.bf16 %v2375_v48, %v2368_v47  ;;  %v6532_v3 = vpack.c.bf16 %v2643_v39, %v2636_v52  ;;  %v2431_v47 = vld [vmem:[%s12151_s3 + $0x8a8] sm:$0xff]  ;;  %v2692_v48 = vld [vmem:[%s12151_s3 + $0x10d0] sm:$0xff]  ;;  %v2446_v39 = vld [vmem:[%s12151_s3 + $0x920] sm:$0xff] }
 0x318   :  { %6311 = vmatprep.subr.bf16.mxu1 %v6310_v5  ;;  %6519 = vmatprep.subr.bf16.mxu0 %v6518_v6  ;;  %v2382_v5 = vld [vmem:[%s12151_s3 + $0x720] sm:$0xff]  ;;  %v2389_v6 = vld [vmem:[%s12151_s3 + $0x758] sm:$0xff]  ;;  %v2439_v52 = vld [vmem:[%s12151_s3 + $0x8e8] sm:$0xff] }
 0x31b   :  { %6313 = vmatpush1.bf16.msra.mxu1 %v6312_v10  ;;  %6521 = vmatpush3.bf16.msra.mxu0 %v6520_v12  ;;  %v6328_v10 = vpack.c.bf16 %v2389_v6, %v2382_v5  ;;  %v6536_v12 = vpack.c.bf16 %v2657_v49, %v2650_v7  ;;  %v6550_v5 = vpack.c.bf16 %v2825_v59, %v2818_v58  ;;  %v2713_v6 = vld [vmem:[%s12151_s3 + $0x1178] sm:$0xff]  ;;  %v2460_v49 = vld [vmem:[%s12151_s3 + $0x990] sm:$0xff] }
 0x31c   :  { %6315 = vmatprep.subr.bf16.mxu1 %v6314_v20  ;;  %6523 = vmatprep.subr.bf16.mxu0 %v6522_v17  ;;  %v2396_v20 = vld [vmem:[%s12151_s3 + $0x790] sm:$0xff]  ;;  %v2403_v17 = vld [vmem:[%s12151_s3 + $0x7c8] sm:$0xff]  ;;  %v2453_v7 = vld [vmem:[%s12151_s3 + $0x958] sm:$0xff] }
 0x31e   :  { %3868 = vmatmul.mubr.f32.vlgmr.msra.gmra.mrb[8].mxu0 %v10145_v43 }
 0x31f   :  { %6317 = vmatpush1.bf16.msra.mxu1 %v6316_v37  ;;  %6525 = vmatpush3.bf16.msra.mxu0 %v6524_v31  ;;  %v6332_v37 = vpack.c.bf16 %v2403_v17, %v2396_v20  ;;  %v6540_v31 = vpack.c.bf16 %v2671_v23, %v2664_v21  ;;  %v2467_v20 = vld [vmem:[%s12151_s3 + $0x9c8] sm:$0xff]  ;;  %v2474_v17 = vld [vmem:[%s12151_s3 + $0xa00] sm:$0xff]  ;;  %v6589_v21 = vpack.c.bf16 %v4118_v63, %v4117_v32 }
 0x320   :  { %3937 = vmatprep.mubr.f32.mxu0 %v10852_v0  ;;  %6319 = vmatprep.subr.bf16.mxu1 %v6318_v38  ;;  %v2678_v38 = vld [vmem:[%s12151_s3 + $0x1060] sm:$0xff]  ;;  %v4102_v23 = vld [vmem:[%s12153_s5 + $0x108] sm:$0xff]  ;;  %v6350_v30 = vpack.c.bf16 %v2474_v17, %v2467_v20 }
 0x321   :  { %6527 = vmatprep.subr.bf16.mxu0 %v6526_v41  ;;  %v2804_v41 = vld [vmem:[%s12151_s3 + $0x1450] sm:$0xff]  ;;  %v4109_v17 = vld [vmem:[%s12153_s5 + $0x140] sm:$0xff] }
 0x323   :  { %6321 = vmatpush1.bf16.msra.mxu1 %v6320_v44  ;;  %6529 = vmatpush3.bf16.msra.mxu0 %v6528_v46  ;;  %v6338_v44 = vpack.c.bf16 %v2432_v40, %v2425_v36  ;;  %v2424_v46 = vld [vmem:[%s12151_s3 + $0x870] sm:$0xff]  ;;  %v4121_v36 = vld [vmem:[%s12153_s5 + $0x1a0] sm:$0xff]  ;;  %v4122_v40 = vld [vmem:[%s12153_s5 + $0x1a8] sm:$0xff] }
 0x324   :  { %6323 = vmatprep.subr.bf16.mxu1 %v6322_v50  ;;  %6531 = vmatprep.subr.bf16.mxu0 %v6530_v51  ;;  %v6546_v50 = vpack.c.bf16 %v2811_v53, %v2804_v41  ;;  %v2699_v51 = vld [vmem:[%s12151_s3 + $0x1108] sm:$0xff]  ;;  %v6340_v24 = vpack.c.bf16 %v2431_v47, %v2424_v46  ;;  %v2502_v47 = vld [vmem:[%s12151_s3 + $0xae0] sm:$0xff] }
 0x325   :  { %v6548_v1 = vpack.c.bf16 %v2699_v51, %v2692_v48  ;;  %v6597_v48 = vpack.c.bf16 %v4122_v40, %v4121_v36  ;;  %v4106_v51 = vld [vmem:[%s12153_s5 + $0x128] sm:$0xff] }
 0x327   :  { %6325 = vmatpush1.bf16.msra.mxu1 %v6324_v2  ;;  %6533 = vmatpush3.bf16.msra.mxu0 %v6532_v3  ;;  %v6342_v2 = vpack.c.bf16 %v2446_v39, %v2439_v52  ;;  %v2438_v3 = vld [vmem:[%s12151_s3 + $0x8e0] sm:$0xff]  ;;  %v4123_v52 = vld [vmem:[%s12153_s5 + $0x1b0] sm:$0xff]  ;;  %v4124_v39 = vld [vmem:[%s12153_s5 + $0x1b8] sm:$0xff] }
 0x328   :  { %6327 = vmatprep.subr.bf16.mxu1 %v6326_v55  ;;  %6535 = vmatprep.subr.bf16.mxu0 %v6534_v4  ;;  %v2445_v55 = vld [vmem:[%s12151_s3 + $0x918] sm:$0xff]  ;;  %v2706_v4 = vld [vmem:[%s12151_s3 + $0x1140] sm:$0xff] }
 0x329   :  { %v6344_v8 = vpack.c.bf16 %v2445_v55, %v2438_v3  ;;  %v6552_v9 = vpack.c.bf16 %v2713_v6, %v2706_v4  ;;  %v2516_v55 = vld [vmem:[%s12151_s3 + $0xb50] sm:$0xff]  ;;  %v6601_v4 = vpack.c.bf16 %v4124_v39, %v4123_v52  ;;  %v4108_v6 = vld [vmem:[%s12153_s5 + $0x138] sm:$0xff] }
 0x32a   :  { %3514 = vmatmul.mubr.f32.vlgmr.msra.gmra.mrb[14].mxu1 %v9740_v57  ;;  %v2410_v57 = vld [vmem:[%s12151_s3 + $0x800] sm:$0xff] }
 0x32b   :  { %6329 = vmatpush1.bf16.msra.mxu1 %v6328_v10  ;;  %3584 = vmatprep.mubr.f32.mxu1 %v9748_v60  ;;  %v2685_v60 = vld [vmem:[%s12151_s3 + $0x1098] sm:$0xff]  ;;  %v6336_v42 = vpack.c.bf16 %v2417_v34, %v2410_v57  ;;  %v6346_v10 = vpack.c.bf16 %v2460_v49, %v2453_v7  ;;  %v2488_v34 = vld [vmem:[%s12151_s3 + $0xa70] sm:$0xff]  ;;  %v4125_v7 = vld [vmem:[%s12153_s5 + $0x1c0] sm:$0xff] }
 0x32c   :  { %6537 = vmatpush3.bf16.msra.mxu0 %v6536_v12  ;;  %6331 = vmatprep.subr.bf16.mxu1 %v6330_v14  ;;  %v6544_v45 = vpack.c.bf16 %v2685_v60, %v2678_v38  ;;  %v2452_v12 = vld [vmem:[%s12151_s3 + $0x950] sm:$0xff]  ;;  %v2459_v14 = vld [vmem:[%s12151_s3 + $0x988] sm:$0xff]  ;;  %v6593_v38 = vpack.c.bf16 %v4120_v27, %v4119_v26  ;;  %v4104_v60 = vld [vmem:[%s12153_s5 + $0x118] sm:$0xff] }
 0x32d   :  { %6539 = vmatprep.subr.bf16.mxu0 %v6538_v22  ;;  %v4101_v22 = vld [vmem:[%s12153_s5 + $0x100] sm:$0xff]  ;;  %v6348_v28 = vpack.c.bf16 %v2459_v14, %v2452_v12  ;;  %v4126_v49 = vld [vmem:[%s12153_s5 + $0x1c8] sm:$0xff] }
 0x32e   :  { %v6591_v57 = vpack.c.bf16 %v4102_v23, %v4101_v22  ;;  %v2530_v14 = vld [vmem:[%s12151_s3 + $0xbc0] sm:$0xff]  ;;  %v6605_v20 = vpack.c.bf16 %v4126_v49, %v4125_v7  ;;  %v4127_v22 = vld [vmem:[%s12153_s5 + $0x1d0] sm:$0xff]  ;;  %v4128_v23 = vld [vmem:[%s12153_s5 + $0x1d8] sm:$0xff] }
 0x32f   :  { %6333 = vmatpush1.bf16.msra.mxu1 %v6332_v37  ;;  %v2466_v37 = vld [vmem:[%s12151_s3 + $0x9c0] sm:$0xff]  ;;  %v2564_v7 = vld [vmem:[%s12151_s3 + $0xcd0] sm:$0xff]  ;;  %v2571_v49 = vld [vmem:[%s12151_s3 + $0xd08] sm:$0xff] }
 0x330   :  { %6541 = vmatpush3.bf16.msra.mxu0 %v6540_v31  ;;  %6335 = vmatprep.subr.bf16.mxu1 %v6334_v33  ;;  %v2473_v31 = vld [vmem:[%s12151_s3 + $0x9f8] sm:$0xff] }
 0x331   :  { %6543 = vmatprep.subr.bf16.mxu0 %v6542_v35  ;;  %v2481_v33 = vld [vmem:[%s12151_s3 + $0xa38] sm:$0xff]  ;;  %v4103_v35 = vld [vmem:[%s12153_s5 + $0x110] sm:$0xff]  ;;  %v6352_v41 = vpack.c.bf16 %v2473_v31, %v2466_v37 }
 0x332   :  { %v6354_v53 = vpack.c.bf16 %v2488_v34, %v2481_v33  ;;  %v6595_v46 = vpack.c.bf16 %v4104_v60, %v4103_v35  ;;  %v2537_v37 = vld [vmem:[%s12151_s3 + $0xbf8] sm:$0xff]  ;;  %v2544_v33 = vld [vmem:[%s12151_s3 + $0xc30] sm:$0xff]  ;;  %v4129_v35 = vld [vmem:[%s12153_s5 + $0x1e0] sm:$0xff] }
 0x333   :  { %6337 = vmatpush1.bf16.msra.mxu1 %v6336_v42  ;;  %v2480_v42 = vld [vmem:[%s12151_s3 + $0xa30] sm:$0xff]  ;;  %v4130_v60 = vld [vmem:[%s12153_s5 + $0x1e8] sm:$0xff]  ;;  %v6370_v40 = vpack.c.bf16 %v2544_v33, %v2537_v37  ;;  %v2606_v33 = vld [vmem:[%s12151_s3 + $0xe20] sm:$0xff] }
 0x334   :  { %6545 = vmatpush3.bf16.msra.mxu0 %v6544_v45  ;;  %6339 = vmatprep.subr.bf16.mxu1 %v6338_v44  ;;  %v2487_v45 = vld [vmem:[%s12151_s3 + $0xa68] sm:$0xff]  ;;  %v4111_v34 = vld [vmem:[%s12153_s5 + $0x150] sm:$0xff] }
 0x335   :  { %6547 = vmatprep.subr.bf16.mxu0 %v6546_v50  ;;  %v2495_v44 = vld [vmem:[%s12151_s3 + $0xaa8] sm:$0xff]  ;;  %v4105_v50 = vld [vmem:[%s12153_s5 + $0x120] sm:$0xff]  ;;  %v6356_v58 = vpack.c.bf16 %v2487_v45, %v2480_v42 }
 0x336   :  { %v6358_v59 = vpack.c.bf16 %v2502_v47, %v2495_v44  ;;  %v6599_v3 = vpack.c.bf16 %v4106_v51, %v4105_v50  ;;  %v2551_v42 = vld [vmem:[%s12151_s3 + $0xc68] sm:$0xff]  ;;  %v2558_v44 = vld [vmem:[%s12151_s3 + $0xca0] sm:$0xff]  ;;  %v4131_v50 = vld [vmem:[%s12153_s5 + $0x1f0] sm:$0xff] }
 0x337   :  { %6341 = vmatpush1.bf16.msra.mxu1 %v6340_v24  ;;  %v2494_v24 = vld [vmem:[%s12151_s3 + $0xaa0] sm:$0xff]  ;;  %v4132_v51 = vld [vmem:[%s12153_s5 + $0x1f8] sm:$0xff]  ;;  %v6374_v39 = vpack.c.bf16 %v2558_v44, %v2551_v42 }
 0x338   :  { %6549 = vmatpush3.bf16.msra.mxu0 %v6548_v1  ;;  %6343 = vmatprep.subr.bf16.mxu1 %v6342_v2  ;;  %v2501_v1 = vld [vmem:[%s12151_s3 + $0xad8] sm:$0xff]  ;;  %v4113_v47 = vld [vmem:[%s12153_s5 + $0x160] sm:$0xff] }
 0x339   :  { %6551 = vmatprep.subr.bf16.mxu0 %v6550_v5  ;;  %v2509_v2 = vld [vmem:[%s12151_s3 + $0xb18] sm:$0xff]  ;;  %v4107_v5 = vld [vmem:[%s12153_s5 + $0x130] sm:$0xff]  ;;  %v6360_v32 = vpack.c.bf16 %v2501_v1, %v2494_v24  ;;  %v2634_v44 = vld [vmem:[%s12151_s3 + $0xf00] sm:$0xff] }
 0x33a   :  { %v6362_v63 = vpack.c.bf16 %v2516_v55, %v2509_v2  ;;  %v6603_v12 = vpack.c.bf16 %v4108_v6, %v4107_v5  ;;  %v2565_v24 = vld [vmem:[%s12151_s3 + $0xcd8] sm:$0xff]  ;;  %v2572_v2 = vld [vmem:[%s12151_s3 + $0xd10] sm:$0xff] }
 0x33b   :  { %6345 = vmatpush1.bf16.msra.mxu1 %v6344_v8  ;;  %v2508_v8 = vld [vmem:[%s12151_s3 + $0xb10] sm:$0xff]  ;;  %v6378_v6 = vpack.c.bf16 %v2572_v2, %v2565_v24  ;;  %v2662_v24 = vld [vmem:[%s12151_s3 + $0xfe0] sm:$0xff]  ;;  %v2677_v2 = vld [vmem:[%s12151_s3 + $0x1058] sm:$0xff] }
 0x33c   :  { %6553 = vmatpush3.bf16.msra.mxu0 %v6552_v9  ;;  %6347 = vmatprep.subr.bf16.mxu1 %v6346_v10  ;;  %v2515_v9 = vld [vmem:[%s12151_s3 + $0xb48] sm:$0xff]  ;;  %v4115_v55 = vld [vmem:[%s12153_s5 + $0x170] sm:$0xff] }
 0x33d   :  { %6590 = vmatprep.subr.bf16.mxu0 %v6589_v21  ;;  %v2523_v10 = vld [vmem:[%s12151_s3 + $0xb88] sm:$0xff]  ;;  %v6364_v26 = vpack.c.bf16 %v2515_v9, %v2508_v8  ;;  %v2586_v8 = vld [vmem:[%s12151_s3 + $0xd80] sm:$0xff]  ;;  %v6380_v9 = vpack.c.bf16 %v2571_v49, %v2564_v7 }
 0x33e   :  { %v4110_v21 = vld [vmem:[%s12153_s5 + $0x148] sm:$0xff]  ;;  %v6366_v27 = vpack.c.bf16 %v2530_v14, %v2523_v10  ;;  %v2585_v14 = vld [vmem:[%s12151_s3 + $0xd78] sm:$0xff]  ;;  %v2698_v49 = vld [vmem:[%s12151_s3 + $0x1100] sm:$0xff] }
 0x33f   :  { %3938 = vmatmul.mubr.f32.vlgmr.msra.gmra.mrb[10].mxu0 %v10854_v25  ;;  %6349 = vmatpush1.bf16.msra.mxu1 %v6348_v28  ;;  %v2522_v28 = vld [vmem:[%s12151_s3 + $0xb80] sm:$0xff]  ;;  %v6607_v31 = vpack.c.bf16 %v4110_v21, %v4109_v17  ;;  %v2600_v17 = vld [vmem:[%s12151_s3 + $0xdf0] sm:$0xff]  ;;  %v6772_v21 = vmov 0.0|0.0   ;;  %v2691_v7 = vld [vmem:[%s12151_s3 + $0x10c8] sm:$0xff] }
 0x340   :  { %6351 = vmatprep.subr.bf16.mxu1 %v6350_v30  ;;  %6592 = vmatpush3.bf16.msra.mxu0 %v6591_v57  ;;  %v2529_v30 = vld [vmem:[%s12151_s3 + $0xbb8] sm:$0xff]  ;;  %v6609_v57 = vpack.c.bf16 %v4128_v23, %v4127_v22 }
 0x341   :  { %6594 = vmatprep.subr.bf16.mxu0 %v6593_v38  ;;  %v4112_v38 = vld [vmem:[%s12153_s5 + $0x158] sm:$0xff]  ;;  %v6368_v36 = vpack.c.bf16 %v2529_v30, %v2522_v28  ;;  %v2607_v28 = vld [vmem:[%s12151_s3 + $0xe28] sm:$0xff]  ;;  %v2614_v30 = vld [vmem:[%s12151_s3 + $0xe60] sm:$0xff] }
 0x342   :  { %v6611_v45 = vpack.c.bf16 %v4112_v38, %v4111_v34  ;;  %v2621_v34 = vld [vmem:[%s12151_s3 + $0xe98] sm:$0xff]  ;;  %v2628_v38 = vld [vmem:[%s12151_s3 + $0xed0] sm:$0xff] }
 0x343   :  { %6353 = vmatpush1.bf16.msra.mxu1 %v6352_v41  ;;  %v2536_v41 = vld [vmem:[%s12151_s3 + $0xbf0] sm:$0xff] }
 0x344   :  { %6355 = vmatprep.subr.bf16.mxu1 %v6354_v53  ;;  %6596 = vmatpush3.bf16.msra.mxu0 %v6595_v46  ;;  %v2543_v53 = vld [vmem:[%s12151_s3 + $0xc28] sm:$0xff]  ;;  %v6613_v46 = vpack.c.bf16 %v4130_v60, %v4129_v35  ;;  %v6394_v60 = vpack.c.bf16 %v2628_v38, %v2621_v34  ;;  %v2732_v38 = vld [vmem:[%s12151_s3 + $0x1210] sm:$0xff] }
 0x345   :  { %6598 = vmatprep.subr.bf16.mxu0 %v6597_v48  ;;  %v4114_v48 = vld [vmem:[%s12153_s5 + $0x168] sm:$0xff]  ;;  %v6372_v52 = vpack.c.bf16 %v2543_v53, %v2536_v41  ;;  %v2642_v53 = vld [vmem:[%s12151_s3 + $0xf40] sm:$0xff] }
 0x346   :  { %v6615_v1 = vpack.c.bf16 %v4114_v48, %v4113_v47  ;;  %v2635_v41 = vld [vmem:[%s12151_s3 + $0xf08] sm:$0xff]  ;;  %v2649_v47 = vld [vmem:[%s12151_s3 + $0xf78] sm:$0xff] }
 0x347   :  { %6357 = vmatpush1.bf16.msra.mxu1 %v6356_v58  ;;  %v2550_v58 = vld [vmem:[%s12151_s3 + $0xc60] sm:$0xff] }
 0x348   :  { %6359 = vmatprep.subr.bf16.mxu1 %v6358_v59  ;;  %6600 = vmatpush3.bf16.msra.mxu0 %v6599_v3  ;;  %v2557_v59 = vld [vmem:[%s12151_s3 + $0xc98] sm:$0xff]  ;;  %v6617_v3 = vpack.c.bf16 %v4132_v51, %v4131_v50  ;;  %v2648_v50 = vld [vmem:[%s12151_s3 + $0xf70] sm:$0xff]  ;;  %v2655_v51 = vld [vmem:[%s12151_s3 + $0xfa8] sm:$0xff] }
 0x349   :  { %6602 = vmatprep.subr.bf16.mxu0 %v6601_v4  ;;  %v4116_v4 = vld [vmem:[%s12153_s5 + $0x178] sm:$0xff]  ;;  %v6376_v5 = vpack.c.bf16 %v2557_v59, %v2550_v58  ;;  %v6404_v58 = vpack.c.bf16 %v2655_v51, %v2648_v50  ;;  %v2782_v50 = vld [vmem:[%s12151_s3 + $0x13a0] sm:$0xff] }
 0x34b   :  { %6361 = vmatpush1.bf16.msra.mxu1 %v6360_v32  ;;  %v6619_v32 = vpack.c.bf16 %v4116_v4, %v4115_v55 }
 0x34c   :  { %6363 = vmatprep.subr.bf16.mxu1 %v6362_v63  ;;  %6604 = vmatpush3.bf16.msra.mxu0 %v6603_v12  ;;  %v2579_v63 = vld [vmem:[%s12151_s3 + $0xd48] sm:$0xff]  ;;  %v2578_v12 = vld [vmem:[%s12151_s3 + $0xd40] sm:$0xff] }
 0x34d   :  { %6606 = vmatprep.subr.bf16.mxu0 %v6605_v20  ;;  %v6382_v10 = vpack.c.bf16 %v2586_v8, %v2579_v63  ;;  %v2593_v20 = vld [vmem:[%s12151_s3 + $0xdb8] sm:$0xff]  ;;  %v6384_v22 = vpack.c.bf16 %v2585_v14, %v2578_v12  ;;  %v6414_v63 = vpack.c.bf16 %v2698_v49, %v2691_v7  ;;  %v2690_v8 = vld [vmem:[%s12151_s3 + $0x10c0] sm:$0xff]  ;;  %v2712_v12 = vld [vmem:[%s12151_s3 + $0x1170] sm:$0xff] }
 0x34e   :  { %v6386_v23 = vpack.c.bf16 %v2600_v17, %v2593_v20  ;;  %v2704_v17 = vld [vmem:[%s12151_s3 + $0x1130] sm:$0xff]  ;;  %v2802_v49 = vld [vmem:[%s12151_s3 + $0x1440] sm:$0xff] }
 0x34f   :  { %6365 = vmatpush1.bf16.msra.mxu1 %v6364_v26  ;;  %v2592_v26 = vld [vmem:[%s12151_s3 + $0xdb0] sm:$0xff] }
 0x350   :  { %6367 = vmatprep.subr.bf16.mxu1 %v6366_v27  ;;  %6608 = vmatpush3.bf16.msra.mxu0 %v6607_v31  ;;  %v2599_v27 = vld [vmem:[%s12151_s3 + $0xde8] sm:$0xff]  ;;  %v6390_v31 = vpack.c.bf16 %v2614_v30, %v2607_v28  ;;  %v2718_v30 = vld [vmem:[%s12151_s3 + $0x11a0] sm:$0xff] }
 0x351   :  { %6610 = vmatprep.subr.bf16.mxu0 %v6609_v57  ;;  %v6388_v37 = vpack.c.bf16 %v2599_v27, %v2592_v26  ;;  %v2613_v57 = vld [vmem:[%s12151_s3 + $0xe58] sm:$0xff]  ;;  %v2726_v26 = vld [vmem:[%s12151_s3 + $0x11e0] sm:$0xff] }
 0x352   :  { %v6392_v35 = vpack.c.bf16 %v2613_v57, %v2606_v33  ;;  %v2740_v33 = vld [vmem:[%s12151_s3 + $0x1250] sm:$0xff] }
 0x353   :  { %6369 = vmatpush1.bf16.msra.mxu1 %v6368_v36  ;;  %v2620_v36 = vld [vmem:[%s12151_s3 + $0xe90] sm:$0xff] }
 0x354   :  { %6371 = vmatprep.subr.bf16.mxu1 %v6370_v40  ;;  %6612 = vmatpush3.bf16.msra.mxu0 %v6611_v45  ;;  %v2627_v40 = vld [vmem:[%s12151_s3 + $0xec8] sm:$0xff]  ;;  %v6398_v45 = vpack.c.bf16 %v2642_v53, %v2635_v41  ;;  %v2746_v53 = vld [vmem:[%s12151_s3 + $0x1280] sm:$0xff] }
 0x355   :  { %6614 = vmatprep.subr.bf16.mxu0 %v6613_v46  ;;  %v6396_v42 = vpack.c.bf16 %v2627_v40, %v2620_v36  ;;  %v2641_v46 = vld [vmem:[%s12151_s3 + $0xf38] sm:$0xff]  ;;  %v2754_v36 = vld [vmem:[%s12151_s3 + $0x12c0] sm:$0xff] }
 0x357   :  { %6373 = vmatpush1.bf16.msra.mxu1 %v6372_v52  ;;  %v2663_v52 = vld [vmem:[%s12151_s3 + $0xfe8] sm:$0xff] }
 0x358   :  { %6375 = vmatprep.subr.bf16.mxu1 %v6374_v39  ;;  %6616 = vmatpush3.bf16.msra.mxu0 %v6615_v1  ;;  %v2670_v39 = vld [vmem:[%s12151_s3 + $0x1020] sm:$0xff]  ;;  %v2669_v1 = vld [vmem:[%s12151_s3 + $0x1018] sm:$0xff] }
 0x359   :  { %6618 = vmatprep.subr.bf16.mxu0 %v6617_v3  ;;  %v6406_v59 = vpack.c.bf16 %v2670_v39, %v2663_v52  ;;  %v2684_v3 = vld [vmem:[%s12151_s3 + $0x1090] sm:$0xff]  ;;  %v6408_v55 = vpack.c.bf16 %v2669_v1, %v2662_v24  ;;  %v2774_v39 = vld [vmem:[%s12151_s3 + $0x1360] sm:$0xff] }
 0x35a   :  { %v6410_v4 = vpack.c.bf16 %v2684_v3, %v2677_v2  ;;  %v2796_v24 = vld [vmem:[%s12151_s3 + $0x1410] sm:$0xff] }
 0x35b   :  { %6377 = vmatpush1.bf16.msra.mxu1 %v6376_v5  ;;  %v2676_v5 = vld [vmem:[%s12151_s3 + $0x1050] sm:$0xff] }
 0x35c   :  { %6379 = vmatprep.subr.bf16.mxu1 %v6378_v6  ;;  %6620 = vmatpush3.bf16.msra.mxu0 %v6619_v32  ;;  %v2683_v6 = vld [vmem:[%s12151_s3 + $0x1088] sm:$0xff]  ;;  %v2788_v3 = vld [vmem:[%s12151_s3 + $0x13d0] sm:$0xff] }
 0x35d   :  { %6653 = vmatprep.subr.bf16.mxu0 %v6772_v21  ;;  %v6412_v32 = vpack.c.bf16 %v2683_v6, %v2676_v5  ;;  %v2810_v5 = vld [vmem:[%s12151_s3 + $0x1480] sm:$0xff] }
 0x35f   :  { %6381 = vmatpush1.bf16.msra.mxu1 %v6380_v9  ;;  %v2697_v9 = vld [vmem:[%s12151_s3 + $0x10f8] sm:$0xff] }
 0x360   :  { %6383 = vmatprep.subr.bf16.mxu1 %v6382_v10  ;;  %v2705_v10 = vld [vmem:[%s12151_s3 + $0x1138] sm:$0xff]  ;;  %v6416_v14 = vpack.c.bf16 %v2697_v9, %v2690_v8  ;;  %v2824_v8 = vld [vmem:[%s12151_s3 + $0x14f0] sm:$0xff] }
 0x361   :  { %v6418_v20 = vpack.c.bf16 %v2712_v12, %v2705_v10  ;;  %v2816_v12 = vld [vmem:[%s12151_s3 + $0x14b0] sm:$0xff] }
 0x363   :  { %6385 = vmatpush1.bf16.msra.mxu1 %v6384_v22  ;;  %v2711_v22 = vld [vmem:[%s12151_s3 + $0x1168] sm:$0xff] }
 0x364   :  { %6387 = vmatprep.subr.bf16.mxu1 %v6386_v23  ;;  %v2719_v23 = vld [vmem:[%s12151_s3 + $0x11a8] sm:$0xff]  ;;  %v6420_v27 = vpack.c.bf16 %v2711_v22, %v2704_v17  ;;  %v2838_v17 = vld [vmem:[%s12151_s3 + $0x1560] sm:$0xff] }
 0x365   :  { %v6422_v28 = vpack.c.bf16 %v2726_v26, %v2719_v23  ;;  %v2830_v26 = vld [vmem:[%s12151_s3 + $0x1520] sm:$0xff] }
 0x367   :  { %6389 = vmatpush1.bf16.msra.mxu1 %v6388_v37  ;;  %v2725_v37 = vld [vmem:[%s12151_s3 + $0x11d8] sm:$0xff] }
 0x368   :  { %6391 = vmatprep.subr.bf16.mxu1 %v6390_v31  ;;  %v2733_v31 = vld [vmem:[%s12151_s3 + $0x1218] sm:$0xff]  ;;  %v6424_v57 = vpack.c.bf16 %v2725_v37, %v2718_v30  ;;  %v2832_v30 = vld [vmem:[%s12151_s3 + $0x1530] sm:$0xff]  ;;  %v2839_v37 = vld [vmem:[%s12151_s3 + $0x1568] sm:$0xff] }
 0x369   :  { %v6426_v34 = vpack.c.bf16 %v2740_v33, %v2733_v31  ;;  %v4085_v31 = vld [vmem:[%s12153_s5 + $0x80] sm:$0xff]  ;;  %v6555_v33 = vpack.c.bf16 %v2839_v37, %v2832_v30 }
 0x36a   :  { %3585 = vmatmul.mubr.f32.vlgmr.msra.gmra.mrb[14].mxu1 %v10145_v43  ;;  %v2656_v43 = vld [vmem:[%s12151_s3 + $0xfb0] sm:$0xff] }
 0x36b   :  { %6393 = vmatpush1.bf16.msra.mxu1 %v6392_v35  ;;  %3655 = vmatprep.mubr.f32.mxu1 %v10852_v0  ;;  %v6400_v0 = vpack.c.bf16 %v2641_v46, %v2634_v44  ;;  %v6402_v48 = vpack.c.bf16 %v2656_v43, %v2649_v47  ;;  %v2739_v35 = vld [vmem:[%s12151_s3 + $0x1248] sm:$0xff]  ;;  %v2768_v44 = vld [vmem:[%s12151_s3 + $0x1330] sm:$0xff] }
 0x36c   :  { %6395 = vmatprep.subr.bf16.mxu1 %v6394_v60  ;;  %v2747_v60 = vld [vmem:[%s12151_s3 + $0x1288] sm:$0xff]  ;;  %v6428_v40 = vpack.c.bf16 %v2739_v35, %v2732_v38  ;;  %v2760_v43 = vld [vmem:[%s12151_s3 + $0x12f0] sm:$0xff] }
 0x36d   :  { %v6430_v41 = vpack.c.bf16 %v2754_v36, %v2747_v60  ;;  %v4070_v38 = vld [vmem:[%s12153_s5 + $0x8] sm:$0xff]  ;;  %v4087_v60 = vld [vmem:[%s12153_s5 + $0x90] sm:$0xff]  ;;  %v4088_v36 = vld [vmem:[%s12153_s5 + $0x98] sm:$0xff] }
 0x36f   :  { %6397 = vmatpush1.bf16.msra.mxu1 %v6396_v42  ;;  %v2753_v42 = vld [vmem:[%s12151_s3 + $0x12b8] sm:$0xff] }
 0x370   :  { %6399 = vmatprep.subr.bf16.mxu1 %v6398_v45  ;;  %v2761_v45 = vld [vmem:[%s12151_s3 + $0x12f8] sm:$0xff]  ;;  %v6432_v46 = vpack.c.bf16 %v2753_v42, %v2746_v53  ;;  %v6561_v53 = vpack.c.bf16 %v4088_v36, %v4087_v60  ;;  %v4071_v42 = vld [vmem:[%s12153_s5 + $0x10] sm:$0xff] }
 0x371   :  { %v6434_v47 = vpack.c.bf16 %v2768_v44, %v2761_v45  ;;  %v4072_v45 = vld [vmem:[%s12153_s5 + $0x18] sm:$0xff]  ;;  %v11881_v44 = vld [vmem:[%s12152_s4] sm:$0x7f]  ;;  %s4562_s4 = sshll.u32 %s6774_s18, 4  ;;  %s4563_s4 = int_to_ptr.vmem [resolvable:$true] %s4562_s4 }
 0x372   :  { %s6722_s0 = scalar_lea.vmem %s4563_s4, 224  ;;  %p6727_p1 = scmp.lt.s32.totalorder %s4563_s4, %s4563_s4 }
 0x373   :  { %6401 = vmatpush1.bf16.msra.mxu1 %v6400_v0  ;;  %v2767_v0 = vld [vmem:[%s12151_s3 + $0x1328] sm:$0xff]  ;;  %p6723_p0 = scmp.ne.s32.totalorder %s4563_s4, %s6722_s0  ;;  %p6728_p2 = scmp.lt.s32.totalorder %s6722_s0, %s6722_s0 }
 0x374   :  { %6403 = vmatprep.subr.bf16.mxu1 %v6402_v48  ;;  %v2775_v48 = vld [vmem:[%s12151_s3 + $0x1368] sm:$0xff]  ;;  %v6436_v51 = vpack.c.bf16 %v2767_v0, %v2760_v43  ;;  %v2845_v43 = vrot.slane %v11881_v44, %v938_v15  ;;  %v6563_v0 = vpack.c.bf16 %v4072_v45, %v4071_v42  ;;  %v4100_v42 = vld [vmem:[%s12153_s5 + $0xf8] sm:$0xff] }
 0x375   :  { %v6438_v52 = vpack.c.bf16 %v2782_v50, %v2775_v48  ;;  %v2849_v48 = vrot.slane %v11881_v44, %v942_v18  ;;  %v2853_v50 = vrot.slane %v11881_v44, %v946_v56  ;;  %v4074_v15 = vld [vmem:[%s12153_s5 + $0x28] sm:$0xff]  ;;  %v4091_v18 = vld [vmem:[%s12153_s5 + $0xb0] sm:$0xff]  ;;  %v4092_v56 = vld [vmem:[%s12153_s5 + $0xb8] sm:$0xff]  ;;  %p6729_p3 = por %p6728_p2, %p6727_p1 }
 0x377   :  { %6405 = vmatpush1.bf16.msra.mxu1 %v6404_v58  ;;  %v2781_v58 = vld [vmem:[%s12151_s3 + $0x1398] sm:$0xff]  ;;  %p6730_p4 = pnand %p6729_p3, %p6723_p0 }
 0x378   :  { %6407 = vmatprep.subr.bf16.mxu1 %v6406_v59  ;;  %v2789_v59 = vld [vmem:[%s12151_s3 + $0x13d8] sm:$0xff]  ;;  %v6440_v1 = vpack.c.bf16 %v2781_v58, %v2774_v39 }
 0x379   :  { %v6442_v2 = vpack.c.bf16 %v2796_v24, %v2789_v59 }
 0x37b   :  { %6409 = vmatpush1.bf16.msra.mxu1 %v6408_v55  ;;  %v2795_v55 = vld [vmem:[%s12151_s3 + $0x1408] sm:$0xff] }
 0x37c   :  { %6411 = vmatprep.subr.bf16.mxu1 %v6410_v4  ;;  %v2803_v4 = vld [vmem:[%s12151_s3 + $0x1448] sm:$0xff]  ;;  %v6444_v6 = vpack.c.bf16 %v2795_v55, %v2788_v3  ;;  %v4075_v55 = vld [vmem:[%s12153_s5 + $0x30] sm:$0xff] }
 0x37d   :  { %v6446_v7 = vpack.c.bf16 %v2810_v5, %v2803_v4  ;;  %v4076_v4 = vld [vmem:[%s12153_s5 + $0x38] sm:$0xff] }
 0x37f   :  { %6413 = vmatpush1.bf16.msra.mxu1 %v6412_v32  ;;  %v2809_v32 = vld [vmem:[%s12151_s3 + $0x1478] sm:$0xff] }
 0x380   :  { %6415 = vmatprep.subr.bf16.mxu1 %v6414_v63  ;;  %v2817_v63 = vld [vmem:[%s12151_s3 + $0x14b8] sm:$0xff]  ;;  %v6448_v9 = vpack.c.bf16 %v2809_v32, %v2802_v49  ;;  %v4093_v49 = vld [vmem:[%s12153_s5 + $0xc0] sm:$0xff]  ;;  %v4094_v32 = vld [vmem:[%s12153_s5 + $0xc8] sm:$0xff] }
 0x381   :  { %v6450_v10 = vpack.c.bf16 %v2824_v8, %v2817_v63 }
 0x383   :  { %6417 = vmatpush1.bf16.msra.mxu1 %v6416_v14  ;;  %v2823_v14 = vld [vmem:[%s12151_s3 + $0x14e8] sm:$0xff] }
 0x384   :  { %6419 = vmatprep.subr.bf16.mxu1 %v6418_v20  ;;  %v2831_v20 = vld [vmem:[%s12151_s3 + $0x1528] sm:$0xff]  ;;  %v6452_v22 = vpack.c.bf16 %v2823_v14, %v2816_v12  ;;  %v6571_v12 = vpack.c.bf16 %v4076_v4, %v4075_v55  ;;  %v4153_v55 = vld [vmem:[%s12153_s5 + $0x2a0] sm:$0xff] }
 0x385   :  { %v6454_v23 = vpack.c.bf16 %v2838_v17, %v2831_v20  ;;  %v6573_v20 = vpack.c.bf16 %v4094_v32, %v4093_v49  ;;  %v4077_v17 = vld [vmem:[%s12153_s5 + $0x40] sm:$0xff]  ;;  %v4154_v4 = vld [vmem:[%s12153_s5 + $0x2a8] sm:$0xff]  ;;  %v4155_v32 = vld [vmem:[%s12153_s5 + $0x2b0] sm:$0xff] }
 0x386   :  { %v4138_v49 = vld [vmem:[%s12153_s5 + $0x228] sm:$0xff] }
 0x387   :  { %6421 = vmatpush1.bf16.msra.mxu1 %v6420_v27  ;;  %v2837_v27 = vld [vmem:[%s12151_s3 + $0x1558] sm:$0xff] }
 0x388   :  { %6423 = vmatprep.subr.bf16.mxu1 %v6422_v28  ;;  %v6456_v28 = vpack.c.bf16 %v2837_v27, %v2830_v26  ;;  %v4095_v26 = vld [vmem:[%s12153_s5 + $0xd0] sm:$0xff]  ;;  %v4096_v27 = vld [vmem:[%s12153_s5 + $0xd8] sm:$0xff] }
 0x389   :  { %v6577_v37 = vpack.c.bf16 %v4096_v27, %v4095_v26  ;;  %v4160_v26 = vld [vmem:[%s12153_s5 + $0x2d8] sm:$0xff] }
 0x38b   :  { %6425 = vmatpush1.bf16.msra.mxu1 %v6424_v57 }
 0x38c   :  { %6427 = vmatprep.subr.bf16.mxu1 %v6426_v34  ;;  %v4069_v34 = vld [vmem:[%s12153_s5] sm:$0xff] }
 0x38f   :  { %6429 = vmatpush1.bf16.msra.mxu1 %v6428_v40 }
 0x390   :  { %6431 = vmatprep.subr.bf16.mxu1 %v6430_v41  ;;  %v6559_v41 = vpack.c.bf16 %v4070_v38, %v4069_v34  ;;  %v4097_v34 = vld [vmem:[%s12153_s5 + $0xe0] sm:$0xff]  ;;  %v4098_v38 = vld [vmem:[%s12153_s5 + $0xe8] sm:$0xff] }
 0x391   :  { %v6581_v36 = vpack.c.bf16 %v4098_v38, %v4097_v34  ;;  %v2869_v34 = vrot.slane %v11881_v44, %v962_v62  ;;  %v4166_v62 = vld [vmem:[%s12153_s5 + $0x308] sm:$0xff] }
 0x393   :  { %6433 = vmatpush1.bf16.msra.mxu1 %v6432_v46  ;;  %v4089_v46 = vld [vmem:[%s12153_s5 + $0xa0] sm:$0xff] }
 0x394   :  { %6435 = vmatprep.subr.bf16.mxu1 %v6434_v47  ;;  %v4090_v47 = vld [vmem:[%s12153_s5 + $0xa8] sm:$0xff] }
 0x397   :  { %6437 = vmatpush1.bf16.msra.mxu1 %v6436_v51  ;;  %v6565_v51 = vpack.c.bf16 %v4090_v47, %v4089_v46  ;;  %v4083_v47 = vld [vmem:[%s12153_s5 + $0x70] sm:$0xff] }
 0x398   :  { %6439 = vmatprep.subr.bf16.mxu1 %v6438_v52  ;;  %v2857_v52 = vrot.slane %v11881_v44, %v950_v19  ;;  %v6569_v19 = vpack.c.bf16 %v4092_v56, %v4091_v18  ;;  %v4152_v18 = vld [vmem:[%s12153_s5 + $0x298] sm:$0xff] }
 0x39b   :  { %6441 = vmatpush1.bf16.msra.mxu1 %v6440_v1 }
 0x39c   :  { %6443 = vmatprep.subr.bf16.mxu1 %v6442_v2 }
 0x39f   :  { %6445 = vmatpush1.bf16.msra.mxu1 %v6444_v6 }
 0x3a0   :  { %6447 = vmatprep.subr.bf16.mxu1 %v6446_v7 }
 0x3a3   :  { %6449 = vmatpush1.bf16.msra.mxu1 %v6448_v9 }
 0x3a4   :  { %6451 = vmatprep.subr.bf16.mxu1 %v6450_v10 }
 0x3a7   :  { %6453 = vmatpush1.bf16.msra.mxu1 %v6452_v22  ;;  %v4078_v22 = vld [vmem:[%s12153_s5 + $0x48] sm:$0xff] }
 0x3a8   :  { %6455 = vmatprep.subr.bf16.mxu1 %v6454_v23  ;;  %v6575_v30 = vpack.c.bf16 %v4078_v22, %v4077_v17  ;;  %v4141_v17 = vld [vmem:[%s12153_s5 + $0x240] sm:$0xff]  ;;  %v4142_v22 = vld [vmem:[%s12153_s5 + $0x248] sm:$0xff] }
 0x3a9   :  { %v6639_v27 = vpack.c.bf16 %v4142_v22, %v4141_v17  ;;  %v4460_v17 = vld [vmem:[%s12155_s7] sm:$0xff] }
 0x3aa   :  { %3656 = vmatmul.mubr.f32.vlgmr.msra.gmra.mrb[14].mxu1 %v10854_v25  ;;  %v4086_v25 = vld [vmem:[%s12153_s5 + $0x88] sm:$0xff] }
 0x3ab   :  { %6457 = vmatpush1.bf16.msra.mxu1 %v6456_v28  ;;  %3726 = vmatprep.mubr.f32.mxu1 %v6771_v54  ;;  %v6557_v57 = vpack.c.bf16 %v4086_v25, %v4085_v31  ;;  %v4079_v31 = vld [vmem:[%s12153_s5 + $0x50] sm:$0xff]  ;;  %v4080_v25 = vld [vmem:[%s12153_s5 + $0x58] sm:$0xff] }
 0x3ac   :  { %6554 = vmatprep.subr.bf16.mxu1 %v6772_v21 }
 0x3b1   :  { %v3373_v35 = vpop.f32.mrb[4].mxu0 }
 0x3b2   :  { %4576 = vmatmul.mubr.msk.f32.vlgmr.msra.gmra.mrb[14].mxu1 %vm2877_vm0, %v10902_v29  ;;  %v3375_v40 = vpop.f32.mrb[5].mxu0  ;;  %v6673_v2 = vadd.f32 %v3373_v35, %v2853_v50  ;;  %v6579_v35 = vpack.c.bf16 %v4080_v25, %v4079_v31  ;;  %v4161_v31 = vld [vmem:[%s12153_s5 + $0x2e0] sm:$0xff]  ;;  %v4162_v25 = vld [vmem:[%s12153_s5 + $0x2e8] sm:$0xff] }
 0x3b3   :  { %6556 = vmatpush3.bf16.msra.mxu1 %v6555_v33  ;;  %4949 = vmatprep.mubr.msk.f32.mxu1 %vm6773_vm1, %v6771_v54  ;;  %v6675_v5 = vadd.f32 %v3375_v40, %v2857_v52  ;;  %v4081_v40 = vld [vmem:[%s12153_s5 + $0x60] sm:$0xff] }
 0x3b4   :  { %6558 = vmatprep.subr.bf16.mxu1 %v6557_v57 }
 0x3b6   :  { %4950 = vmatmul.mubr.msk.f32.vlgmr.msra.gmra.mrb[16].mxu1 %vm2877_vm0, %v10902_v29  ;;  %v4073_v29 = vld [vmem:[%s12153_s5 + $0x20] sm:$0xff] }
 0x3b7   :  { %6560 = vmatpush3.bf16.msra.mxu1 %v6559_v41  ;;  %v6567_v1 = vpack.c.bf16 %v4074_v15, %v4073_v29  ;;  %v4082_v41 = vld [vmem:[%s12153_s5 + $0x68] sm:$0xff]  ;;  %v4133_v29 = vld [vmem:[%s12153_s5 + $0x200] sm:$0xff] }
 0x3b8   :  { %6562 = vmatprep.subr.bf16.mxu1 %v6561_v53  ;;  %v4099_v53 = vld [vmem:[%s12153_s5 + $0xf0] sm:$0xff]  ;;  %v6583_v45 = vpack.c.bf16 %v4082_v41, %v4081_v40  ;;  %v4134_v15 = vld [vmem:[%s12153_s5 + $0x208] sm:$0xff]  ;;  %v4145_v41 = vld [vmem:[%s12153_s5 + $0x260] sm:$0xff] }
 0x3b9   :  { %v3160_v39 = vpop.f32.mrb[10].mxu1  ;;  %v6585_v46 = vpack.c.bf16 %v4100_v42, %v4099_v53  ;;  %v4146_v53 = vld [vmem:[%s12153_s5 + $0x268] sm:$0xff] }
 0x3ba   :  { %v11915_v58 = vadd.f32 %v3160_v39, %v2845_v43  ;;  %v3162_v59 = vpop.f32.mrb[11].mxu1  ;;  %v4084_v43 = vld [vmem:[%s12153_s5 + $0x78] sm:$0xff]  ;;  %v4151_v39 = vld [vmem:[%s12153_s5 + $0x290] sm:$0xff]  ;;  %v6647_v42 = vpack.c.bf16 %v4146_v53, %v4145_v41 }
 0x3bb   :  { %6564 = vmatpush3.bf16.msra.mxu1 %v6563_v0  ;;  %v6672_v24 = vadd.f32 %v3162_v59, %v2849_v48  ;;  %v4149_v0 = vld [vmem:[%s12153_s5 + $0x280] sm:$0xff]  ;;  %v4150_v48 = vld [vmem:[%s12153_s5 + $0x288] sm:$0xff]  ;;  %v6587_v50 = vpack.c.bf16 %v4084_v43, %v4083_v47  ;;  %v4163_v47 = vld [vmem:[%s12153_s5 + $0x2f0] sm:$0xff] }
 0x3bc   :  { %v4013_v3 = vmax.f32 %v11915_v58, 0.0  ;;  %6566 = vmatprep.subr.bf16.mxu1 %v6565_v51  ;;  %v6621_v51 = vpack.c.bf16 %v4150_v48, %v4149_v0  ;;  %v4156_v58 = vld [vmem:[%s12153_s5 + $0x2b8] sm:$0xff]  ;;  %v4147_v48 = vld [vmem:[%s12153_s5 + $0x270] sm:$0xff] }
 0x3bd   :  { %v4014_v6 = vmax.f32 %v6672_v24, 0.0  ;;  %v3444_v7 = vpop.f32.mrb[12].mxu1  ;;  %v6623_v24 = vpack.c.bf16 %v4134_v15, %v4133_v29  ;;  %v4164_v43 = vld [vmem:[%s12153_s5 + $0x2f8] sm:$0xff]  ;;  %v4167_v29 = vld [vmem:[%s12153_s5 + $0x310] sm:$0xff] }
 0x3be   :  { %v6674_v63 = vadd.f32 %v6673_v2, %v3444_v7  ;;  %v3446_v8 = vpop.f32.mrb[13].mxu1  ;;  %v4135_v2 = vld [vmem:[%s12153_s5 + $0x210] sm:$0xff]  ;;  %v4137_v7 = vld [vmem:[%s12153_s5 + $0x220] sm:$0xff]  ;;  %v6649_v0 = vpack.c.bf16 %v4164_v43, %v4163_v47  ;;  %v4168_v15 = vld [vmem:[%s12153_s5 + $0x318] sm:$0xff] }
 0x3bf   :  { %v4027_v9 = vcombine.low %v4013_v3, %v4014_v6  ;;  %6568 = vmatpush3.bf16.msra.mxu1 %v6567_v1  ;;  %v6676_v10 = vadd.f32 %v6675_v5, %v3446_v8  ;;  %4243 = vmatprep.mubr.f32.mxu1 %v4014_v6  ;;  %v6625_v1 = vpack.c.bf16 %v4152_v18, %v4151_v39  ;;  %v4139_v8 = vld [vmem:[%s12153_s5 + $0x230] sm:$0xff] }
 0x3c0   :  { %v4015_v14 = vmax.f32 %v6674_v63, 0.0  ;;  %6570 = vmatprep.subr.bf16.mxu1 %v6569_v19  ;;  %v4136_v19 = vld [vmem:[%s12153_s5 + $0x218] sm:$0xff]  ;;  %v6629_v6 = vpack.c.bf16 %v4154_v4, %v4153_v55  ;;  %v6633_v63 = vpack.c.bf16 %v4156_v58, %v4155_v32 }
 0x3c1   :  { %v4016_v23 = vmax.f32 %v6676_v10, 0.0  ;;  %v4035_v33 = vrot.slane %v4027_v9, %v7110_v11  ;;  %v6627_v5 = vpack.c.bf16 %v4136_v19, %v4135_v2  ;;  %v4140_v9 = vld [vmem:[%s12153_s5 + $0x238] sm:$0xff]  ;;  %v4157_v10 = vld [vmem:[%s12153_s5 + $0x2c0] sm:$0xff] }
 0x3c3   :  { %v4028_v28 = vcombine.low %v4015_v14, %v4016_v23  ;;  %6572 = vmatpush3.bf16.msra.mxu1 %v6571_v12  ;;  %4313 = vmatprep.mubr.f32.mxu0 %v4016_v23  ;;  %v4158_v12 = vld [vmem:[%s12153_s5 + $0x2c8] sm:$0xff]  ;;  %v4159_v23 = vld [vmem:[%s12153_s5 + $0x2d0] sm:$0xff] }
 0x3c4   :  { %6574 = vmatprep.subr.bf16.mxu1 %v6573_v20  ;;  %4314 = vmatmul.mubr.f32.vlgmr.msra.gmra.mrb[12].mxu0 %v4015_v14  ;;  %v6635_v14 = vpack.c.bf16 %v4140_v9, %v4139_v8  ;;  %v6637_v20 = vpack.c.bf16 %v4158_v12, %v4157_v10  ;;  %v4578_v10 = vld [vmem:[%s12154_s6] ss:$0 sm:$0xff] }
 0x3c5   :  { %v4042_v57 = vrot.slane %v4028_v28, %v7110_v11  ;;  %4960 = vmatprep.mubr.msk.f32.mxu0 %vm6773_vm1, %v6771_v54  ;;  %v6641_v28 = vpack.c.bf16 %v4160_v26, %v4159_v23  ;;  %v4462_v23 = vld [vmem:[%s12155_s7 + $0x10] sm:$0xff]  ;;  %v4463_v26 = vld [vmem:[%s12155_s7 + $0x18] sm:$0xff] }
 0x3c7   :  { %6576 = vmatpush3.bf16.msra.mxu1 %v6575_v30  ;;  %v4043_v60 = vcombine.low %v4035_v33, %v4042_v57  ;;  %v4143_v30 = vld [vmem:[%s12153_s5 + $0x250] sm:$0xff]  ;;  %v6645_v57 = vpack.c.bf16 %v4162_v25, %v4161_v31 }
 0x3c8   :  { %6578 = vmatprep.subr.bf16.mxu1 %v6577_v37  ;;  %v4144_v37 = vld [vmem:[%s12153_s5 + $0x258] sm:$0xff] }
 0x3c9   :  { %4062 = vst [vmem:[#allocation4] sm:$0xff] %v4043_v60  ;;  %v6643_v33 = vpack.c.bf16 %v4144_v37, %v4143_v30 }
 0x3cb   :  { %6580 = vmatpush3.bf16.msra.mxu1 %v6579_v35 }
 0x3cc   :  { %6582 = vmatprep.subr.bf16.mxu1 %v6581_v36 }
 0x3cf   :  { %6584 = vmatpush3.bf16.msra.mxu1 %v6583_v45  ;;  %v4165_v45 = vld [vmem:[%s12153_s5 + $0x300] sm:$0xff] }
 0x3d0   :  { %6586 = vmatprep.subr.bf16.mxu1 %v6585_v46  ;;  %v6654_v46 = vpack.c.bf16 %v4166_v62, %v4165_v45 }
 0x3d1   :  { %v4754_v52 = vpop.f32.mrb[6].mxu0 }
 0x3d2   :  { %v4755_v56 = vpop.f32.mrb[7].mxu0  ;;  %6655 = vmatpush3.bf16.msra.mxu0 %v6654_v46 }
 0x3d3   :  { %v4756_v59 = vadd.f32 %v4755_v56, %v4754_v52  ;;  %6588 = vmatpush3.bf16.msra.mxu1 %v6587_v50  ;;  %v4148_v50 = vld [vmem:[%s12153_s5 + $0x278] sm:$0xff]  ;;  %6656 = vmatprep.subr.bf16.mxu0 %v6772_v21  ;;  %v6657_v52 = vpack.c.bf16 %v4168_v15, %v4167_v29 }
 0x3d4   :  { %6622 = vmatprep.subr.bf16.mxu1 %v6621_v51  ;;  %v6651_v51 = vpack.c.bf16 %v4148_v50, %v4147_v48 }
 0x3d5   :  { %v3800_v60 = vadd.f32 %v4756_v59, %v2869_v34 }
 0x3d6   :  { %4244 = vmatmul.mubr.f32.vlgmr.msra.gmra.mrb[18].mxu1 %v4013_v3  ;;  %v6631_v3 = vpack.c.bf16 %v4138_v49, %v4137_v7  ;;  %6658 = vmatpush3.bf16.msra.mxu0 %v6657_v52 }
 0x3d7   :  { %6624 = vmatpush3.bf16.msra.mxu1 %v6623_v24  ;;  %6659 = vmatprep.subr.bf16.mxu0 %v6772_v21  ;;  %v2861_v24 = vrot.slane %v11881_v44, %v954_v13 }
 0x3d8   :  { %6626 = vmatprep.subr.bf16.mxu1 %v6625_v1  ;;  %v2865_v1 = vrot.slane %v11881_v44, %v958_v16 }
 0x3db   :  { %6628 = vmatpush3.bf16.msra.mxu1 %v6627_v5 }
 0x3dc   :  { %6630 = vmatprep.subr.bf16.mxu1 %v6629_v6 }
 0x3df   :  { %6632 = vmatpush3.bf16.msra.mxu1 %v6631_v3 }
 0x3e0   :  { %6634 = vmatprep.subr.bf16.mxu1 %v6633_v63 }
 0x3e3   :  { %6636 = vmatpush3.bf16.msra.mxu1 %v6635_v14 }
 0x3e4   :  { %6638 = vmatprep.subr.bf16.mxu1 %v6637_v20 }
 0x3e7   :  { %6640 = vmatpush3.bf16.msra.mxu1 %v6639_v27  ;;  %v6663_v27 = vpack.c.bf16 %v4463_v26, %v4462_v23 }
 0x3e8   :  { %6642 = vmatprep.subr.bf16.mxu1 %v6641_v28 }
 0x3eb   :  { %6644 = vmatpush3.bf16.msra.mxu1 %v6643_v33 }
 0x3ec   :  { %6646 = vmatprep.subr.bf16.mxu1 %v6645_v57 }
 0x3ef   :  { %6648 = vmatpush3.bf16.msra.mxu1 %v6647_v42 }
 0x3f0   :  { %6650 = vmatprep.subr.bf16.mxu1 %v6649_v0 }
 0x3f1   :  { %v4789_v38 = vpop.f32.mrb[8].mxu0 }
 0x3f2   :  { %v4790_v35 = vpop.f32.mrb[9].mxu0 }
 0x3f3   :  { %v4791_v36 = vadd.f32 %v4790_v35, %v4789_v38  ;;  %6652 = vmatpush3.bf16.msra.mxu1 %v6651_v51 }
 0x3f5   :  { %v3870_v40 = vadd.f32 %v4791_v36, %v3800_v60 }
 0x412   :  { %v4824_v39 = vpop.f32.mrb[10].mxu0 }
 0x413   :  { %v4825_v18 = vpop.f32.mrb[11].mxu0 }
 0x414   :  { %v4826_v56 = vadd.f32 %v4825_v18, %v4824_v39 }
 0x416   :  { %v3940_v59 = vadd.f32 %v4826_v56, %v3870_v40 }
 0x485   :  { %v3728_v2 = vpop.f32.mrb[14].mxu1 }
 0x486   :  { %v6677_v19 = vadd.f32 %v3728_v2, %v2861_v24  ;;  %v3730_v55 = vpop.f32.mrb[15].mxu1 }
 0x487   :  { %v6678_v4 = vadd.f32 %v3730_v55, %v2865_v1 }
 0x488   :  { %v4017_v5 = vmax.f32 %v6677_v19, 0.0 }
 0x489   :  { %v4018_v6 = vmax.f32 %v6678_v4, 0.0  ;;  %v4009_v7 = vpop.f32.mrb[16].mxu1 }
 0x48a   :  { %v4010_v49 = vadd.f32 %v4009_v7, %v3940_v59  ;;  %v4951_v32 = vpop.f32.mrb[17].mxu1 }
 0x48b   :  { %v4044_v58 = vcombine.low %v4017_v5, %v4018_v6  ;;  %4383 = vmatprep.mubr.f32.mxu1 %v4018_v6 }
 0x48c   :  { %v4019_v3 = vmax.f32 %v4010_v49, 0.0  ;;  %4384 = vmatmul.mubr.f32.vlgmr.msra.gmra.mrb[20].mxu1 %v4017_v5 }
 0x48d   :  { %v4051_v61 = vrot.slane %v4044_v58, %v7110_v11 }
 0x48e   :  { %v4058_v13 = vrot.slane %v4019_v3, %v7110_v11  ;;  %4961 = vmatmul.mubr.msk.f32.vlgmr.msra.gmra.mrb[14].mxu0 %vm4176_vm4, %v4019_v3 }
 0x48f   :  { %4971 = vmatprep.mubr.msk.f32.mxu0 %vm6773_vm1, %v6771_v54  ;;  %v4461_v54 = vld [vmem:[%s12155_s7 + $0x8] sm:$0xff] }
 0x490   :  { %v4059_v16 = vcombine.low %v4051_v61, %v4058_v13  ;;  %v6660_v22 = vpack.c.bf16 %v4461_v54, %v4460_v17 }
 0x492   :  { %4068 = vst.msk [vmem:[#allocation4 + $0x8] sm:$0x3f] %vm4067_vm7, %v4059_v16  ;;  %6661 = vmatpush3.bf16.msra.mxu0 %v6660_v22 }
 0x493   :  { %6662 = vmatprep.subr.bf16.mxu0 %v6772_v21 }
 0x496   :  { %6664 = vmatpush3.bf16.msra.mxu0 %v6663_v27 }
 0x497   :  { %v4897_v44 = vpop.f32.mrb[12].mxu0 }
 0x498   :  { %v4898_v63 = vpop.f32.mrb[13].mxu0 }
 0x499   :  { %v4899_v8 = vadd.f32 %v4898_v63, %v4897_v44 }
 0x4a9   :  { %v4862_v9 = vpop.f32.mrb[18].mxu1 }
 0x4aa   :  { %v4863_v12 = vpop.f32.mrb[19].mxu1 }
 0x4ab   :  { %v4864_v14 = vadd.f32 %v4863_v12, %v4862_v9 }
 0x4ad   :  { %v4246_v20 = vadd.f32 %v4864_v14, %v4578_v10 }
 0x4af   :  { %v4316_v11 = vadd.f32 %v4899_v8, %v4246_v20 }
 0x55f   :  { %v4932_v28 = vpop.f32.mrb[20].mxu1 }
 0x560   :  { %v4933_v30 = vpop.f32.mrb[21].mxu1 }
 0x561   :  { %v4934_v37 = vadd.f32 %v4933_v30, %v4932_v28  ;;  %v4455_v31 = vpop.f32.mrb[14].mxu0 }
 0x562   :  { %v4962_v25 = vpop.f32.mrb[15].mxu0 }
 0x563   :  { %v4386_v33 = vadd.f32 %v4934_v37, %v4316_v11 }
 0x565   :  { %v4456_v57 = vadd.f32 %v4455_v31, %v4386_v33 }
 0x567   :  { %v4459_v34 = vmax.f32 %v4456_v57, 0.0 }
 0x569   :  { %4972 = vmatmul.mubr.msk.f32.vlgmr.msra.gmra.mrb[16].mxu0 %vm4176_vm4, %v4459_v34 }
 0x56a   :  { %6733 = shalt.err (!%p6730_p4)
}
 0x56b   :  { %s6734_s20 = scalar_lea.hbm %s12158_s10, 224 }
 0x56c   :  { %p6735_p5 = scmp.ne.s32.totalorder %s12158_s10, %s6734_s20  ;;  %p6738_p6 = scmp.lt.u32.totalorder %s6734_s20, %s12158_s10 }
 0x56e   :  { %p6740_p7 = pnand %p6738_p6, %p6735_p5 }
 0x570   :  { %6743 = shalt.err (!%p6740_p7)
}
 0x571   :  { %4565 = dma.vmem_to_hbm [thread:$0]  %s4563_s4, 224, %s12158_s10, [#allocation5]   ;;  %v4580_v21 = vld [vmem:[%s12156_s8] ss:$0 sm:$0xff]  ;;  %vm4544_vm8 = vcmask 41984  }
 0x572   :  { %s6775_s28 = smov [#allocation2]  }
 0x573   :  { %s4552_s29 = sshll.u32 %s6775_s28, 4  ;;  %s4553_s29 = int_to_ptr.vmem [resolvable:$true] %s4552_s29 }
 0x574   :  { %s6744_s30 = scalar_lea.vmem %s4553_s29, 32  ;;  %p6749_p9 = scmp.lt.s32.totalorder %s4553_s29, %s4553_s29 }
 0x575   :  { %p6745_p8 = scmp.ne.s32.totalorder %s4553_s29, %s6744_s30  ;;  %p6750_p10 = scmp.lt.s32.totalorder %s6744_s30, %s6744_s30 }
 0x577   :  { %p6751_p11 = por %p6750_p10, %p6749_p9 }
 0x579   :  { %p6752_p12 = pnand %p6751_p11, %p6745_p8 }
 0x63c   :  { %v4540_v38 = vpop.f32.mrb[16].mxu0 }
 0x63d   :  { %v4541_v35 = vadd.f32 %v4580_v21, %v4540_v38  ;;  %v4973_v60 = vpop.f32.mrb[17].mxu0 }
 0x63f   :  { %4545 = vst.msk [vmem:[#allocation2] sm:$0x3] %vm4544_vm8, %v4541_v35 }
 0x640   :  { %6755 = shalt.err (!%p6752_p12)
}
 0x641   :  { %s6756_s5 = scalar_lea.hbm %s12157_s9, 32 }
 0x642   :  { %p6757_p13 = scmp.ne.s32.totalorder %s12157_s9, %s6756_s5  ;;  %p6760_p0 = scmp.lt.u32.totalorder %s6756_s5, %s12157_s9 }
 0x644   :  { %p6762_p1 = pnand %p6760_p0, %p6757_p13 }
 0x646   :  { %6765 = shalt.err (!%p6762_p1)
}
 0x647   :  { %4555 = dma.vmem_to_hbm [thread:$0]  %s4553_s29, 32, %s12157_s9, [#allocation3]  }
 0x648   :  { %6766 = dma.done.wait [#allocation3], 32  }
 0x649   :  { %6767 = vsyncadd [#allocation3], 4294967264 }
 0x64a   :  { %6768 = dma.done.wait [#allocation5], 224  }
 0x64b   :  { %6769 = vsyncadd [#allocation5], 4294967072 }
 0x64c   :  { %4572 = vsyncpa [#allocation3], 1 }
 0x64d   :  { %4573 = vsyncpa [#allocation5], 1 }

</bundles_post_ra>
